<compile_context>
chip_gen: v6e
topology: v6e:2x2x1
jax: 0.10.0
libtpu: 0.0.40
codegen_flags: <defaults>
</compile_context>

<pallas_src>
import jax
import jax.numpy as jnp
from jax.experimental import pallas as pl
from jax.experimental.pallas import tpu as pltpu


def _residual_block_kernel(x_ref, w1_ref, b1_ref, w2_ref, b2_ref, o_ref, xpad, ypad):
    # x_ref : (1, H, W, C)  NHWC slab for this batch element
    # w*_ref: (9, C, C)     tap-major folded conv weights (tap k = kh*3 + kw)
    # b*_ref: (1, C)        folded per-channel bias (BN shift [+ conv bias])
    # o_ref : (1, H, W, C)
    # xpad, ypad: VMEM (H+2, W+2, C) f32 scratch holding zero-padded activations
    _, H, W, C = x_ref.shape
    HW = H * W

    # relu(x) into a zero-padded scratch (zero border == the conv's padding=1).
    xpad[...] = jnp.zeros_like(xpad)
    xpad[pl.ds(1, H), pl.ds(1, W), :] = jnp.maximum(x_ref[0], 0.0)

    def conv3x3(src_pad, w_ref, b_ref):
        acc = jnp.zeros((HW, C), jnp.float32)
        for k in range(9):                       # static unroll: 9 MXU matmuls
            kh, kw = divmod(k, 3)
            tap = src_pad[pl.ds(kh, H), pl.ds(kw, W), :].reshape(HW, C)
            acc += jnp.dot(tap, w_ref[k], preferred_element_type=jnp.float32)
        return acc + b_ref[...]                  # (1, C) bias broadcast

    # conv1 (+ folded BN1) + relu -> second zero-padded scratch
    y1 = jnp.maximum(conv3x3(xpad, w1_ref, b1_ref), 0.0)
    ypad[...] = jnp.zeros_like(ypad)
    ypad[pl.ds(1, H), pl.ds(1, W), :] = y1.reshape(H, W, C)

    # conv2 (+ folded BN2) + residual add + relu
    y2 = conv3x3(ypad, w2_ref, b2_ref)
    res = xpad[pl.ds(1, H), pl.ds(1, W), :].reshape(HW, C)   # == relu(x)
    out = jnp.maximum(y2 + res, 0.0)
    o_ref[...] = out.reshape(1, H, W, C).astype(o_ref.dtype)


def _fold_bn_into_conv(w_oihw, conv_bias, gamma, beta, mean, var, eps):
    # BN(conv(x) + b) == conv_scaled(x) + (scale*(b - mean) + beta)
    scale = gamma / jnp.sqrt(var + eps)                     # (Cout,)
    w_f = w_oihw * scale[:, None, None, None]
    b_f = beta - mean * scale
    if conv_bias is not None:
        b_f = b_f + conv_bias * scale
    return w_f, b_f


def _to_taps(w_oihw):
    # (Cout, Cin, 3, 3) -> (9, Cin, Cout), tap k = kh*3 + kw
    c_out, c_in = w_oihw.shape[0], w_oihw.shape[1]
    return jnp.transpose(w_oihw, (2, 3, 1, 0)).reshape(9, c_in, c_out)


def resnet18_layer2(x_nchw, w1, bn1_g, bn1_b, bn1_m, bn1_v,
                    w2, conv2_b, bn2_g, bn2_b, bn2_m, bn2_v, eps=1e-5):
    """x_nchw: [B, 64, H, W] f32; conv weights in PyTorch OIHW layout."""
    B, C, H, W = x_nchw.shape
    assert w1.shape == (C, C, 3, 3) and w2.shape == (C, C, 3, 3)

    # Static weight-side math: fold eval-mode BN into the convs (free at runtime).
    w1_f, b1_f = _fold_bn_into_conv(w1, None, bn1_g, bn1_b, bn1_m, bn1_v, eps)
    w2_f, b2_f = _fold_bn_into_conv(w2, conv2_b, bn2_g, bn2_b, bn2_m, bn2_v, eps)
    w1_t, w2_t = _to_taps(w1_f), _to_taps(w2_f)
    b1_r, b2_r = b1_f.reshape(1, C), b2_f.reshape(1, C)

    x_nhwc = jnp.transpose(x_nchw, (0, 2, 3, 1))            # channels -> lane axis

    out_nhwc = pl.pallas_call(
        _residual_block_kernel,
        out_shape=jax.ShapeDtypeStruct((B, H, W, C), x_nchw.dtype),
        grid_spec=pltpu.PrefetchScalarGridSpec(
            num_scalar_prefetch=0,
            grid=(B,),
            in_specs=[
                pl.BlockSpec((1, H, W, C), lambda b: (b, 0, 0, 0)),
                pl.BlockSpec((9, C, C), lambda b: (0, 0, 0)),   # grid-invariant
                pl.BlockSpec((1, C), lambda b: (0, 0)),
                pl.BlockSpec((9, C, C), lambda b: (0, 0, 0)),   # grid-invariant
                pl.BlockSpec((1, C), lambda b: (0, 0)),
            ],
            out_specs=pl.BlockSpec((1, H, W, C), lambda b: (b, 0, 0, 0)),
            scratch_shapes=[
                pltpu.VMEM((H + 2, W + 2, C), jnp.float32),
                pltpu.VMEM((H + 2, W + 2, C), jnp.float32),
            ],
        ),
        compiler_params=pltpu.CompilerParams(
            dimension_semantics=("parallel",),
        ),
    )(x_nhwc, w1_t, b1_r, w2_t, b2_r)

    return jnp.transpose(out_nhwc, (0, 3, 1, 2))            # back to NCHW


if __name__ == "__main__":
    B, C, H, W = 2, 64, 16, 16          # channel count is fixed at 64 by the module
    eps = 1e-5
    key = jax.random.PRNGKey(0)
    ks = jax.random.split(key, 12)

    x = jax.random.normal(ks[0], (B, C, H, W), dtype=jnp.float32)

    bound = 1.0 / (C * 9) ** 0.5        # PyTorch default conv init range
    w1 = jax.random.uniform(ks[1], (C, C, 3, 3), minval=-bound, maxval=bound, dtype=jnp.float32)
    w2 = jax.random.uniform(ks[2], (C, C, 3, 3), minval=-bound, maxval=bound, dtype=jnp.float32)
    conv2_b = jax.random.uniform(ks[3], (C,), minval=-bound, maxval=bound, dtype=jnp.float32)

    bn1_g = jax.random.uniform(ks[4], (C,), minval=0.5, maxval=1.5, dtype=jnp.float32)
    bn1_b = 0.1 * jax.random.normal(ks[5], (C,), dtype=jnp.float32)
    bn1_m = 0.1 * jax.random.normal(ks[6], (C,), dtype=jnp.float32)
    bn1_v = jax.random.uniform(ks[7], (C,), minval=0.5, maxval=1.5, dtype=jnp.float32)
    bn2_g = jax.random.uniform(ks[8], (C,), minval=0.5, maxval=1.5, dtype=jnp.float32)
    bn2_b = 0.1 * jax.random.normal(ks[9], (C,), dtype=jnp.float32)
    bn2_m = 0.1 * jax.random.normal(ks[10], (C,), dtype=jnp.float32)
    bn2_v = jax.random.uniform(ks[11], (C,), minval=0.5, maxval=1.5, dtype=jnp.float32)

    fwd = jax.jit(resnet18_layer2)
    y = fwd(x, w1, bn1_g, bn1_b, bn1_m, bn1_v, w2, conv2_b, bn2_g, bn2_b, bn2_m, bn2_v)
    y = jax.block_until_ready(y)

    # --- pure-JAX reference of the PyTorch forward (eval-mode BN) ---
    def conv(t, w):
        return jax.lax.conv_general_dilated(
            t, w, window_strides=(1, 1), padding=((1, 1), (1, 1)),
            dimension_numbers=("NCHW", "OIHW", "NCHW"),
            precision=jax.lax.Precision.HIGHEST)

    def bn(t, g, b, m, v):
        s = g / jnp.sqrt(v + eps)
        return t * s[None, :, None, None] + (b - m * s)[None, :, None, None]

    r1 = jnp.maximum(x, 0.0)
    t = jnp.maximum(bn(conv(r1, w1), bn1_g, bn1_b, bn1_m, bn1_v), 0.0)
    t = bn(conv(t, w2) + conv2_b[None, :, None, None], bn2_g, bn2_b, bn2_m, bn2_v)
    y_ref = jnp.maximum(t + r1, 0.0)

    assert y.shape == (B, C, H, W)
    assert jnp.allclose(y, y_ref, atol=1e-2, rtol=1e-2), "mismatch vs reference"
    print("KERNEL_OK")
</pallas_src>

<mosaic_0001>
module attributes {stable_mosaic.version = 11 : i64} {
  func.func @_residual_block_kernel(%arg0: i32, %arg1: memref<1x16x16x64xf32, #tpu.memory_space<vmem>>, %arg2: memref<9x64x64xf32, #tpu.memory_space<vmem>>, %arg3: memref<1x64xf32, #tpu.memory_space<vmem>>, %arg4: memref<9x64x64xf32, #tpu.memory_space<vmem>>, %arg5: memref<1x64xf32, #tpu.memory_space<vmem>>, %arg6: memref<1x16x16x64xf32, #tpu.memory_space<vmem>>, %arg7: memref<18x18x64xf32, #tpu.memory_space<vmem>>, %arg8: memref<18x18x64xf32, #tpu.memory_space<vmem>>) attributes {dimension_semantics = [#tpu.dimension_semantics<parallel>], iteration_bounds = array<i64: 2>, scalar_prefetch = 0 : i64, scratch_operands = 2 : i64, tpu.core_type = #tpu.core_type<tc>, window_params = [{transform_indices = @transform_0, window_bounds = array<i64: 1, 16, 16, 64>}, {pipeline_mode = #tpu.pipeline_mode<synchronous>, transform_indices = @transform_1, window_bounds = array<i64: 9, 64, 64>}, {pipeline_mode = #tpu.pipeline_mode<synchronous>, transform_indices = @transform_2, window_bounds = array<i64: 1, 64>}, {pipeline_mode = #tpu.pipeline_mode<synchronous>, transform_indices = @transform_3, window_bounds = array<i64: 9, 64, 64>}, {pipeline_mode = #tpu.pipeline_mode<synchronous>, transform_indices = @transform_4, window_bounds = array<i64: 1, 64>}, {transform_indices = @transform_5, window_bounds = array<i64: 1, 16, 16, 64>}]} {
    %cst = arith.constant 0.000000e+00 : f32
    %0 = vector.broadcast %cst : f32 to vector<18x18x64xf32>
    %c0 = arith.constant 0 : index
    %c0_0 = arith.constant 0 : index
    %c0_1 = arith.constant 0 : index
    %1 = vector.load %arg7[%c0, %c0_0, %c0_1] : memref<18x18x64xf32, #tpu.memory_space<vmem>>, vector<18x18x64xf32>
    tpu.vector_store %arg7[%c0, %c0_0, %c0_1], %0 {strides = array<i32>} : memref<18x18x64xf32, #tpu.memory_space<vmem>>, vector<18x18x64xf32>,
    %c0_2 = arith.constant 0 : index
    %c0_3 = arith.constant 0 : index
    %c0_4 = arith.constant 0 : index
    %c0_5 = arith.constant 0 : index
    %2 = vector.load %arg1[%c0_2, %c0_3, %c0_4, %c0_5] : memref<1x16x16x64xf32, #tpu.memory_space<vmem>>, vector<1x16x16x64xf32>
    %3 = vector.shape_cast %2 : vector<1x16x16x64xf32> to vector<16x16x64xf32>
    %cst_6 = arith.constant 0.000000e+00 : f32
    %4 = vector.broadcast %cst_6 : f32 to vector<16x16x64xf32>
    %5 = arith.maximumf %3, %4 : vector<16x16x64xf32>
    %c1 = arith.constant 1 : index
    %c1_7 = arith.constant 1 : index
    %c0_8 = arith.constant 0 : index
    %6 = vector.load %arg7[%c1, %c1_7, %c0_8] : memref<18x18x64xf32, #tpu.memory_space<vmem>>, vector<16x16x64xf32>
    tpu.vector_store %arg7[%c1, %c1_7, %c0_8], %5 {strides = array<i32>} : memref<18x18x64xf32, #tpu.memory_space<vmem>>, vector<16x16x64xf32>,
    %cst_9 = arith.constant 0.000000e+00 : f32
    %7 = vector.broadcast %cst_9 : f32 to vector<256x64xf32>
    %c0_10 = arith.constant 0 : index
    %c0_11 = arith.constant 0 : index
    %c0_12 = arith.constant 0 : index
    %8 = vector.load %arg7[%c0_10, %c0_11, %c0_12] : memref<18x18x64xf32, #tpu.memory_space<vmem>>, vector<16x16x64xf32>
    %9 = vector.shape_cast %8 : vector<16x16x64xf32> to vector<256x64xf32>
    %c0_13 = arith.constant 0 : index
    %c0_14 = arith.constant 0 : index
    %c0_15 = arith.constant 0 : index
    %10 = vector.load %arg2[%c0_13, %c0_14, %c0_15] : memref<9x64x64xf32, #tpu.memory_space<vmem>>, vector<1x64x64xf32>
    %11 = vector.shape_cast %10 : vector<1x64x64xf32> to vector<64x64xf32>
    %cst_16 = arith.constant dense<0.000000e+00> : vector<256x64xf32>
    %12 = tpu.matmul %9, %11, %cst_16 {dimension_numbers = #tpu.dot_dimension_numbers<[1], [0], [0], [1], [0, 0, 1, 1], [], []>} : vector<256x64xf32>, vector<64x64xf32>, vector<256x64xf32> -> vector<256x64xf32>
    %13 = arith.addf %7, %12 : vector<256x64xf32>
    %c0_17 = arith.constant 0 : index
    %c1_18 = arith.constant 1 : index
    %c0_19 = arith.constant 0 : index
    %14 = vector.load %arg7[%c0_17, %c1_18, %c0_19] : memref<18x18x64xf32, #tpu.memory_space<vmem>>, vector<16x16x64xf32>
    %15 = vector.shape_cast %14 : vector<16x16x64xf32> to vector<256x64xf32>
    %c1_20 = arith.constant 1 : index
    %c0_21 = arith.constant 0 : index
    %c0_22 = arith.constant 0 : index
    %16 = vector.load %arg2[%c1_20, %c0_21, %c0_22] : memref<9x64x64xf32, #tpu.memory_space<vmem>>, vector<1x64x64xf32>
    %17 = vector.shape_cast %16 : vector<1x64x64xf32> to vector<64x64xf32>
    %cst_23 = arith.constant dense<0.000000e+00> : vector<256x64xf32>
    %18 = tpu.matmul %15, %17, %cst_23 {dimension_numbers = #tpu.dot_dimension_numbers<[1], [0], [0], [1], [0, 0, 1, 1], [], []>} : vector<256x64xf32>, vector<64x64xf32>, vector<256x64xf32> -> vector<256x64xf32>
    %19 = arith.addf %13, %18 : vector<256x64xf32>
    %c0_24 = arith.constant 0 : index
    %c2 = arith.constant 2 : index
    %c0_25 = arith.constant 0 : index
    %20 = vector.load %arg7[%c0_24, %c2, %c0_25] : memref<18x18x64xf32, #tpu.memory_space<vmem>>, vector<16x16x64xf32>
    %21 = vector.shape_cast %20 : vector<16x16x64xf32> to vector<256x64xf32>
    %c2_26 = arith.constant 2 : index
    %c0_27 = arith.constant 0 : index
    %c0_28 = arith.constant 0 : index
    %22 = vector.load %arg2[%c2_26, %c0_27, %c0_28] : memref<9x64x64xf32, #tpu.memory_space<vmem>>, vector<1x64x64xf32>
    %23 = vector.shape_cast %22 : vector<1x64x64xf32> to vector<64x64xf32>
    %cst_29 = arith.constant dense<0.000000e+00> : vector<256x64xf32>
    %24 = tpu.matmul %21, %23, %cst_29 {dimension_numbers = #tpu.dot_dimension_numbers<[1], [0], [0], [1], [0, 0, 1, 1], [], []>} : vector<256x64xf32>, vector<64x64xf32>, vector<256x64xf32> -> vector<256x64xf32>
    %25 = arith.addf %19, %24 : vector<256x64xf32>
    %c1_30 = arith.constant 1 : index
    %c0_31 = arith.constant 0 : index
    %c0_32 = arith.constant 0 : index
    %26 = vector.load %arg7[%c1_30, %c0_31, %c0_32] : memref<18x18x64xf32, #tpu.memory_space<vmem>>, vector<16x16x64xf32>
    %27 = vector.shape_cast %26 : vector<16x16x64xf32> to vector<256x64xf32>
    %c3 = arith.constant 3 : index
    %c0_33 = arith.constant 0 : index
    %c0_34 = arith.constant 0 : index
    %28 = vector.load %arg2[%c3, %c0_33, %c0_34] : memref<9x64x64xf32, #tpu.memory_space<vmem>>, vector<1x64x64xf32>
    %29 = vector.shape_cast %28 : vector<1x64x64xf32> to vector<64x64xf32>
    %cst_35 = arith.constant dense<0.000000e+00> : vector<256x64xf32>
    %30 = tpu.matmul %27, %29, %cst_35 {dimension_numbers = #tpu.dot_dimension_numbers<[1], [0], [0], [1], [0, 0, 1, 1], [], []>} : vector<256x64xf32>, vector<64x64xf32>, vector<256x64xf32> -> vector<256x64xf32>
    %31 = arith.addf %25, %30 : vector<256x64xf32>
    %c1_36 = arith.constant 1 : index
    %c1_37 = arith.constant 1 : index
    %c0_38 = arith.constant 0 : index
    %32 = vector.load %arg7[%c1_36, %c1_37, %c0_38] : memref<18x18x64xf32, #tpu.memory_space<vmem>>, vector<16x16x64xf32>
    %33 = vector.shape_cast %32 : vector<16x16x64xf32> to vector<256x64xf32>
    %c4 = arith.constant 4 : index
    %c0_39 = arith.constant 0 : index
    %c0_40 = arith.constant 0 : index
    %34 = vector.load %arg2[%c4, %c0_39, %c0_40] : memref<9x64x64xf32, #tpu.memory_space<vmem>>, vector<1x64x64xf32>
    %35 = vector.shape_cast %34 : vector<1x64x64xf32> to vector<64x64xf32>
    %cst_41 = arith.constant dense<0.000000e+00> : vector<256x64xf32>
    %36 = tpu.matmul %33, %35, %cst_41 {dimension_numbers = #tpu.dot_dimension_numbers<[1], [0], [0], [1], [0, 0, 1, 1], [], []>} : vector<256x64xf32>, vector<64x64xf32>, vector<256x64xf32> -> vector<256x64xf32>
    %37 = arith.addf %31, %36 : vector<256x64xf32>
    %c1_42 = arith.constant 1 : index
    %c2_43 = arith.constant 2 : index
    %c0_44 = arith.constant 0 : index
    %38 = vector.load %arg7[%c1_42, %c2_43, %c0_44] : memref<18x18x64xf32, #tpu.memory_space<vmem>>, vector<16x16x64xf32>
    %39 = vector.shape_cast %38 : vector<16x16x64xf32> to vector<256x64xf32>
    %c5 = arith.constant 5 : index
    %c0_45 = arith.constant 0 : index
    %c0_46 = arith.constant 0 : index
    %40 = vector.load %arg2[%c5, %c0_45, %c0_46] : memref<9x64x64xf32, #tpu.memory_space<vmem>>, vector<1x64x64xf32>
    %41 = vector.shape_cast %40 : vector<1x64x64xf32> to vector<64x64xf32>
    %cst_47 = arith.constant dense<0.000000e+00> : vector<256x64xf32>
    %42 = tpu.matmul %39, %41, %cst_47 {dimension_numbers = #tpu.dot_dimension_numbers<[1], [0], [0], [1], [0, 0, 1, 1], [], []>} : vector<256x64xf32>, vector<64x64xf32>, vector<256x64xf32> -> vector<256x64xf32>
    %43 = arith.addf %37, %42 : vector<256x64xf32>
    %c2_48 = arith.constant 2 : index
    %c0_49 = arith.constant 0 : index
    %c0_50 = arith.constant 0 : index
    %44 = vector.load %arg7[%c2_48, %c0_49, %c0_50] : memref<18x18x64xf32, #tpu.memory_space<vmem>>, vector<16x16x64xf32>
    %45 = vector.shape_cast %44 : vector<16x16x64xf32> to vector<256x64xf32>
    %c6 = arith.constant 6 : index
    %c0_51 = arith.constant 0 : index
    %c0_52 = arith.constant 0 : index
    %46 = vector.load %arg2[%c6, %c0_51, %c0_52] : memref<9x64x64xf32, #tpu.memory_space<vmem>>, vector<1x64x64xf32>
    %47 = vector.shape_cast %46 : vector<1x64x64xf32> to vector<64x64xf32>
    %cst_53 = arith.constant dense<0.000000e+00> : vector<256x64xf32>
    %48 = tpu.matmul %45, %47, %cst_53 {dimension_numbers = #tpu.dot_dimension_numbers<[1], [0], [0], [1], [0, 0, 1, 1], [], []>} : vector<256x64xf32>, vector<64x64xf32>, vector<256x64xf32> -> vector<256x64xf32>
    %49 = arith.addf %43, %48 : vector<256x64xf32>
    %c2_54 = arith.constant 2 : index
    %c1_55 = arith.constant 1 : index
    %c0_56 = arith.constant 0 : index
    %50 = vector.load %arg7[%c2_54, %c1_55, %c0_56] : memref<18x18x64xf32, #tpu.memory_space<vmem>>, vector<16x16x64xf32>
    %51 = vector.shape_cast %50 : vector<16x16x64xf32> to vector<256x64xf32>
    %c7 = arith.constant 7 : index
    %c0_57 = arith.constant 0 : index
    %c0_58 = arith.constant 0 : index
    %52 = vector.load %arg2[%c7, %c0_57, %c0_58] : memref<9x64x64xf32, #tpu.memory_space<vmem>>, vector<1x64x64xf32>
    %53 = vector.shape_cast %52 : vector<1x64x64xf32> to vector<64x64xf32>
    %cst_59 = arith.constant dense<0.000000e+00> : vector<256x64xf32>
    %54 = tpu.matmul %51, %53, %cst_59 {dimension_numbers = #tpu.dot_dimension_numbers<[1], [0], [0], [1], [0, 0, 1, 1], [], []>} : vector<256x64xf32>, vector<64x64xf32>, vector<256x64xf32> -> vector<256x64xf32>
    %55 = arith.addf %49, %54 : vector<256x64xf32>
    %c2_60 = arith.constant 2 : index
    %c2_61 = arith.constant 2 : index
    %c0_62 = arith.constant 0 : index
    %56 = vector.load %arg7[%c2_60, %c2_61, %c0_62] : memref<18x18x64xf32, #tpu.memory_space<vmem>>, vector<16x16x64xf32>
    %57 = vector.shape_cast %56 : vector<16x16x64xf32> to vector<256x64xf32>
    %c8 = arith.constant 8 : index
    %c0_63 = arith.constant 0 : index
    %c0_64 = arith.constant 0 : index
    %58 = vector.load %arg2[%c8, %c0_63, %c0_64] : memref<9x64x64xf32, #tpu.memory_space<vmem>>, vector<1x64x64xf32>
    %59 = vector.shape_cast %58 : vector<1x64x64xf32> to vector<64x64xf32>
    %cst_65 = arith.constant dense<0.000000e+00> : vector<256x64xf32>
    %60 = tpu.matmul %57, %59, %cst_65 {dimension_numbers = #tpu.dot_dimension_numbers<[1], [0], [0], [1], [0, 0, 1, 1], [], []>} : vector<256x64xf32>, vector<64x64xf32>, vector<256x64xf32> -> vector<256x64xf32>
    %61 = arith.addf %55, %60 : vector<256x64xf32>
    %c0_66 = arith.constant 0 : index
    %c0_67 = arith.constant 0 : index
    %62 = vector.load %arg3[%c0_66, %c0_67] : memref<1x64xf32, #tpu.memory_space<vmem>>, vector<1x64xf32>
    %63 = vector.broadcast %62 : vector<1x64xf32> to vector<256x64xf32>
    %64 = arith.addf %61, %63 : vector<256x64xf32>
    %cst_68 = arith.constant 0.000000e+00 : f32
    %65 = vector.broadcast %cst_68 : f32 to vector<256x64xf32>
    %66 = arith.maximumf %64, %65 : vector<256x64xf32>
    %cst_69 = arith.constant 0.000000e+00 : f32
    %67 = vector.broadcast %cst_69 : f32 to vector<18x18x64xf32>
    %c0_70 = arith.constant 0 : index
    %c0_71 = arith.constant 0 : index
    %c0_72 = arith.constant 0 : index
    %68 = vector.load %arg8[%c0_70, %c0_71, %c0_72] : memref<18x18x64xf32, #tpu.memory_space<vmem>>, vector<18x18x64xf32>
    tpu.vector_store %arg8[%c0_70, %c0_71, %c0_72], %67 {strides = array<i32>} : memref<18x18x64xf32, #tpu.memory_space<vmem>>, vector<18x18x64xf32>,
    %69 = vector.shape_cast %66 : vector<256x64xf32> to vector<16x16x64xf32>
    %c1_73 = arith.constant 1 : index
    %c1_74 = arith.constant 1 : index
    %c0_75 = arith.constant 0 : index
    %70 = vector.load %arg8[%c1_73, %c1_74, %c0_75] : memref<18x18x64xf32, #tpu.memory_space<vmem>>, vector<16x16x64xf32>
    tpu.vector_store %arg8[%c1_73, %c1_74, %c0_75], %69 {strides = array<i32>} : memref<18x18x64xf32, #tpu.memory_space<vmem>>, vector<16x16x64xf32>,
    %cst_76 = arith.constant 0.000000e+00 : f32
    %71 = vector.broadcast %cst_76 : f32 to vector<256x64xf32>
    %c0_77 = arith.constant 0 : index
    %c0_78 = arith.constant 0 : index
    %c0_79 = arith.constant 0 : index
    %72 = vector.load %arg8[%c0_77, %c0_78, %c0_79] : memref<18x18x64xf32, #tpu.memory_space<vmem>>, vector<16x16x64xf32>
    %73 = vector.shape_cast %72 : vector<16x16x64xf32> to vector<256x64xf32>
    %c0_80 = arith.constant 0 : index
    %c0_81 = arith.constant 0 : index
    %c0_82 = arith.constant 0 : index
    %74 = vector.load %arg4[%c0_80, %c0_81, %c0_82] : memref<9x64x64xf32, #tpu.memory_space<vmem>>, vector<1x64x64xf32>
    %75 = vector.shape_cast %74 : vector<1x64x64xf32> to vector<64x64xf32>
    %cst_83 = arith.constant dense<0.000000e+00> : vector<256x64xf32>
    %76 = tpu.matmul %73, %75, %cst_83 {dimension_numbers = #tpu.dot_dimension_numbers<[1], [0], [0], [1], [0, 0, 1, 1], [], []>} : vector<256x64xf32>, vector<64x64xf32>, vector<256x64xf32> -> vector<256x64xf32>
    %77 = arith.addf %71, %76 : vector<256x64xf32>
    %c0_84 = arith.constant 0 : index
    %c1_85 = arith.constant 1 : index
    %c0_86 = arith.constant 0 : index
    %78 = vector.load %arg8[%c0_84, %c1_85, %c0_86] : memref<18x18x64xf32, #tpu.memory_space<vmem>>, vector<16x16x64xf32>
    %79 = vector.shape_cast %78 : vector<16x16x64xf32> to vector<256x64xf32>
    %c1_87 = arith.constant 1 : index
    %c0_88 = arith.constant 0 : index
    %c0_89 = arith.constant 0 : index
    %80 = vector.load %arg4[%c1_87, %c0_88, %c0_89] : memref<9x64x64xf32, #tpu.memory_space<vmem>>, vector<1x64x64xf32>
    %81 = vector.shape_cast %80 : vector<1x64x64xf32> to vector<64x64xf32>
    %cst_90 = arith.constant dense<0.000000e+00> : vector<256x64xf32>
    %82 = tpu.matmul %79, %81, %cst_90 {dimension_numbers = #tpu.dot_dimension_numbers<[1], [0], [0], [1], [0, 0, 1, 1], [], []>} : vector<256x64xf32>, vector<64x64xf32>, vector<256x64xf32> -> vector<256x64xf32>
    %83 = arith.addf %77, %82 : vector<256x64xf32>
    %c0_91 = arith.constant 0 : index
    %c2_92 = arith.constant 2 : index
    %c0_93 = arith.constant 0 : index
    %84 = vector.load %arg8[%c0_91, %c2_92, %c0_93] : memref<18x18x64xf32, #tpu.memory_space<vmem>>, vector<16x16x64xf32>
    %85 = vector.shape_cast %84 : vector<16x16x64xf32> to vector<256x64xf32>
    %c2_94 = arith.constant 2 : index
    %c0_95 = arith.constant 0 : index
    %c0_96 = arith.constant 0 : index
    %86 = vector.load %arg4[%c2_94, %c0_95, %c0_96] : memref<9x64x64xf32, #tpu.memory_space<vmem>>, vector<1x64x64xf32>
    %87 = vector.shape_cast %86 : vector<1x64x64xf32> to vector<64x64xf32>
    %cst_97 = arith.constant dense<0.000000e+00> : vector<256x64xf32>
    %88 = tpu.matmul %85, %87, %cst_97 {dimension_numbers = #tpu.dot_dimension_numbers<[1], [0], [0], [1], [0, 0, 1, 1], [], []>} : vector<256x64xf32>, vector<64x64xf32>, vector<256x64xf32> -> vector<256x64xf32>
    %89 = arith.addf %83, %88 : vector<256x64xf32>
    %c1_98 = arith.constant 1 : index
    %c0_99 = arith.constant 0 : index
    %c0_100 = arith.constant 0 : index
    %90 = vector.load %arg8[%c1_98, %c0_99, %c0_100] : memref<18x18x64xf32, #tpu.memory_space<vmem>>, vector<16x16x64xf32>
    %91 = vector.shape_cast %90 : vector<16x16x64xf32> to vector<256x64xf32>
    %c3_101 = arith.constant 3 : index
    %c0_102 = arith.constant 0 : index
    %c0_103 = arith.constant 0 : index
    %92 = vector.load %arg4[%c3_101, %c0_102, %c0_103] : memref<9x64x64xf32, #tpu.memory_space<vmem>>, vector<1x64x64xf32>
    %93 = vector.shape_cast %92 : vector<1x64x64xf32> to vector<64x64xf32>
    %cst_104 = arith.constant dense<0.000000e+00> : vector<256x64xf32>
    %94 = tpu.matmul %91, %93, %cst_104 {dimension_numbers = #tpu.dot_dimension_numbers<[1], [0], [0], [1], [0, 0, 1, 1], [], []>} : vector<256x64xf32>, vector<64x64xf32>, vector<256x64xf32> -> vector<256x64xf32>
    %95 = arith.addf %89, %94 : vector<256x64xf32>
    %c1_105 = arith.constant 1 : index
    %c1_106 = arith.constant 1 : index
    %c0_107 = arith.constant 0 : index
    %96 = vector.load %arg8[%c1_105, %c1_106, %c0_107] : memref<18x18x64xf32, #tpu.memory_space<vmem>>, vector<16x16x64xf32>
    %97 = vector.shape_cast %96 : vector<16x16x64xf32> to vector<256x64xf32>
    %c4_108 = arith.constant 4 : index
    %c0_109 = arith.constant 0 : index
    %c0_110 = arith.constant 0 : index
    %98 = vector.load %arg4[%c4_108, %c0_109, %c0_110] : memref<9x64x64xf32, #tpu.memory_space<vmem>>, vector<1x64x64xf32>
    %99 = vector.shape_cast %98 : vector<1x64x64xf32> to vector<64x64xf32>
    %cst_111 = arith.constant dense<0.000000e+00> : vector<256x64xf32>
    %100 = tpu.matmul %97, %99, %cst_111 {dimension_numbers = #tpu.dot_dimension_numbers<[1], [0], [0], [1], [0, 0, 1, 1], [], []>} : vector<256x64xf32>, vector<64x64xf32>, vector<256x64xf32> -> vector<256x64xf32>
    %101 = arith.addf %95, %100 : vector<256x64xf32>
    %c1_112 = arith.constant 1 : index
    %c2_113 = arith.constant 2 : index
    %c0_114 = arith.constant 0 : index
    %102 = vector.load %arg8[%c1_112, %c2_113, %c0_114] : memref<18x18x64xf32, #tpu.memory_space<vmem>>, vector<16x16x64xf32>
    %103 = vector.shape_cast %102 : vector<16x16x64xf32> to vector<256x64xf32>
    %c5_115 = arith.constant 5 : index
    %c0_116 = arith.constant 0 : index
    %c0_117 = arith.constant 0 : index
    %104 = vector.load %arg4[%c5_115, %c0_116, %c0_117] : memref<9x64x64xf32, #tpu.memory_space<vmem>>, vector<1x64x64xf32>
    %105 = vector.shape_cast %104 : vector<1x64x64xf32> to vector<64x64xf32>
    %cst_118 = arith.constant dense<0.000000e+00> : vector<256x64xf32>
    %106 = tpu.matmul %103, %105, %cst_118 {dimension_numbers = #tpu.dot_dimension_numbers<[1], [0], [0], [1], [0, 0, 1, 1], [], []>} : vector<256x64xf32>, vector<64x64xf32>, vector<256x64xf32> -> vector<256x64xf32>
    %107 = arith.addf %101, %106 : vector<256x64xf32>
    %c2_119 = arith.constant 2 : index
    %c0_120 = arith.constant 0 : index
    %c0_121 = arith.constant 0 : index
    %108 = vector.load %arg8[%c2_119, %c0_120, %c0_121] : memref<18x18x64xf32, #tpu.memory_space<vmem>>, vector<16x16x64xf32>
    %109 = vector.shape_cast %108 : vector<16x16x64xf32> to vector<256x64xf32>
    %c6_122 = arith.constant 6 : index
    %c0_123 = arith.constant 0 : index
    %c0_124 = arith.constant 0 : index
    %110 = vector.load %arg4[%c6_122, %c0_123, %c0_124] : memref<9x64x64xf32, #tpu.memory_space<vmem>>, vector<1x64x64xf32>
    %111 = vector.shape_cast %110 : vector<1x64x64xf32> to vector<64x64xf32>
    %cst_125 = arith.constant dense<0.000000e+00> : vector<256x64xf32>
    %112 = tpu.matmul %109, %111, %cst_125 {dimension_numbers = #tpu.dot_dimension_numbers<[1], [0], [0], [1], [0, 0, 1, 1], [], []>} : vector<256x64xf32>, vector<64x64xf32>, vector<256x64xf32> -> vector<256x64xf32>
    %113 = arith.addf %107, %112 : vector<256x64xf32>
    %c2_126 = arith.constant 2 : index
    %c1_127 = arith.constant 1 : index
    %c0_128 = arith.constant 0 : index
    %114 = vector.load %arg8[%c2_126, %c1_127, %c0_128] : memref<18x18x64xf32, #tpu.memory_space<vmem>>, vector<16x16x64xf32>
    %115 = vector.shape_cast %114 : vector<16x16x64xf32> to vector<256x64xf32>
    %c7_129 = arith.constant 7 : index
    %c0_130 = arith.constant 0 : index
    %c0_131 = arith.constant 0 : index
    %116 = vector.load %arg4[%c7_129, %c0_130, %c0_131] : memref<9x64x64xf32, #tpu.memory_space<vmem>>, vector<1x64x64xf32>
    %117 = vector.shape_cast %116 : vector<1x64x64xf32> to vector<64x64xf32>
    %cst_132 = arith.constant dense<0.000000e+00> : vector<256x64xf32>
    %118 = tpu.matmul %115, %117, %cst_132 {dimension_numbers = #tpu.dot_dimension_numbers<[1], [0], [0], [1], [0, 0, 1, 1], [], []>} : vector<256x64xf32>, vector<64x64xf32>, vector<256x64xf32> -> vector<256x64xf32>
    %119 = arith.addf %113, %118 : vector<256x64xf32>
    %c2_133 = arith.constant 2 : index
    %c2_134 = arith.constant 2 : index
    %c0_135 = arith.constant 0 : index
    %120 = vector.load %arg8[%c2_133, %c2_134, %c0_135] : memref<18x18x64xf32, #tpu.memory_space<vmem>>, vector<16x16x64xf32>
    %121 = vector.shape_cast %120 : vector<16x16x64xf32> to vector<256x64xf32>
    %c8_136 = arith.constant 8 : index
    %c0_137 = arith.constant 0 : index
    %c0_138 = arith.constant 0 : index
    %122 = vector.load %arg4[%c8_136, %c0_137, %c0_138] : memref<9x64x64xf32, #tpu.memory_space<vmem>>, vector<1x64x64xf32>
    %123 = vector.shape_cast %122 : vector<1x64x64xf32> to vector<64x64xf32>
    %cst_139 = arith.constant dense<0.000000e+00> : vector<256x64xf32>
    %124 = tpu.matmul %121, %123, %cst_139 {dimension_numbers = #tpu.dot_dimension_numbers<[1], [0], [0], [1], [0, 0, 1, 1], [], []>} : vector<256x64xf32>, vector<64x64xf32>, vector<256x64xf32> -> vector<256x64xf32>
    %125 = arith.addf %119, %124 : vector<256x64xf32>
    %c0_140 = arith.constant 0 : index
    %c0_141 = arith.constant 0 : index
    %126 = vector.load %arg5[%c0_140, %c0_141] : memref<1x64xf32, #tpu.memory_space<vmem>>, vector<1x64xf32>
    %127 = vector.broadcast %126 : vector<1x64xf32> to vector<256x64xf32>
    %128 = arith.addf %125, %127 : vector<256x64xf32>
    %c1_142 = arith.constant 1 : index
    %c1_143 = arith.constant 1 : index
    %c0_144 = arith.constant 0 : index
    %129 = vector.load %arg7[%c1_142, %c1_143, %c0_144] : memref<18x18x64xf32, #tpu.memory_space<vmem>>, vector<16x16x64xf32>
    %130 = vector.shape_cast %129 : vector<16x16x64xf32> to vector<256x64xf32>
    %131 = arith.addf %128, %130 : vector<256x64xf32>
    %cst_145 = arith.constant 0.000000e+00 : f32
    %132 = vector.broadcast %cst_145 : f32 to vector<256x64xf32>
    %133 = arith.maximumf %131, %132 : vector<256x64xf32>
    %134 = vector.shape_cast %133 : vector<256x64xf32> to vector<1x16x16x64xf32>
    %c0_146 = arith.constant 0 : index
    %c0_147 = arith.constant 0 : index
    %c0_148 = arith.constant 0 : index
    %c0_149 = arith.constant 0 : index
    %135 = vector.load %arg6[%c0_146, %c0_147, %c0_148, %c0_149] : memref<1x16x16x64xf32, #tpu.memory_space<vmem>>, vector<1x16x16x64xf32>
    tpu.vector_store %arg6[%c0_146, %c0_147, %c0_148, %c0_149], %134 {strides = array<i32>} : memref<1x16x16x64xf32, #tpu.memory_space<vmem>>, vector<1x16x16x64xf32>,
    return
  }
  func.func @transform_0(%arg0: i32) -> (i32, i32, i32, i32) {
    %c0_i32 = arith.constant 0 : i32
    %c0_i32_0 = arith.constant 0 : i32
    %c0_i32_1 = arith.constant 0 : i32
    %c0_i32_2 = arith.constant 0 : i32
    return %arg0, %c0_i32, %c0_i32_0, %c0_i32_1 : i32, i32, i32, i32
  }
  func.func @transform_1(%arg0: i32) -> (i32, i32, i32) {
    %c0_i32 = arith.constant 0 : i32
    %c0_i32_0 = arith.constant 0 : i32
    %c0_i32_1 = arith.constant 0 : i32
    %c0_i32_2 = arith.constant 0 : i32
    return %c0_i32, %c0_i32_0, %c0_i32_1 : i32, i32, i32
  }
  func.func @transform_2(%arg0: i32) -> (i32, i32) {
    %c0_i32 = arith.constant 0 : i32
    %c0_i32_0 = arith.constant 0 : i32
    %c0_i32_1 = arith.constant 0 : i32
    return %c0_i32, %c0_i32_0 : i32, i32
  }
  func.func @transform_3(%arg0: i32) -> (i32, i32, i32) {
    %c0_i32 = arith.constant 0 : i32
    %c0_i32_0 = arith.constant 0 : i32
    %c0_i32_1 = arith.constant 0 : i32
    %c0_i32_2 = arith.constant 0 : i32
    return %c0_i32, %c0_i32_0, %c0_i32_1 : i32, i32, i32
  }
  func.func @transform_4(%arg0: i32) -> (i32, i32) {
    %c0_i32 = arith.constant 0 : i32
    %c0_i32_0 = arith.constant 0 : i32
    %c0_i32_1 = arith.constant 0 : i32
    return %c0_i32, %c0_i32_0 : i32, i32
  }
  func.func @transform_5(%arg0: i32) -> (i32, i32, i32, i32) {
    %c0_i32 = arith.constant 0 : i32
    %c0_i32_0 = arith.constant 0 : i32
    %c0_i32_1 = arith.constant 0 : i32
    %c0_i32_2 = arith.constant 0 : i32
    return %arg0, %c0_i32, %c0_i32_0, %c0_i32_1 : i32, i32, i32, i32
  }
}

</mosaic_0001>

<bundles_post_ra>
// kernel: resnet18_layer2.1
= control target key start
LH: loop header
LB: loop body
LE: loop exit
PB: predicated region body
PF: predicated region fallthrough
CT: control target
= control target key end

     0   :  { %10 = vsyncpa [#allocation5], 0  ;;  %s14042_s0 = inlined_call_operand.vmem [shape: f32[2,16,16,64], index: 0, kind: input, shape index: {}]   ;;  %s14043_s1 = inlined_call_operand.vmem [shape: f32[9,64,64], index: 1, kind: input, shape index: {}]   ;;  %s14044_s2 = inlined_call_operand.vmem [shape: f32[1,64], index: 2, kind: input, shape index: {}]   ;;  %s14045_s3 = inlined_call_operand.vmem [shape: f32[9,64,64], index: 3, kind: input, shape index: {}]   ;;  %s14046_s4 = inlined_call_operand.vmem [shape: f32[1,64], index: 4, kind: input, shape index: {}]   ;;  %s14047_s5 = inlined_call_operand.hbm [shape: f32[2,16,16,64], index: 5, kind: output, shape index: {}]  }
   0x1   :  { %12 = vsyncpa [#allocation5 + $0x1], 0  ;;  %s10471_s18 = smov 0   ;;  %s10473_s19 = smov 0  }
   0x2   :  { %s10475_s20 = smov 0   ;;  %s10477_s21 = smov 0  }
   0x3 LB: > { %s10492_s22 = sadd.s32 4294967295, %s10435_s21   ;;  %s7741_s23 = sadd.s32 4294967294, %s10435_s21   ;;  %s10435_s21 = sphi %s10477_s21, %s14380_s21   ;;  %s10431_s20 = sphi %s10475_s20, %s14379_s20   ;;  %s10427_s19 = sphi %s10473_s19, %s14378_s19   ;;  %s10423_s18 = sphi %s10471_s18, %s14377_s18  }
   0x4   : > { %s10496_s24 = sadd.s32 1, %s10435_s21   ;;  %s135_s25 = sadd.s32 1, %s10431_s20 }
   0x5   : > { %s132_s26 = ssub.s32 %s10435_s21, %s10496_s24  ;;  %p145_p0 = scmp.ne.s32.totalorder %s10431_s20, %s10427_s19 }
   0x6   : > { %p133_p1 = scmp.eq.s32.totalorder %s132_s26, 0  ;;  %p146_p2 = scmp.eq.s32.totalorder %s10492_s22, 1 }
   0x7   : > { %p151_p3 = scmp.ne.s32.totalorder %s10427_s19, %s10423_s18  ;;  %p152_p4 = scmp.eq.s32.totalorder %s7741_s23, 1 }
   0x8   : > { %s10507_s27 = scalar_select %p133_p1, %s10431_s20, %s135_s25  }
   0x9   : > { %p10509_p5 = por %p146_p2, %p145_p0  ;;  %p10513_p6 = por %p152_p4, %p151_p3 }
   0xa   : > { %p7744_p7 = scmp.ge.s32.totalorder %s10435_s21, 1  ;;  %p190_p8 = scmp.lt.s32.totalorder %s10435_s21, 3 }
   0xc   : > { %p191_p9 = pnand %p7744_p7, %p190_p8 }
   0xe   : > { %194 = sbr.rel (%p191_p9) target bundleno = 1076 (0x434), region = 40 }
  0x13   : > { %v10522_v0 = vld [vmem:[%s14043_s1 + $0x78] sm:$0xff]  ;;  %v10532_v2 = vld [vmem:[%s14043_s1 + $0x70] sm:$0xff]  ;;  %vm223_vm0 = vcmask 523264   ;;  %vm226_vm1 = vcmask 517120   ;;  %v10437_v4 = vmov 0.0   ;;  %p218_p10 = scmp.lt.s32.totalorder %s10492_s22, 1 }
  0x14   : > { %v10527_v1 = vld [vmem:[%s14043_s1 + $0x38] sm:$0xff]  ;;  %9181 = vmatprep.subr.mxu0 %v10522_v0  ;;  %v10539_v3 = vld [vmem:[%s14043_s1 + $0x30] sm:$0xff]  ;;  %224 = vst.msk [vmem:[#allocation2] sm:$0xff] %vm223_vm0, %v10437_v4  ;;  %225 = vst.msk [vmem:[#allocation2 + $0x8] sm:$0xff] %vm223_vm0, %v10437_v4  ;;  %s215_s14 = sand.u32 1, %s10427_s19   ;;  %s8460_s25 = sshll.u32 %s10492_s22, 12 }
  0x15   : > { %9245 = vmatprep.subr.mxu1 %v10527_v1  ;;  %228 = vst.msk [vmem:[#allocation2 + $0x18] sm:$0xff] %vm223_vm0, %v10437_v4  ;;  %229 = vst.msk [vmem:[#allocation2 + $0x20] sm:$0xff] %vm223_vm0, %v10437_v4  ;;  %9182 = vmatpush3.msra.mxu0 %v10522_v0  ;;  %v7753_v5 = vld [vmem:[%s14043_s1 + $0x68] sm:$0xff]  ;;  %s219_s17 = scalar_select %p218_p10, %s10492_s22, 1  ;;  %v7752_v7 = vld [vmem:[%s14043_s1 + $0x60] sm:$0xff] }
  0x16   : > { %231 = vst.msk [vmem:[#allocation2 + $0x30] sm:$0xff] %vm223_vm0, %v10437_v4  ;;  %232 = vst.msk [vmem:[#allocation2 + $0x38] sm:$0xff] %vm223_vm0, %v10437_v4  ;;  %9246 = vmatpush3.msra.mxu1 %v10527_v1  ;;  %v413_v6 = vld [vmem:[%s14043_s1 + $0x28] sm:$0xff]  ;;  %9183 = vmatprep.subr.mxu0 %v10532_v2  ;;  %v412_v8 = vld [vmem:[%s14043_s1 + $0x20] sm:$0xff]  ;;  %s13992_s7 = scalar_lea.hbm %s14047_s5, %s8460_s25  ;;  %s14002_s22 = scalar_lea.sflag [#allocation5], %s215_s14 }
  0x17   : > { %234 = vst.msk [vmem:[#allocation2 + $0x48] sm:$0xff] %vm223_vm0, %v10437_v4  ;;  %235 = vst.msk [vmem:[#allocation2 + $0x50] sm:$0xff] %vm223_vm0, %v10437_v4  ;;  %9247 = vmatprep.subr.mxu1 %v10539_v3  ;;  %9184 = vmatpush3.msra.mxu0 %v10532_v2  ;;  %s8459_s6 = sshll.u32 %s219_s17, 8  ;;  %v7751_v9 = vld [vmem:[%s14043_s1 + $0x58] sm:$0xff]  ;;  %v7750_v14 = vld [vmem:[%s14043_s1 + $0x50] sm:$0xff]  ;;  %s7745_s17 = sshll.u32 %s215_s14, 8 }
  0x18   : > { %237 = vst.msk [vmem:[#allocation2 + $0x60] sm:$0xff] %vm223_vm0, %v10437_v4  ;;  %238 = vst.msk [vmem:[#allocation2 + $0x68] sm:$0xff] %vm223_vm0, %v10437_v4  ;;  %9248 = vmatpush3.msra.mxu1 %v10539_v3  ;;  %9185 = vmatprep.subr.mxu0 %v7753_v5  ;;  %v411_v10 = vld [vmem:[%s14043_s1 + $0x18] sm:$0xff]  ;;  %s10786_s13 = scalar_lea.vmem %s14042_s0, %s8459_s6  ;;  %v410_v15 = vld [vmem:[%s14043_s1 + $0x10] sm:$0xff]  ;;  %s13792_s23 = scalar_lea.vmem [#allocation4], %s7745_s17 }
  0x19   : > { %240 = vst.msk [vmem:[#allocation2 + $0x78] sm:$0xff] %vm223_vm0, %v10437_v4  ;;  %241 = vst.msk [vmem:[#allocation2 + $0x80] sm:$0xff] %vm223_vm0, %v10437_v4  ;;  %9249 = vmatprep.subr.mxu1 %v413_v6  ;;  %9186 = vmatpush3.msra.mxu0 %v7753_v5  ;;  %v279_v11 = vld [vmem:[%s10786_s13] sm:$0xff]  ;;  %v280_v12 = vld [vmem:[%s10786_s13 + $0x8] sm:$0xff]  ;;  %s7679_s26 = sshll.u32 %s13792_s23, 4  ;;  %s10438_s9 = smov [#allocation4]   ;;  %s13994_s26 = int_to_ptr.vmem [resolvable:$true] %s7679_s26 }
  0x1a   : > { %243 = vst.msk [vmem:[#allocation2 + $0x90] sm:$0xff] %vm223_vm0, %v10437_v4  ;;  %244 = vst.msk [vmem:[#allocation2 + $0x98] sm:$0xff] %vm223_vm0, %v10437_v4  ;;  %9250 = vmatpush3.msra.mxu1 %v413_v6  ;;  %9187 = vmatprep.subr.mxu0 %v7752_v7  ;;  %v281_v13 = vld [vmem:[%s10786_s13 + $0x10] sm:$0xff]  ;;  %v7749_v16 = vld [vmem:[%s14043_s1 + $0x48] sm:$0xff]  ;;  %v311_v17 = vmax.f32 %v279_v11, 0.0  ;;  %v312_v18 = vmax.f32 %v280_v12, 0.0 }
  0x1b   : > { %246 = vst.msk [vmem:[#allocation2 + $0xa8] sm:$0xff] %vm223_vm0, %v10437_v4  ;;  %247 = vst.msk [vmem:[#allocation2 + $0xb0] sm:$0xff] %vm223_vm0, %v10437_v4  ;;  %9251 = vmatprep.subr.mxu1 %v412_v8  ;;  %9188 = vmatpush3.msra.mxu0 %v7752_v7  ;;  %v313_v19 = vmax.f32 %v281_v13, 0.0  ;;  %v409_v20 = vld [vmem:[%s14043_s1 + $0x8] sm:$0xff]  ;;  %v282_v21 = vld [vmem:[%s10786_s13 + $0x18] sm:$0xff]  ;;  %s10375_s8 = scalar_lea.vmem %s13994_s26, 4096 }
  0x1c   : > { %249 = vst.msk [vmem:[#allocation2 + $0xc0] sm:$0xff] %vm223_vm0, %v10437_v4  ;;  %250 = vst.msk [vmem:[#allocation2 + $0xc8] sm:$0xff] %vm223_vm0, %v10437_v4  ;;  %9252 = vmatpush3.msra.mxu1 %v412_v8  ;;  %9189 = vmatprep.subr.mxu0 %v7751_v9  ;;  %v283_v22 = vld [vmem:[%s10786_s13 + $0x20] sm:$0xff]  ;;  %v314_v25 = vmax.f32 %v282_v21, 0.0  ;;  %v284_v27 = vld [vmem:[%s10786_s13 + $0x28] sm:$0xff]  ;;  %p10376_p11 = scmp.ne.s32.totalorder %s13994_s26, %s10375_s8  ;;  %s10379_s10 = sshll.u32 %s10438_s9, 4  ;;  %s10380_s10 = int_to_ptr.vmem [resolvable:$false] %s10379_s10 }
  0x1d   : > { %252 = vst.msk [vmem:[#allocation2 + $0xd8] sm:$0xff] %vm223_vm0, %v10437_v4  ;;  %253 = vst.msk [vmem:[#allocation2 + $0xe0] sm:$0xff] %vm223_vm0, %v10437_v4  ;;  %9253 = vmatprep.subr.mxu1 %v411_v10  ;;  %9190 = vmatpush3.msra.mxu0 %v7751_v9  ;;  %v10808_v23 = vld [vmem:[%s14043_s1 + $0x40] sm:$0xff]  ;;  %v315_v26 = vmax.f32 %v283_v22, 0.0  ;;  %v285_v28 = vld [vmem:[%s10786_s13 + $0x30] sm:$0xff]  ;;  %v316_v31 = vmax.f32 %v284_v27, 0.0  ;;  %p10382_p0 = scmp.lt.s32.totalorder %s13994_s26, %s10380_s10 }
  0x1e   : > { %255 = vst.msk [vmem:[#allocation2 + $0xf0] sm:$0xff] %vm223_vm0, %v10437_v4  ;;  %256 = vst.msk [vmem:[#allocation2 + $0xf8] sm:$0xff] %vm223_vm0, %v10437_v4  ;;  %9254 = vmatpush3.msra.mxu1 %v411_v10  ;;  %v10813_v24 = vld [vmem:[%s14043_s1] sm:$0xff]  ;;  %v286_v29 = vld [vmem:[%s10786_s13 + $0x38] sm:$0xff]  ;;  %9191 = vmatprep.subr.mxu0 %v7750_v14  ;;  %v317_v32 = vmax.f32 %v285_v28, 0.0  ;;  %p10377_p12 = pnand %p10376_p11, %p10509_p5  ;;  %s10381_s11 = scalar_lea.vmem %s10380_s10, 8192 }
  0x1f   : > { %258 = vst.msk [vmem:[#allocation2 + $0x108] sm:$0xff] %vm223_vm0, %v10437_v4  ;;  %259 = vst.msk [vmem:[#allocation2 + $0x110] sm:$0xff] %vm223_vm0, %v10437_v4  ;;  %9255 = vmatprep.subr.mxu1 %v410_v15  ;;  %v416_v30 = vld [vmem:[#allocation2 + $0x1] sm:$0xff]  ;;  %v318_v33 = vmax.f32 %v286_v29, 0.0  ;;  %v289_v36 = vld [vmem:[%s10786_s13 + $0x50] sm:$0xff]  ;;  %9192 = vmatpush3.msra.mxu0 %v7750_v14  ;;  %p10383_p1 = scmp.lt.s32.totalorder %s10381_s11, %s10375_s8 }
  0x20   : > { %261 = vst.msk [vmem:[#allocation2 + $0x120] sm:$0xff] %vm223_vm0, %v10437_v4  ;;  %262 = vst.msk [vmem:[#allocation2 + $0x128] sm:$0xff] %vm223_vm0, %v10437_v4  ;;  %v287_v34 = vld [vmem:[%s10786_s13 + $0x40] sm:$0xff]  ;;  %v288_v35 = vld [vmem:[%s10786_s13 + $0x48] sm:$0xff]  ;;  %9256 = vmatpush3.msra.mxu1 %v410_v15  ;;  %v321_v40 = vmax.f32 %v289_v36, 0.0  ;;  %9193 = vmatprep.subr.mxu0 %v7749_v16  ;;  %p10378_p13 = pneg %p10377_p12 }
  0x21   : > { %264 = vst.msk [vmem:[#allocation2 + $0x138] sm:$0xff] %vm223_vm0, %v10437_v4  ;;  %265 = vst.msk [vmem:[#allocation2 + $0x140] sm:$0xff] %vm223_vm0, %v10437_v4  ;;  %v376_v37 = vld [vmem:[#allocation2] sm:$0xff]  ;;  %v319_v38 = vmax.f32 %v287_v34, 0.0  ;;  %v320_v39 = vmax.f32 %v288_v35, 0.0  ;;  %v290_v41 = vld [vmem:[%s10786_s13 + $0x58] sm:$0xff]  ;;  %9257 = vmatprep.subr.mxu1 %v409_v20  ;;  %9194 = vmatpush3.msra.mxu0 %v7749_v16  ;;  %p10384_p2 = por %p10383_p1, %p10382_p0 }
  0x22   : > { %267 = vst.msk [vmem:[#allocation2 + $0x150] sm:$0xff] %vm223_vm0, %v10437_v4  ;;  %268 = vst.msk [vmem:[#allocation2 + $0x158] sm:$0xff] %vm223_vm0, %v10437_v4  ;;  %v291_v42 = vld [vmem:[%s10786_s13 + $0x60] sm:$0xff]  ;;  %v292_v43 = vld [vmem:[%s10786_s13 + $0x68] sm:$0xff]  ;;  %v322_v45 = vmax.f32 %v290_v41, 0.0  ;;  %9258 = vmatpush3.msra.mxu1 %v409_v20  ;;  %9195 = vmatprep.subr.mxu0 %v10808_v23 }
  0x23   : > { %270 = vst.msk [vmem:[#allocation2 + $0x168] sm:$0xff] %vm223_vm0, %v10437_v4  ;;  %271 = vst.msk [vmem:[#allocation2 + $0x170] sm:$0xff] %vm223_vm0, %v10437_v4  ;;  %v323_v46 = vmax.f32 %v291_v42, 0.0  ;;  %v324_v47 = vmax.f32 %v292_v43, 0.0  ;;  %v293_v48 = vld [vmem:[%s10786_s13 + $0x70] sm:$0xff]  ;;  %v294_v49 = vld [vmem:[%s10786_s13 + $0x78] sm:$0xff]  ;;  %9259 = vmatprep.subr.mxu1 %v10813_v24  ;;  %9196 = vmatpush3.msra.mxu0 %v10808_v23  ;;  %p10385_p3 = pnand %p10384_p2, %p10378_p13 }
  0x24   : > { %273 = vst.msk [vmem:[#allocation2 + $0x180] sm:$0xff] %vm223_vm0, %v10437_v4  ;;  %274 = vst.msk [vmem:[#allocation2 + $0x188] sm:$0xff] %vm223_vm0, %v10437_v4  ;;  %v295_v50 = vld [vmem:[%s10786_s13 + $0x80] sm:$0xff]  ;;  %v325_v51 = vmax.f32 %v293_v48, 0.0  ;;  %v326_v52 = vmax.f32 %v294_v49, 0.0  ;;  %v296_v54 = vld [vmem:[%s10786_s13 + $0x88] sm:$0xff]  ;;  %9197 = vmatprep.mubr.msk.f32.mxu0 %vm223_vm0, %v416_v30  ;;  %9260 = vmatpush3.msra.mxu1 %v10813_v24 }
  0x25   : > { %276 = vst.msk [vmem:[#allocation2 + $0x198] sm:$0xff] %vm223_vm0, %v10437_v4  ;;  %277 = vst.msk [vmem:[#allocation2 + $0x1a0] sm:$0xff] %vm223_vm0, %v10437_v4  ;;  %v327_v53 = vmax.f32 %v295_v50, 0.0  ;;  %v297_v55 = vld [vmem:[%s10786_s13 + $0x90] sm:$0xff]  ;;  %v298_v56 = vld [vmem:[%s10786_s13 + $0x98] sm:$0xff]  ;;  %v328_v58 = vmax.f32 %v296_v54, 0.0  ;;  %9261 = vmatprep.mubr.msk.f32.mxu1 %vm223_vm0, %v376_v37 }
  0x26   : > { %3929 = vst.msk [vmem:[#allocation3] sm:$0xff] %vm223_vm0, %v10437_v4  ;;  %3930 = vst.msk [vmem:[#allocation3 + $0x8] sm:$0xff] %vm223_vm0, %v10437_v4  ;;  %v377_v57 = vld [vmem:[#allocation2 + $0x8] sm:$0xff]  ;;  %v329_v59 = vmax.f32 %v297_v55, 0.0  ;;  %v330_v60 = vmax.f32 %v298_v56, 0.0  ;;  %v299_v61 = vld [vmem:[%s10786_s13 + $0xa0] sm:$0xff] }
  0x27   : > { %3932 = vst.msk [vmem:[#allocation3 + $0x18] sm:$0xff] %vm223_vm0, %v10437_v4  ;;  %3933 = vst.msk [vmem:[#allocation3 + $0x20] sm:$0xff] %vm223_vm0, %v10437_v4  ;;  %v300_v62 = vld [vmem:[%s10786_s13 + $0xa8] sm:$0xff]  ;;  %v7827_v63 = vld [vmem:[%s14043_s1 + $0xb8] sm:$0xff]  ;;  %v331_v0 = vmax.f32 %v299_v61, 0.0  ;;  %9262 = vmatmul.mubr.msk.f32.vlgmr.msra.gmra.mxu1 %vm223_vm0, %v377_v57 }
  0x28   : > { %3935 = vst.msk [vmem:[#allocation3 + $0x30] sm:$0xff] %vm223_vm0, %v10437_v4  ;;  %3936 = vst.msk [vmem:[#allocation3 + $0x38] sm:$0xff] %vm223_vm0, %v10437_v4  ;;  %v332_v1 = vmax.f32 %v300_v62, 0.0  ;;  %v301_v2 = vld [vmem:[%s10786_s13 + $0xb0] sm:$0xff]  ;;  %v302_v3 = vld [vmem:[%s10786_s13 + $0xb8] sm:$0xff]  ;;  %9309 = vmatprep.subr.mxu0 %v7827_v63 }
  0x29   : > { %3938 = vst.msk [vmem:[#allocation3 + $0x48] sm:$0xff] %vm223_vm0, %v10437_v4  ;;  %3939 = vst.msk [vmem:[#allocation3 + $0x50] sm:$0xff] %vm223_vm0, %v10437_v4  ;;  %v333_v6 = vmax.f32 %v301_v2, 0.0  ;;  %v334_v7 = vmax.f32 %v302_v3, 0.0  ;;  %v7826_v8 = vld [vmem:[%s14043_s1 + $0xb0] sm:$0xff]  ;;  %v7825_v13 = vld [vmem:[%s14043_s1 + $0xa8] sm:$0xff] }
  0x2a   : > { %3941 = vst.msk [vmem:[#allocation3 + $0x60] sm:$0xff] %vm223_vm0, %v10437_v4  ;;  %3942 = vst.msk [vmem:[#allocation3 + $0x68] sm:$0xff] %vm223_vm0, %v10437_v4  ;;  %v7823_v23 = vld [vmem:[%s14043_s1 + $0x98] sm:$0xff]  ;;  %v303_v29 = vld [vmem:[%s10786_s13 + $0xc0] sm:$0xff] }
  0x2b   : > { %3944 = vst.msk [vmem:[#allocation3 + $0x78] sm:$0xff] %vm223_vm0, %v10437_v4  ;;  %3945 = vst.msk [vmem:[#allocation3 + $0x80] sm:$0xff] %vm223_vm0, %v10437_v4  ;;  %v7867_v28 = vld [vmem:[%s14043_s1 + $0xf8] sm:$0xff]  ;;  %v304_v30 = vld [vmem:[%s10786_s13 + $0xc8] sm:$0xff] }
  0x2c   : > { %3947 = vst.msk [vmem:[#allocation3 + $0x90] sm:$0xff] %vm223_vm0, %v10437_v4  ;;  %3948 = vst.msk [vmem:[#allocation3 + $0x98] sm:$0xff] %vm223_vm0, %v10437_v4  ;;  %v336_v34 = vmax.f32 %v304_v30, 0.0  ;;  %v305_v35 = vld [vmem:[%s10786_s13 + $0xd0] sm:$0xff]  ;;  %9373 = vmatprep.subr.mxu1 %v7867_v28  ;;  %v307_v42 = vld [vmem:[%s10786_s13 + $0xe0] sm:$0xff] }
  0x2d   : > { %3950 = vst.msk [vmem:[#allocation3 + $0xa8] sm:$0xff] %vm223_vm0, %v10437_v4  ;;  %3951 = vst.msk [vmem:[#allocation3 + $0xb0] sm:$0xff] %vm223_vm0, %v10437_v4  ;;  %v308_v43 = vld [vmem:[%s10786_s13 + $0xe8] sm:$0xff]  ;;  %9374 = vmatpush3.msra.mxu1 %v7867_v28  ;;  %v310_v30 = vld [vmem:[%s10786_s13 + $0xf8] sm:$0xff] }
  0x2e   : > { %3953 = vst.msk [vmem:[#allocation3 + $0xc0] sm:$0xff] %vm223_vm0, %v10437_v4  ;;  %3954 = vst.msk [vmem:[#allocation3 + $0xc8] sm:$0xff] %vm223_vm0, %v10437_v4  ;;  %v7861_v28 = vld [vmem:[%s14043_s1 + $0xc8] sm:$0xff] }
  0x2f   : > { %3956 = vst.msk [vmem:[#allocation3 + $0xd8] sm:$0xff] %vm223_vm0, %v10437_v4  ;;  %3957 = vst.msk [vmem:[#allocation3 + $0xe0] sm:$0xff] %vm223_vm0, %v10437_v4 }
  0x30   : > { %3959 = vst.msk [vmem:[#allocation3 + $0xf0] sm:$0xff] %vm223_vm0, %v10437_v4  ;;  %3960 = vst.msk [vmem:[#allocation3 + $0xf8] sm:$0xff] %vm223_vm0, %v10437_v4 }
  0x31   : > { %3962 = vst.msk [vmem:[#allocation3 + $0x108] sm:$0xff] %vm223_vm0, %v10437_v4  ;;  %3963 = vst.msk [vmem:[#allocation3 + $0x110] sm:$0xff] %vm223_vm0, %v10437_v4 }
  0x32   : > { %3965 = vst.msk [vmem:[#allocation3 + $0x120] sm:$0xff] %vm223_vm0, %v10437_v4  ;;  %3966 = vst.msk [vmem:[#allocation3 + $0x128] sm:$0xff] %vm223_vm0, %v10437_v4 }
  0x33   : > { %3968 = vst.msk [vmem:[#allocation3 + $0x138] sm:$0xff] %vm223_vm0, %v10437_v4  ;;  %3969 = vst.msk [vmem:[#allocation3 + $0x140] sm:$0xff] %vm223_vm0, %v10437_v4 }
  0x34   : > { %3971 = vst.msk [vmem:[#allocation3 + $0x150] sm:$0xff] %vm223_vm0, %v10437_v4  ;;  %3972 = vst.msk [vmem:[#allocation3 + $0x158] sm:$0xff] %vm223_vm0, %v10437_v4 }
  0x35   : > { %3974 = vst.msk [vmem:[#allocation3 + $0x168] sm:$0xff] %vm223_vm0, %v10437_v4  ;;  %3975 = vst.msk [vmem:[#allocation3 + $0x170] sm:$0xff] %vm223_vm0, %v10437_v4 }
  0x36   : > { %3977 = vst.msk [vmem:[#allocation3 + $0x180] sm:$0xff] %vm223_vm0, %v10437_v4  ;;  %3978 = vst.msk [vmem:[#allocation3 + $0x188] sm:$0xff] %vm223_vm0, %v10437_v4 }
  0x37   : > { %3980 = vst.msk [vmem:[#allocation3 + $0x198] sm:$0xff] %vm223_vm0, %v10437_v4  ;;  %3981 = vst.msk [vmem:[#allocation3 + $0x1a0] sm:$0xff] %vm223_vm0, %v10437_v4 }
  0x38   : > { %227 = vst.msk [vmem:[#allocation2 + $0x10] sm:$0x3] %vm226_vm1, %v10437_v4  ;;  %230 = vst.msk [vmem:[#allocation2 + $0x28] sm:$0x3] %vm226_vm1, %v10437_v4 }
  0x39   : > { %233 = vst.msk [vmem:[#allocation2 + $0x40] sm:$0x3] %vm226_vm1, %v10437_v4  ;;  %236 = vst.msk [vmem:[#allocation2 + $0x58] sm:$0x3] %vm226_vm1, %v10437_v4 }
  0x3a   : > { %239 = vst.msk [vmem:[#allocation2 + $0x70] sm:$0x3] %vm226_vm1, %v10437_v4  ;;  %242 = vst.msk [vmem:[#allocation2 + $0x88] sm:$0x3] %vm226_vm1, %v10437_v4 }
  0x3b   : > { %245 = vst.msk [vmem:[#allocation2 + $0xa0] sm:$0x3] %vm226_vm1, %v10437_v4  ;;  %248 = vst.msk [vmem:[#allocation2 + $0xb8] sm:$0x3] %vm226_vm1, %v10437_v4 }
  0x3c   : > { %251 = vst.msk [vmem:[#allocation2 + $0xd0] sm:$0x3] %vm226_vm1, %v10437_v4  ;;  %254 = vst.msk [vmem:[#allocation2 + $0xe8] sm:$0x3] %vm226_vm1, %v10437_v4 }
  0x3d   : > { %257 = vst.msk [vmem:[#allocation2 + $0x100] sm:$0x3] %vm226_vm1, %v10437_v4  ;;  %260 = vst.msk [vmem:[#allocation2 + $0x118] sm:$0x3] %vm226_vm1, %v10437_v4 }
  0x3e   : > { %263 = vst.msk [vmem:[#allocation2 + $0x130] sm:$0x3] %vm226_vm1, %v10437_v4  ;;  %266 = vst.msk [vmem:[#allocation2 + $0x148] sm:$0x3] %vm226_vm1, %v10437_v4 }
  0x3f   : > { %269 = vst.msk [vmem:[#allocation2 + $0x160] sm:$0x3] %vm226_vm1, %v10437_v4  ;;  %272 = vst.msk [vmem:[#allocation2 + $0x178] sm:$0x3] %vm226_vm1, %v10437_v4  ;;  %v417_v44 = vld [vmem:[#allocation2 + $0x9] sm:$0xff] }
  0x40   : > { %275 = vst.msk [vmem:[#allocation2 + $0x190] sm:$0x3] %vm226_vm1, %v10437_v4  ;;  %278 = vst.msk [vmem:[#allocation2 + $0x1a8] sm:$0x3] %vm226_vm1, %v10437_v4  ;;  %9198 = vmatmul.mubr.msk.f32.vlgmr.msra.gmra.mxu0 %vm223_vm0, %v417_v44  ;;  %v7866_v44 = vld [vmem:[%s14043_s1 + $0xf0] sm:$0xff] }
  0x41   : > { %3931 = vst.msk [vmem:[#allocation3 + $0x10] sm:$0x3] %vm226_vm1, %v10437_v4  ;;  %3934 = vst.msk [vmem:[#allocation3 + $0x28] sm:$0x3] %vm226_vm1, %v10437_v4  ;;  %9310 = vmatpush3.msra.mxu0 %v7827_v63  ;;  %9375 = vmatprep.subr.mxu1 %v7866_v44 }
  0x42   : > { %3937 = vst.msk [vmem:[#allocation3 + $0x40] sm:$0x3] %vm226_vm1, %v10437_v4  ;;  %3940 = vst.msk [vmem:[#allocation3 + $0x58] sm:$0x3] %vm226_vm1, %v10437_v4  ;;  %9311 = vmatprep.subr.mxu0 %v7826_v8  ;;  %9376 = vmatpush3.msra.mxu1 %v7866_v44 }
  0x43   : > { %3943 = vst.msk [vmem:[#allocation3 + $0x70] sm:$0x3] %vm226_vm1, %v10437_v4  ;;  %3946 = vst.msk [vmem:[#allocation3 + $0x88] sm:$0x3] %vm226_vm1, %v10437_v4  ;;  %9312 = vmatpush3.msra.mxu0 %v7826_v8 }
  0x44   : > { %3949 = vst.msk [vmem:[#allocation3 + $0xa0] sm:$0x3] %vm226_vm1, %v10437_v4  ;;  %3952 = vst.msk [vmem:[#allocation3 + $0xb8] sm:$0x3] %vm226_vm1, %v10437_v4  ;;  %9313 = vmatprep.subr.mxu0 %v7825_v13 }
  0x45   : > { %3955 = vst.msk [vmem:[#allocation3 + $0xd0] sm:$0x3] %vm226_vm1, %v10437_v4  ;;  %3958 = vst.msk [vmem:[#allocation3 + $0xe8] sm:$0x3] %vm226_vm1, %v10437_v4  ;;  %9314 = vmatpush3.msra.mxu0 %v7825_v13 }
  0x46   : > { %3961 = vst.msk [vmem:[#allocation3 + $0x100] sm:$0x3] %vm226_vm1, %v10437_v4  ;;  %3964 = vst.msk [vmem:[#allocation3 + $0x118] sm:$0x3] %vm226_vm1, %v10437_v4 }
  0x47   : > { %3967 = vst.msk [vmem:[#allocation3 + $0x130] sm:$0x3] %vm226_vm1, %v10437_v4  ;;  %3970 = vst.msk [vmem:[#allocation3 + $0x148] sm:$0x3] %vm226_vm1, %v10437_v4 }
  0x48   : > { %3973 = vst.msk [vmem:[#allocation3 + $0x160] sm:$0x3] %vm226_vm1, %v10437_v4  ;;  %3976 = vst.msk [vmem:[#allocation3 + $0x178] sm:$0x3] %vm226_vm1, %v10437_v4 }
  0x49   : > { %3979 = vst.msk [vmem:[#allocation3 + $0x190] sm:$0x3] %vm226_vm1, %v10437_v4  ;;  %3982 = vst.msk [vmem:[#allocation3 + $0x1a8] sm:$0x3] %vm226_vm1, %v10437_v4 }
  0x4a   : > { %344 = vst.msk [vmem:[#allocation2 + $0x19] sm:$0xff] %vm223_vm0, %v311_v17  ;;  %345 = vst.msk [vmem:[#allocation2 + $0x21] sm:$0xff] %vm223_vm0, %v312_v18  ;;  %v7824_v18 = vld [vmem:[%s14043_s1 + $0xa0] sm:$0xff] }
  0x4b   : > { %346 = vst.msk [vmem:[#allocation2 + $0x31] sm:$0xff] %vm223_vm0, %v313_v19  ;;  %347 = vst.msk [vmem:[#allocation2 + $0x39] sm:$0xff] %vm223_vm0, %v314_v25  ;;  %9315 = vmatprep.subr.mxu0 %v7824_v18 }
  0x4c   : > { %348 = vst.msk [vmem:[#allocation2 + $0x49] sm:$0xff] %vm223_vm0, %v315_v26  ;;  %349 = vst.msk [vmem:[#allocation2 + $0x51] sm:$0xff] %vm223_vm0, %v316_v31  ;;  %9316 = vmatpush3.msra.mxu0 %v7824_v18 }
  0x4d   : > { %350 = vst.msk [vmem:[#allocation2 + $0x61] sm:$0xff] %vm223_vm0, %v317_v32  ;;  %351 = vst.msk [vmem:[#allocation2 + $0x69] sm:$0xff] %vm223_vm0, %v318_v33  ;;  %9317 = vmatprep.subr.mxu0 %v7823_v23  ;;  %v7822_v32 = vld [vmem:[%s14043_s1 + $0x90] sm:$0xff]  ;;  %v335_v33 = vmax.f32 %v303_v29, 0.0 }
  0x4e   : > { %352 = vst.msk [vmem:[#allocation2 + $0x79] sm:$0xff] %vm223_vm0, %v319_v38  ;;  %353 = vst.msk [vmem:[#allocation2 + $0x81] sm:$0xff] %vm223_vm0, %v320_v39  ;;  %v337_v38 = vmax.f32 %v305_v35, 0.0  ;;  %v306_v39 = vld [vmem:[%s10786_s13 + $0xd8] sm:$0xff]  ;;  %9318 = vmatpush3.msra.mxu0 %v7823_v23  ;;  %v309_v29 = vld [vmem:[%s10786_s13 + $0xf0] sm:$0xff] }
  0x4f   : > { %354 = vst.msk [vmem:[#allocation2 + $0x91] sm:$0xff] %vm223_vm0, %v321_v40  ;;  %355 = vst.msk [vmem:[#allocation2 + $0x99] sm:$0xff] %vm223_vm0, %v322_v45  ;;  %v338_v41 = vmax.f32 %v306_v39, 0.0  ;;  %9319 = vmatprep.subr.mxu0 %v7822_v32  ;;  %v339_v45 = vmax.f32 %v307_v42, 0.0 }
  0x50   : > { %356 = vst.msk [vmem:[#allocation2 + $0xa9] sm:$0xff] %vm223_vm0, %v323_v46  ;;  %357 = vst.msk [vmem:[#allocation2 + $0xb1] sm:$0xff] %vm223_vm0, %v324_v47  ;;  %v340_v46 = vmax.f32 %v308_v43, 0.0  ;;  %v7821_v47 = vld [vmem:[%s14043_s1 + $0x88] sm:$0xff]  ;;  %9320 = vmatpush3.msra.mxu0 %v7822_v32  ;;  %v341_v32 = vmax.f32 %v309_v29, 0.0 }
  0x51   : > { %358 = vst.msk [vmem:[#allocation2 + $0xc1] sm:$0xff] %vm223_vm0, %v325_v51  ;;  %359 = vst.msk [vmem:[#allocation2 + $0xc9] sm:$0xff] %vm223_vm0, %v326_v52  ;;  %v10860_v4 = vld [vmem:[#allocation2 + $0x19] sm:$0xff]  ;;  %v10876_v9 = vld [vmem:[#allocation2 + $0x21] sm:$0xff]  ;;  %9321 = vmatprep.subr.mxu0 %v7821_v47 }
  0x52   : > { %360 = vst.msk [vmem:[#allocation2 + $0xd9] sm:$0xff] %vm223_vm0, %v327_v53  ;;  %v10862_v5 = vld [vmem:[#allocation2 + $0x18] sm:$0xff]  ;;  %361 = vst.msk [vmem:[#allocation2 + $0xe1] sm:$0xff] %vm223_vm0, %v328_v58  ;;  %9200 = vmatprep.mubr.msk.f32.mxu0 %vm223_vm0, %v10860_v4  ;;  %v10878_v10 = vld [vmem:[#allocation2 + $0x20] sm:$0xff]  ;;  %9322 = vmatpush3.msra.mxu0 %v7821_v47 }
  0x53   : > { %362 = vst.msk [vmem:[#allocation2 + $0xf1] sm:$0xff] %vm223_vm0, %v329_v59  ;;  %363 = vst.msk [vmem:[#allocation2 + $0xf9] sm:$0xff] %vm223_vm0, %v330_v60  ;;  %9264 = vmatprep.mubr.msk.f32.mxu1 %vm223_vm0, %v10862_v5  ;;  %v10884_v11 = vld [vmem:[#allocation2 + $0x31] sm:$0xff]  ;;  %9201 = vmatmul.mubr.msk.f32.gmra.mxu0 %vm223_vm0, %v10876_v9  ;;  %v10899_v14 = vld [vmem:[#allocation2 + $0x39] sm:$0xff] }
  0x54   : > { %364 = vst.msk [vmem:[#allocation2 + $0x109] sm:$0xff] %vm223_vm0, %v331_v0  ;;  %365 = vst.msk [vmem:[#allocation2 + $0x111] sm:$0xff] %vm223_vm0, %v332_v1  ;;  %v10886_v12 = vld [vmem:[#allocation2 + $0x30] sm:$0xff]  ;;  %9265 = vmatmul.mubr.msk.f32.gmra.mxu1 %vm223_vm0, %v10878_v10  ;;  %9203 = vmatprep.mubr.msk.f32.mxu0 %vm223_vm0, %v10884_v11  ;;  %v10901_v15 = vld [vmem:[#allocation2 + $0x38] sm:$0xff] }
  0x55   : > { %366 = vst.msk [vmem:[#allocation2 + $0x121] sm:$0xff] %vm223_vm0, %v333_v6  ;;  %367 = vst.msk [vmem:[#allocation2 + $0x129] sm:$0xff] %vm223_vm0, %v334_v7  ;;  %9267 = vmatprep.mubr.msk.f32.mxu1 %vm223_vm0, %v10886_v12  ;;  %v10903_v16 = vld [vmem:[#allocation2 + $0x49] sm:$0xff]  ;;  %v10918_v19 = vld [vmem:[#allocation2 + $0x51] sm:$0xff] }
  0x56   : > { %v10905_v17 = vld [vmem:[#allocation2 + $0x48] sm:$0xff]  ;;  %v10920_v20 = vld [vmem:[#allocation2 + $0x50] sm:$0xff]  ;;  %v10924_v22 = vld [vmem:[#allocation2 + $0x60] sm:$0xff]  ;;  %368 = vst.msk [vmem:[#allocation2 + $0x139] sm:$0xff] %vm223_vm0, %v335_v33  ;;  %v342_v33 = vmax.f32 %v310_v30, 0.0 }
  0x57   : > { %9204 = vmatmul.mubr.msk.f32.gmra.mxu0 %vm223_vm0, %v10899_v14  ;;  %v10922_v21 = vld [vmem:[#allocation2 + $0x61] sm:$0xff]  ;;  %v10937_v24 = vld [vmem:[#allocation2 + $0x69] sm:$0xff]  ;;  %v10941_v26 = vld [vmem:[#allocation2 + $0x79] sm:$0xff]  ;;  %369 = vst.msk [vmem:[#allocation2 + $0x141] sm:$0xff] %vm223_vm0, %v336_v34 }
  0x58   : > { %9268 = vmatmul.mubr.msk.f32.gmra.mxu1 %vm223_vm0, %v10901_v15  ;;  %9206 = vmatprep.mubr.msk.f32.mxu0 %vm223_vm0, %v10903_v16  ;;  %v10939_v25 = vld [vmem:[#allocation2 + $0x68] sm:$0xff]  ;;  %v10943_v27 = vld [vmem:[#allocation2 + $0x78] sm:$0xff]  ;;  %v10964_v36 = vld [vmem:[#allocation2 + $0x80] sm:$0xff]  ;;  %370 = vst.msk [vmem:[#allocation2 + $0x151] sm:$0xff] %vm223_vm0, %v337_v38 }
  0x59   : > { %9270 = vmatprep.mubr.msk.f32.mxu1 %vm223_vm0, %v10905_v17  ;;  %v10954_v31 = vld [vmem:[#allocation2 + $0x81] sm:$0xff]  ;;  %v10966_v37 = vld [vmem:[#allocation2 + $0x91] sm:$0xff]  ;;  %371 = vst.msk [vmem:[#allocation2 + $0x159] sm:$0xff] %vm223_vm0, %v338_v41  ;;  %v10991_v48 = vld [vmem:[#allocation2 + $0x99] sm:$0xff] }
  0x5a   : > { %v10969_v40 = vld [vmem:[#allocation2 + $0x90] sm:$0xff]  ;;  %v10993_v49 = vld [vmem:[#allocation2 + $0x98] sm:$0xff]  ;;  %372 = vst.msk [vmem:[#allocation2 + $0x169] sm:$0xff] %vm223_vm0, %v339_v45  ;;  %373 = vst.msk [vmem:[#allocation2 + $0x171] sm:$0xff] %vm223_vm0, %v340_v46 }
  0x5b   : > { %9207 = vmatmul.mubr.msk.f32.gmra.mxu0 %vm223_vm0, %v10918_v19  ;;  %v10997_v50 = vld [vmem:[#allocation2 + $0xa9] sm:$0xff]  ;;  %v7820_v53 = vld [vmem:[%s14043_s1 + $0x80] sm:$0xff]  ;;  %v11015_v54 = vld [vmem:[#allocation2 + $0xb1] sm:$0xff]  ;;  %374 = vst.msk [vmem:[#allocation2 + $0x181] sm:$0xff] %vm223_vm0, %v341_v32 }
  0x5c   : > { %9271 = vmatmul.mubr.msk.f32.gmra.mxu1 %vm223_vm0, %v10920_v20  ;;  %9209 = vmatprep.mubr.msk.f32.mxu0 %vm223_vm0, %v10922_v21  ;;  %v10999_v51 = vld [vmem:[#allocation2 + $0xa8] sm:$0xff]  ;;  %v11017_v55 = vld [vmem:[#allocation2 + $0xb0] sm:$0xff]  ;;  %v11021_v57 = vld [vmem:[#allocation2 + $0xc0] sm:$0xff]  ;;  %375 = vst.msk [vmem:[#allocation2 + $0x189] sm:$0xff] %vm223_vm0, %v342_v33 }
  0x5d   : > { %9273 = vmatprep.mubr.msk.f32.mxu1 %vm223_vm0, %v10924_v22  ;;  %v7865_v52 = vld [vmem:[%s14043_s1 + $0xe8] sm:$0xff]  ;;  %9323 = vmatprep.subr.mxu0 %v7820_v53  ;;  %v7864_v58 = vld [vmem:[%s14043_s1 + $0xe0] sm:$0xff]  ;;  %v11033_v59 = vld [vmem:[%s14043_s1 + $0x138] sm:$0xff] }
  0x5e   : > { %v11019_v56 = vld [vmem:[#allocation2 + $0xc1] sm:$0xff]  ;;  %9377 = vmatprep.subr.mxu1 %v7865_v52  ;;  %v11039_v60 = vld [vmem:[#allocation2 + $0xc9] sm:$0xff]  ;;  %v11043_v62 = vld [vmem:[#allocation2 + $0xd9] sm:$0xff]  ;;  %9324 = vmatpush3.msra.mxu0 %v7820_v53 }
  0x5f   : > { %9210 = vmatmul.mubr.msk.f32.gmra.mxu0 %vm223_vm0, %v10937_v24  ;;  %9378 = vmatpush3.msra.mxu1 %v7865_v52  ;;  %v11041_v61 = vld [vmem:[#allocation2 + $0xc8] sm:$0xff]  ;;  %v11045_v63 = vld [vmem:[#allocation2 + $0xd8] sm:$0xff]  ;;  %v11061_v2 = vld [vmem:[#allocation2 + $0xe0] sm:$0xff] }
  0x60   : > { %9274 = vmatmul.mubr.msk.f32.gmra.mxu1 %vm223_vm0, %v10939_v25  ;;  %9212 = vmatprep.mubr.msk.f32.mxu0 %vm223_vm0, %v10941_v26  ;;  %v7863_v0 = vld [vmem:[%s14043_s1 + $0xd8] sm:$0xff]  ;;  %v11059_v1 = vld [vmem:[#allocation2 + $0xe1] sm:$0xff]  ;;  %v11065_v6 = vld [vmem:[#allocation2 + $0xf0] sm:$0xff] }
  0x61   : > { %9276 = vmatprep.mubr.msk.f32.mxu1 %vm223_vm0, %v10943_v27  ;;  %9379 = vmatprep.subr.mxu1 %v7864_v58  ;;  %v11063_v3 = vld [vmem:[#allocation2 + $0xf1] sm:$0xff]  ;;  %v11078_v8 = vld [vmem:[#allocation2 + $0xf9] sm:$0xff]  ;;  %v11082_v18 = vld [vmem:[#allocation2 + $0x109] sm:$0xff] }
  0x62   : > { %9380 = vmatpush3.msra.mxu1 %v7864_v58  ;;  %9437 = vmatprep.subr.mxu0 %v11033_v59  ;;  %v7862_v7 = vld [vmem:[%s14043_s1 + $0xd0] sm:$0xff]  ;;  %v11080_v13 = vld [vmem:[#allocation2 + $0xf8] sm:$0xff]  ;;  %v11084_v23 = vld [vmem:[#allocation2 + $0x108] sm:$0xff] }
  0x63   : > { %9213 = vmatmul.mubr.msk.f32.gmra.mxu0 %vm223_vm0, %v10954_v31  ;;  %9381 = vmatprep.subr.mxu1 %v7863_v0  ;;  %v11099_v34 = vld [vmem:[#allocation2 + $0x111] sm:$0xff]  ;;  %v11103_v38 = vld [vmem:[#allocation2 + $0x121] sm:$0xff]  ;;  %v11120_v42 = vld [vmem:[#allocation2 + $0x129] sm:$0xff] }
  0x64   : > { %9277 = vmatmul.mubr.msk.f32.gmra.mxu1 %vm223_vm0, %v10964_v36  ;;  %9215 = vmatprep.mubr.msk.f32.mxu0 %vm223_vm0, %v10966_v37  ;;  %v11101_v35 = vld [vmem:[#allocation2 + $0x110] sm:$0xff]  ;;  %v11105_v39 = vld [vmem:[#allocation2 + $0x120] sm:$0xff]  ;;  %v11122_v43 = vld [vmem:[#allocation2 + $0x128] sm:$0xff] }
  0x65   : > { %9279 = vmatprep.mubr.msk.f32.mxu1 %vm223_vm0, %v10969_v40  ;;  %9382 = vmatpush3.msra.mxu1 %v7863_v0  ;;  %v7860_v41 = vld [vmem:[%s14043_s1 + $0xc0] sm:$0xff]  ;;  %v11126_v45 = vld [vmem:[#allocation2 + $0x138] sm:$0xff]  ;;  %v11145_v58 = vld [vmem:[#allocation2 + $0x150] sm:$0xff] }
  0x66   : > { %9383 = vmatprep.subr.mxu1 %v7862_v7  ;;  %v11124_v44 = vld [vmem:[#allocation2 + $0x139] sm:$0xff]  ;;  %v11139_v47 = vld [vmem:[#allocation2 + $0x141] sm:$0xff]  ;;  %v11143_v53 = vld [vmem:[#allocation2 + $0x151] sm:$0xff] }
  0x67   : > { %9216 = vmatmul.mubr.msk.f32.gmra.mxu0 %vm223_vm0, %v10991_v48  ;;  %9384 = vmatpush3.msra.mxu1 %v7862_v7  ;;  %v7947_v46 = vld [vmem:[%s14043_s1 + $0x178] sm:$0xff]  ;;  %v11141_v52 = vld [vmem:[#allocation2 + $0x140] sm:$0xff]  ;;  %v11161_v29 = vld [vmem:[#allocation2 + $0x168] sm:$0xff] }
  0x68   : > { %9280 = vmatmul.mubr.msk.f32.gmra.mxu1 %vm223_vm0, %v10993_v49  ;;  %9218 = vmatprep.mubr.msk.f32.mxu0 %vm223_vm0, %v10997_v50  ;;  %v11155_v0 = vld [vmem:[#allocation2 + $0x159] sm:$0xff]  ;;  %v11171_v30 = vld [vmem:[#allocation2 + $0x171] sm:$0xff]  ;;  %v1099_v33 = vld [vmem:[#allocation2 + $0x2] sm:$0xff] }
  0x69   : > { %9282 = vmatprep.mubr.msk.f32.mxu1 %vm223_vm0, %v10999_v51  ;;  %9385 = vmatprep.subr.mxu1 %v7861_v28  ;;  %14057 = vst [vmem:[#allocation7_spill] sm:$0xff] %v11155_v0  ;;  %v11157_v7 = vld [vmem:[#allocation2 + $0x158] sm:$0xff]  ;;  %v11173_v32 = vld [vmem:[#allocation2 + $0x170] sm:$0xff] }
  0x6a   : > { %9386 = vmatpush3.msra.mxu1 %v7861_v28  ;;  %v11159_v28 = vld [vmem:[#allocation2 + $0x169] sm:$0xff] }
  0x6b   : > { %9219 = vmatmul.mubr.msk.f32.gmra.mxu0 %vm223_vm0, %v11015_v54  ;;  %9387 = vmatprep.subr.mxu1 %v7860_v41  ;;  %14058 = vst [vmem:[#allocation8_spill] sm:$0xff] %v11159_v28 }
  0x6c   : > { %9283 = vmatmul.mubr.msk.f32.gmra.mxu1 %vm223_vm0, %v11017_v55  ;;  %9221 = vmatprep.mubr.msk.f32.mxu0 %vm223_vm0, %v11019_v56 }
  0x6d   : > { %9285 = vmatprep.mubr.msk.f32.mxu1 %vm223_vm0, %v11021_v57  ;;  %9388 = vmatpush3.msra.mxu1 %v7860_v41  ;;  %v1100_v41 = vld [vmem:[#allocation2 + $0xa] sm:$0xff] }
  0x6e   : > { %9501 = vmatprep.subr.mxu1 %v7947_v46 }
  0x6f   : > { %9222 = vmatmul.mubr.msk.f32.gmra.mxu0 %vm223_vm0, %v11039_v60 }
  0x70   : > { %9286 = vmatmul.mubr.msk.f32.gmra.mxu1 %vm223_vm0, %v11041_v61  ;;  %9224 = vmatprep.mubr.msk.f32.mxu0 %vm223_vm0, %v11043_v62 }
  0x71   : > { %9288 = vmatprep.mubr.msk.f32.mxu1 %vm223_vm0, %v11045_v63 }
  0x73   : > { %9225 = vmatmul.mubr.msk.f32.gmra.mxu0 %vm223_vm0, %v11059_v1 }
  0x74   : > { %9289 = vmatmul.mubr.msk.f32.gmra.mxu1 %vm223_vm0, %v11061_v2  ;;  %9227 = vmatprep.mubr.msk.f32.mxu0 %vm223_vm0, %v11063_v3 }
  0x75   : > { %9291 = vmatprep.mubr.msk.f32.mxu1 %vm223_vm0, %v11065_v6 }
  0x77   : > { %9228 = vmatmul.mubr.msk.f32.gmra.mxu0 %vm223_vm0, %v11078_v8 }
  0x78   : > { %9292 = vmatmul.mubr.msk.f32.gmra.mxu1 %vm223_vm0, %v11080_v13  ;;  %9230 = vmatprep.mubr.msk.f32.mxu0 %vm223_vm0, %v11082_v18 }
  0x79   : > { %9294 = vmatprep.mubr.msk.f32.mxu1 %vm223_vm0, %v11084_v23 }
  0x7b   : > { %9231 = vmatmul.mubr.msk.f32.gmra.mxu0 %vm223_vm0, %v11099_v34 }
  0x7c   : > { %9295 = vmatmul.mubr.msk.f32.gmra.mxu1 %vm223_vm0, %v11101_v35  ;;  %9233 = vmatprep.mubr.msk.f32.mxu0 %vm223_vm0, %v11103_v38 }
  0x7d   : > { %9297 = vmatprep.mubr.msk.f32.mxu1 %vm223_vm0, %v11105_v39 }
  0x7f   : > { %9234 = vmatmul.mubr.msk.f32.gmra.mxu0 %vm223_vm0, %v11120_v42 }
  0x80   : > { %9298 = vmatmul.mubr.msk.f32.gmra.mxu1 %vm223_vm0, %v11122_v43  ;;  %9236 = vmatprep.mubr.msk.f32.mxu0 %vm223_vm0, %v11124_v44 }
  0x81   : > { %9300 = vmatprep.mubr.msk.f32.mxu1 %vm223_vm0, %v11126_v45 }
  0x83   : > { %9237 = vmatmul.mubr.msk.f32.gmra.mxu0 %vm223_vm0, %v11139_v47 }
  0x84   : > { %9301 = vmatmul.mubr.msk.f32.gmra.mxu1 %vm223_vm0, %v11141_v52  ;;  %9239 = vmatprep.mubr.msk.f32.mxu0 %vm223_vm0, %v11143_v53 }
  0x85   : > { %9303 = vmatprep.mubr.msk.f32.mxu1 %vm223_vm0, %v11145_v58 }
  0x87   : > { %9240 = vmatmul.mubr.msk.f32.gmra.mxu0 %vm223_vm0, %v11155_v0  ;;  %v7906_v0 = vld [vmem:[%s14043_s1 + $0x130] sm:$0xff] }
  0x88   : > { %9304 = vmatmul.mubr.msk.f32.gmra.mxu1 %vm223_vm0, %v11157_v7  ;;  %9242 = vmatprep.mubr.msk.f32.mxu0 %vm223_vm0, %v11159_v28  ;;  %v11182_v28 = vld [vmem:[#allocation2 + $0x1a] sm:$0xff] }
  0x89   : > { %9306 = vmatprep.mubr.msk.f32.mxu1 %vm223_vm0, %v11161_v29 }
  0x8b   : > { %9243 = vmatmul.mubr.msk.f32.gmra.mxu0 %vm223_vm0, %v11171_v30 }
  0x8c   : > { %9307 = vmatmul.mubr.msk.f32.gmra.mxu1 %vm223_vm0, %v11173_v32  ;;  %9325 = vmatprep.mubr.msk.f32.mxu0 %vm223_vm0, %v1099_v33  ;;  %v11193_v33 = vld [vmem:[#allocation2 + $0x22] sm:$0xff] }
  0x8d   : > { %9389 = vmatprep.mubr.msk.f32.mxu1 %vm223_vm0, %v10862_v5  ;;  %v11197_v5 = vld [vmem:[#allocation2 + $0x32] sm:$0xff] }
  0x8f   : > { %9326 = vmatmul.mubr.msk.f32.vlgmr.msra.gmra.mxu0 %vm223_vm0, %v1100_v41  ;;  %v7905_v41 = vld [vmem:[%s14043_s1 + $0x128] sm:$0xff] }
  0x90   : > { %9390 = vmatmul.mubr.msk.f32.vlgmr.msra.gmra.mxu1 %vm223_vm0, %v10878_v10  ;;  %9438 = vmatpush3.msra.mxu0 %v11033_v59  ;;  %v7946_v10 = vld [vmem:[%s14043_s1 + $0x170] sm:$0xff] }
  0x91   : > { %9328 = vmatprep.mubr.msk.f32.mxu0 %vm223_vm0, %v11182_v28  ;;  %9392 = vmatprep.mubr.msk.f32.mxu1 %vm223_vm0, %v10886_v12  ;;  %v11211_v12 = vld [vmem:[#allocation2 + $0x3a] sm:$0xff]  ;;  %v11215_v59 = vld [vmem:[#allocation2 + $0x4a] sm:$0xff] }
  0x92   : > { %9439 = vmatprep.subr.mxu0 %v7906_v0  ;;  %9502 = vmatpush3.msra.mxu1 %v7947_v46  ;;  %v7904_v46 = vld [vmem:[%s14043_s1 + $0x120] sm:$0xff] }
  0x93   : > { %9440 = vmatpush3.msra.mxu0 %v7906_v0  ;;  %9503 = vmatprep.subr.mxu1 %v7946_v10  ;;  %v11233_v0 = vld [vmem:[#allocation2 + $0x62] sm:$0xff] }
  0x94   : > { %9329 = vmatmul.mubr.msk.f32.gmra.mxu0 %vm223_vm0, %v11193_v33  ;;  %9393 = vmatmul.mubr.msk.f32.gmra.mxu1 %vm223_vm0, %v10901_v15  ;;  %v7945_v15 = vld [vmem:[%s14043_s1 + $0x168] sm:$0xff] }
  0x95   : > { %9331 = vmatprep.mubr.msk.f32.mxu0 %vm223_vm0, %v11197_v5  ;;  %9395 = vmatprep.mubr.msk.f32.mxu1 %vm223_vm0, %v10905_v17  ;;  %v11229_v17 = vld [vmem:[#allocation2 + $0x52] sm:$0xff] }
  0x96   : > { %9441 = vmatprep.subr.mxu0 %v7905_v41  ;;  %9504 = vmatpush3.msra.mxu1 %v7946_v10  ;;  %v11251_v10 = vld [vmem:[#allocation2 + $0x7a] sm:$0xff] }
  0x97   : > { %9442 = vmatpush3.msra.mxu0 %v7905_v41  ;;  %9505 = vmatprep.subr.mxu1 %v7945_v15  ;;  %v7903_v41 = vld [vmem:[%s14043_s1 + $0x118] sm:$0xff] }
  0x98   : > { %9332 = vmatmul.mubr.msk.f32.gmra.mxu0 %vm223_vm0, %v11211_v12  ;;  %9396 = vmatmul.mubr.msk.f32.gmra.mxu1 %vm223_vm0, %v10920_v20  ;;  %v7944_v20 = vld [vmem:[%s14043_s1 + $0x160] sm:$0xff] }
  0x99   : > { %9334 = vmatprep.mubr.msk.f32.mxu0 %vm223_vm0, %v11215_v59  ;;  %9398 = vmatprep.mubr.msk.f32.mxu1 %vm223_vm0, %v10924_v22  ;;  %v11247_v22 = vld [vmem:[#allocation2 + $0x6a] sm:$0xff] }
  0x9a   : > { %9443 = vmatprep.subr.mxu0 %v7904_v46  ;;  %9506 = vmatpush3.msra.mxu1 %v7945_v15  ;;  %v11269_v15 = vld [vmem:[#allocation2 + $0x92] sm:$0xff] }
  0x9b   : > { %9444 = vmatpush3.msra.mxu0 %v7904_v46  ;;  %9507 = vmatprep.subr.mxu1 %v7944_v20  ;;  %v7902_v46 = vld [vmem:[%s14043_s1 + $0x110] sm:$0xff] }
  0x9c   : > { %9335 = vmatmul.mubr.msk.f32.gmra.mxu0 %vm223_vm0, %v11229_v17  ;;  %9399 = vmatmul.mubr.msk.f32.gmra.mxu1 %vm223_vm0, %v10939_v25  ;;  %v7943_v25 = vld [vmem:[%s14043_s1 + $0x158] sm:$0xff] }
  0x9d   : > { %9337 = vmatprep.mubr.msk.f32.mxu0 %vm223_vm0, %v11233_v0  ;;  %9401 = vmatprep.mubr.msk.f32.mxu1 %vm223_vm0, %v10943_v27  ;;  %v11265_v27 = vld [vmem:[#allocation2 + $0x82] sm:$0xff] }
  0x9e   : > { %9445 = vmatprep.subr.mxu0 %v7903_v41  ;;  %9508 = vmatpush3.msra.mxu1 %v7944_v20  ;;  %v11287_v20 = vld [vmem:[#allocation2 + $0xaa] sm:$0xff] }
  0x9f   : > { %9446 = vmatpush3.msra.mxu0 %v7903_v41  ;;  %9509 = vmatprep.subr.mxu1 %v7943_v25  ;;  %v7901_v41 = vld [vmem:[%s14043_s1 + $0x108] sm:$0xff] }
  0xa0   : > { %9338 = vmatmul.mubr.msk.f32.gmra.mxu0 %vm223_vm0, %v11247_v22  ;;  %9402 = vmatmul.mubr.msk.f32.gmra.mxu1 %vm223_vm0, %v10964_v36  ;;  %v7942_v36 = vld [vmem:[%s14043_s1 + $0x150] sm:$0xff] }
  0xa1   : > { %9340 = vmatprep.mubr.msk.f32.mxu0 %vm223_vm0, %v11251_v10  ;;  %9404 = vmatprep.mubr.msk.f32.mxu1 %vm223_vm0, %v10969_v40  ;;  %v11283_v40 = vld [vmem:[#allocation2 + $0x9a] sm:$0xff] }
  0xa2   : > { %9447 = vmatprep.subr.mxu0 %v7902_v46  ;;  %9510 = vmatpush3.msra.mxu1 %v7943_v25  ;;  %v11305_v25 = vld [vmem:[#allocation2 + $0xc2] sm:$0xff] }
  0xa3   : > { %9448 = vmatpush3.msra.mxu0 %v7902_v46  ;;  %9511 = vmatprep.subr.mxu1 %v7942_v36  ;;  %v7900_v46 = vld [vmem:[%s14043_s1 + $0x100] sm:$0xff] }
  0xa4   : > { %9341 = vmatmul.mubr.msk.f32.gmra.mxu0 %vm223_vm0, %v11265_v27  ;;  %9405 = vmatmul.mubr.msk.f32.gmra.mxu1 %vm223_vm0, %v10993_v49  ;;  %v7941_v49 = vld [vmem:[%s14043_s1 + $0x148] sm:$0xff] }
  0xa5   : > { %9343 = vmatprep.mubr.msk.f32.mxu0 %vm223_vm0, %v11269_v15  ;;  %9407 = vmatprep.mubr.msk.f32.mxu1 %vm223_vm0, %v10999_v51  ;;  %v11301_v51 = vld [vmem:[#allocation2 + $0xb2] sm:$0xff] }
  0xa6   : > { %9449 = vmatprep.subr.mxu0 %v7901_v41  ;;  %9512 = vmatpush3.msra.mxu1 %v7942_v36  ;;  %v11323_v36 = vld [vmem:[#allocation2 + $0xda] sm:$0xff] }
  0xa7   : > { %9450 = vmatpush3.msra.mxu0 %v7901_v41  ;;  %9513 = vmatprep.subr.mxu1 %v7941_v49  ;;  %v7940_v41 = vld [vmem:[%s14043_s1 + $0x140] sm:$0xff] }
  0xa8   : > { %9344 = vmatmul.mubr.msk.f32.gmra.mxu0 %vm223_vm0, %v11283_v40  ;;  %9408 = vmatmul.mubr.msk.f32.gmra.mxu1 %vm223_vm0, %v11017_v55  ;;  %v7987_v55 = vld [vmem:[%s14043_s1 + $0x1b8] sm:$0xff] }
  0xa9   : > { %9346 = vmatprep.mubr.msk.f32.mxu0 %vm223_vm0, %v11287_v20  ;;  %9410 = vmatprep.mubr.msk.f32.mxu1 %vm223_vm0, %v11021_v57  ;;  %v11319_v57 = vld [vmem:[#allocation2 + $0xca] sm:$0xff] }
  0xaa   : > { %9451 = vmatprep.subr.mxu0 %v7900_v46  ;;  %9514 = vmatpush3.msra.mxu1 %v7941_v49  ;;  %v11350_v49 = vld [vmem:[#allocation2 + $0x10a] sm:$0xff] }
  0xab   : > { %9452 = vmatpush3.msra.mxu0 %v7900_v46  ;;  %9515 = vmatprep.subr.mxu1 %v7940_v41  ;;  %v8027_v46 = vld [vmem:[%s14043_s1 + $0x1f8] sm:$0xff] }
  0xac   : > { %9347 = vmatmul.mubr.msk.f32.gmra.mxu0 %vm223_vm0, %v11301_v51  ;;  %9411 = vmatmul.mubr.msk.f32.gmra.mxu1 %vm223_vm0, %v11041_v61  ;;  %v11334_v61 = vld [vmem:[#allocation2 + $0xe2] sm:$0xff] }
  0xad   : > { %9349 = vmatprep.mubr.msk.f32.mxu0 %vm223_vm0, %v11305_v25  ;;  %9413 = vmatprep.mubr.msk.f32.mxu1 %vm223_vm0, %v11045_v63  ;;  %v11338_v63 = vld [vmem:[#allocation2 + $0xf2] sm:$0xff] }
  0xae   : > { %9565 = vmatprep.subr.mxu0 %v7987_v55  ;;  %9516 = vmatpush3.msra.mxu1 %v7940_v41  ;;  %v11400_v41 = vld [vmem:[#allocation2 + $0x180] sm:$0xff] }
  0xaf   : > { %9629 = vmatprep.subr.mxu1 %v8027_v46 }
  0xb0   : > { %9350 = vmatmul.mubr.msk.f32.gmra.mxu0 %vm223_vm0, %v11319_v57  ;;  %9414 = vmatmul.mubr.msk.f32.gmra.mxu1 %vm223_vm0, %v11061_v2  ;;  %v11346_v2 = vld [vmem:[#allocation2 + $0xfa] sm:$0xff] }
  0xb1   : > { %9352 = vmatprep.mubr.msk.f32.mxu0 %vm223_vm0, %v11323_v36  ;;  %9416 = vmatprep.mubr.msk.f32.mxu1 %vm223_vm0, %v11065_v6  ;;  %v11358_v6 = vld [vmem:[#allocation2 + $0x112] sm:$0xff] }
  0xb4   : > { %9353 = vmatmul.mubr.msk.f32.gmra.mxu0 %vm223_vm0, %v11334_v61  ;;  %9417 = vmatmul.mubr.msk.f32.gmra.mxu1 %vm223_vm0, %v11080_v13  ;;  %v11362_v13 = vld [vmem:[#allocation2 + $0x122] sm:$0xff] }
  0xb5   : > { %9355 = vmatprep.mubr.msk.f32.mxu0 %vm223_vm0, %v11338_v63  ;;  %9419 = vmatprep.mubr.msk.f32.mxu1 %vm223_vm0, %v11084_v23  ;;  %v11370_v23 = vld [vmem:[#allocation2 + $0x12a] sm:$0xff] }
  0xb8   : > { %9356 = vmatmul.mubr.msk.f32.gmra.mxu0 %vm223_vm0, %v11346_v2  ;;  %9420 = vmatmul.mubr.msk.f32.gmra.mxu1 %vm223_vm0, %v11101_v35  ;;  %v11374_v35 = vld [vmem:[#allocation2 + $0x13a] sm:$0xff] }
  0xb9   : > { %9358 = vmatprep.mubr.msk.f32.mxu0 %vm223_vm0, %v11350_v49  ;;  %9422 = vmatprep.mubr.msk.f32.mxu1 %vm223_vm0, %v11105_v39  ;;  %v11382_v39 = vld [vmem:[#allocation2 + $0x142] sm:$0xff] }
  0xbc   : > { %9359 = vmatmul.mubr.msk.f32.gmra.mxu0 %vm223_vm0, %v11358_v6  ;;  %9423 = vmatmul.mubr.msk.f32.gmra.mxu1 %vm223_vm0, %v11122_v43  ;;  %v11386_v43 = vld [vmem:[#allocation2 + $0x152] sm:$0xff] }
  0xbd   : > { %9361 = vmatprep.mubr.msk.f32.mxu0 %vm223_vm0, %v11362_v13  ;;  %9425 = vmatprep.mubr.msk.f32.mxu1 %vm223_vm0, %v11126_v45  ;;  %v11394_v45 = vld [vmem:[#allocation2 + $0x15a] sm:$0xff] }
  0xc0   : > { %9362 = vmatmul.mubr.msk.f32.gmra.mxu0 %vm223_vm0, %v11370_v23  ;;  %9426 = vmatmul.mubr.msk.f32.gmra.mxu1 %vm223_vm0, %v11141_v52  ;;  %v11398_v52 = vld [vmem:[#allocation2 + $0x16a] sm:$0xff] }
  0xc1   : > { %9364 = vmatprep.mubr.msk.f32.mxu0 %vm223_vm0, %v11374_v35  ;;  %9428 = vmatprep.mubr.msk.f32.mxu1 %vm223_vm0, %v11145_v58  ;;  %v11408_v58 = vld [vmem:[#allocation2 + $0x172] sm:$0xff] }
  0xc4   : > { %9365 = vmatmul.mubr.msk.f32.gmra.mxu0 %vm223_vm0, %v11382_v39  ;;  %9429 = vmatmul.mubr.msk.f32.gmra.mxu1 %vm223_vm0, %v11157_v7  ;;  %v11412_v7 = vld [vmem:[#allocation2 + $0x188] sm:$0xff] }
  0xc5   : > { %9367 = vmatprep.mubr.msk.f32.mxu0 %vm223_vm0, %v11386_v43  ;;  %9431 = vmatprep.mubr.msk.f32.mxu1 %vm223_vm0, %v11161_v29  ;;  %v7986_v29 = vld [vmem:[%s14043_s1 + $0x1b0] sm:$0xff] }
  0xc8   : > { %9368 = vmatmul.mubr.msk.f32.gmra.mxu0 %vm223_vm0, %v11394_v45  ;;  %9432 = vmatmul.mubr.msk.f32.gmra.mxu1 %vm223_vm0, %v11173_v32 }
  0xc9   : > { %9370 = vmatprep.mubr.msk.f32.mxu0 %vm223_vm0, %v11398_v52  ;;  %9434 = vmatprep.mubr.msk.f32.mxu1 %vm223_vm0, %v11400_v41 }
  0xcc   : > { %9371 = vmatmul.mubr.msk.f32.gmra.mxu0 %vm223_vm0, %v11408_v58  ;;  %9435 = vmatmul.mubr.msk.f32.gmra.mxu1 %vm223_vm0, %v11412_v7 }
  0xcd   : > { %9453 = vmatprep.mubr.msk.f32.mxu0 %vm223_vm0, %v10860_v4  ;;  %9517 = vmatprep.mubr.msk.f32.mxu1 %vm223_vm0, %v11182_v28  ;;  %v7985_v4 = vld [vmem:[%s14043_s1 + $0x1a8] sm:$0xff] }
  0xd0   : > { %9454 = vmatmul.mubr.msk.f32.vlgmr.msra.gmra.mxu0 %vm223_vm0, %v10876_v9  ;;  %9518 = vmatmul.mubr.msk.f32.vlgmr.msra.gmra.mxu1 %vm223_vm0, %v11193_v33  ;;  %v8026_v9 = vld [vmem:[%s14043_s1 + $0x1f0] sm:$0xff] }
  0xd1   : > { %9566 = vmatpush3.msra.mxu0 %v7987_v55  ;;  %9456 = vmatprep.mubr.msk.f32.mxu0 %vm223_vm0, %v10884_v11  ;;  %v7984_v11 = vld [vmem:[%s14043_s1 + $0x1a0] sm:$0xff]  ;;  %v2679_v33 = vld [vmem:[#allocation2 + $0x50] sm:$0xff] }
  0xd2   : > { %9520 = vmatprep.mubr.msk.f32.mxu1 %vm223_vm0, %v11197_v5  ;;  %9567 = vmatprep.subr.mxu0 %v7986_v29  ;;  %v3073_v5 = vld [vmem:[#allocation2 + $0x51] sm:$0xff] }
  0xd3   : > { %9568 = vmatpush3.msra.mxu0 %v7986_v29  ;;  %9630 = vmatpush3.msra.mxu1 %v8027_v46 }
  0xd4   : > { %9457 = vmatmul.mubr.msk.f32.gmra.mxu0 %vm223_vm0, %v10899_v14  ;;  %9521 = vmatmul.mubr.msk.f32.gmra.mxu1 %vm223_vm0, %v11211_v12  ;;  %v8025_v14 = vld [vmem:[%s14043_s1 + $0x1e8] sm:$0xff] }
  0xd5   : > { %9459 = vmatprep.mubr.msk.f32.mxu0 %vm223_vm0, %v10903_v16  ;;  %9523 = vmatprep.mubr.msk.f32.mxu1 %vm223_vm0, %v11215_v59  ;;  %v7983_v16 = vld [vmem:[%s14043_s1 + $0x198] sm:$0xff] }
  0xd6   : > { %9569 = vmatprep.subr.mxu0 %v7985_v4  ;;  %9631 = vmatprep.subr.mxu1 %v8026_v9 }
  0xd7   : > { %9570 = vmatpush3.msra.mxu0 %v7985_v4  ;;  %9632 = vmatpush3.msra.mxu1 %v8026_v9  ;;  %v2685_v9 = vld [vmem:[#allocation2 + $0x98] sm:$0xff] }
  0xd8   : > { %9460 = vmatmul.mubr.msk.f32.gmra.mxu0 %vm223_vm0, %v10918_v19  ;;  %9524 = vmatmul.mubr.msk.f32.gmra.mxu1 %vm223_vm0, %v11229_v17  ;;  %v8024_v19 = vld [vmem:[%s14043_s1 + $0x1e0] sm:$0xff] }
  0xd9   : > { %9462 = vmatprep.mubr.msk.f32.mxu0 %vm223_vm0, %v10922_v21  ;;  %9526 = vmatprep.mubr.msk.f32.mxu1 %vm223_vm0, %v11233_v0  ;;  %v7982_v21 = vld [vmem:[%s14043_s1 + $0x190] sm:$0xff]  ;;  %v2680_v17 = vld [vmem:[#allocation2 + $0x60] sm:$0xff] }
  0xda   : > { %9571 = vmatprep.subr.mxu0 %v7984_v11  ;;  %9633 = vmatprep.subr.mxu1 %v8025_v14  ;;  %v3074_v0 = vld [vmem:[#allocation2 + $0x61] sm:$0xff] }
  0xdb   : > { %9572 = vmatpush3.msra.mxu0 %v7984_v11  ;;  %9634 = vmatpush3.msra.mxu1 %v8025_v14  ;;  %v3079_v11 = vld [vmem:[#allocation2 + $0x99] sm:$0xff] }
  0xdc   : > { %9463 = vmatmul.mubr.msk.f32.gmra.mxu0 %vm223_vm0, %v10937_v24  ;;  %9527 = vmatmul.mubr.msk.f32.gmra.mxu1 %vm223_vm0, %v11247_v22  ;;  %v8023_v24 = vld [vmem:[%s14043_s1 + $0x1d8] sm:$0xff] }
  0xdd   : > { %9465 = vmatprep.mubr.msk.f32.mxu0 %vm223_vm0, %v10941_v26  ;;  %9529 = vmatprep.mubr.msk.f32.mxu1 %vm223_vm0, %v11251_v10  ;;  %v7981_v26 = vld [vmem:[%s14043_s1 + $0x188] sm:$0xff] }
  0xde   : > { %9573 = vmatprep.subr.mxu0 %v7983_v16  ;;  %9635 = vmatprep.subr.mxu1 %v8024_v19  ;;  %v8065_v10 = vld [vmem:[%s14043_s1 + $0x228] sm:$0xff] }
  0xdf   : > { %9574 = vmatpush3.msra.mxu0 %v7983_v16  ;;  %9636 = vmatpush3.msra.mxu1 %v8024_v19  ;;  %v2686_v19 = vld [vmem:[#allocation2 + $0xa8] sm:$0xff] }
  0xe0   : > { %9466 = vmatmul.mubr.msk.f32.gmra.mxu0 %vm223_vm0, %v10954_v31  ;;  %9530 = vmatmul.mubr.msk.f32.gmra.mxu1 %vm223_vm0, %v11265_v27  ;;  %v8022_v31 = vld [vmem:[%s14043_s1 + $0x1d0] sm:$0xff] }
  0xe1   : > { %9468 = vmatprep.mubr.msk.f32.mxu0 %vm223_vm0, %v10966_v37  ;;  %9532 = vmatprep.mubr.msk.f32.mxu1 %vm223_vm0, %v11269_v15  ;;  %v7980_v37 = vld [vmem:[%s14043_s1 + $0x180] sm:$0xff] }
  0xe2   : > { %9575 = vmatprep.subr.mxu0 %v7982_v21  ;;  %9637 = vmatprep.subr.mxu1 %v8023_v24 }
  0xe3   : > { %9576 = vmatpush3.msra.mxu0 %v7982_v21  ;;  %9638 = vmatpush3.msra.mxu1 %v8023_v24  ;;  %v3080_v21 = vld [vmem:[#allocation2 + $0xa9] sm:$0xff] }
  0xe4   : > { %9469 = vmatmul.mubr.msk.f32.gmra.mxu0 %vm223_vm0, %v10991_v48  ;;  %9533 = vmatmul.mubr.msk.f32.gmra.mxu1 %vm223_vm0, %v11283_v40  ;;  %v8021_v48 = vld [vmem:[%s14043_s1 + $0x1c8] sm:$0xff] }
  0xe5   : > { %9471 = vmatprep.mubr.msk.f32.mxu0 %vm223_vm0, %v10997_v50  ;;  %9535 = vmatprep.mubr.msk.f32.mxu1 %vm223_vm0, %v11287_v20  ;;  %v8020_v50 = vld [vmem:[%s14043_s1 + $0x1c0] sm:$0xff]  ;;  %v2681_v20 = vld [vmem:[#allocation2 + $0x68] sm:$0xff] }
  0xe6   : > { %9577 = vmatprep.subr.mxu0 %v7981_v26  ;;  %9639 = vmatprep.subr.mxu1 %v8022_v31 }
  0xe7   : > { %9578 = vmatpush3.msra.mxu0 %v7981_v26  ;;  %9640 = vmatpush3.msra.mxu1 %v8022_v31  ;;  %v8062_v26 = vld [vmem:[%s14043_s1 + $0x210] sm:$0xff] }
  0xe8   : > { %9472 = vmatmul.mubr.msk.f32.gmra.mxu0 %vm223_vm0, %v11015_v54  ;;  %9536 = vmatmul.mubr.msk.f32.gmra.mxu1 %vm223_vm0, %v11301_v51  ;;  %v8067_v54 = vld [vmem:[%s14043_s1 + $0x238] sm:$0xff]  ;;  %v3075_v51 = vld [vmem:[#allocation2 + $0x69] sm:$0xff] }
  0xe9   : > { %9474 = vmatprep.mubr.msk.f32.mxu0 %vm223_vm0, %v11019_v56  ;;  %9538 = vmatprep.mubr.msk.f32.mxu1 %vm223_vm0, %v11305_v25  ;;  %v14059_v56 = vld [vmem:[#allocation7_spill] sm:$0xff] }
  0xea   : > { %9579 = vmatprep.subr.mxu0 %v7980_v37  ;;  %9641 = vmatprep.subr.mxu1 %v8021_v48 }
  0xeb   : > { %9580 = vmatpush3.msra.mxu0 %v7980_v37  ;;  %9642 = vmatpush3.msra.mxu1 %v8021_v48 }
  0xec   : > { %9475 = vmatmul.mubr.msk.f32.gmra.mxu0 %vm223_vm0, %v11039_v60  ;;  %9539 = vmatmul.mubr.msk.f32.gmra.mxu1 %vm223_vm0, %v11319_v57  ;;  %v14060_v60 = vld [vmem:[#allocation8_spill] sm:$0xff]  ;;  %v2682_v57 = vld [vmem:[#allocation2 + $0x78] sm:$0xff] }
  0xed   : > { %9477 = vmatprep.mubr.msk.f32.mxu0 %vm223_vm0, %v11043_v62  ;;  %9541 = vmatprep.mubr.msk.f32.mxu1 %vm223_vm0, %v11323_v36  ;;  %v11579_v62 = vld [vmem:[#allocation2 + $0x181] sm:$0xff]  ;;  %v3076_v36 = vld [vmem:[#allocation2 + $0x79] sm:$0xff] }
  0xee   : > { %9643 = vmatprep.subr.mxu1 %v8020_v50  ;;  %9693 = vmatprep.subr.mxu0 %v8067_v54 }
  0xef   : > { %9644 = vmatpush3.msra.mxu1 %v8020_v50  ;;  %v2687_v50 = vld [vmem:[#allocation2 + $0xb0] sm:$0xff] }
  0xf0   : > { %9478 = vmatmul.mubr.msk.f32.gmra.mxu0 %vm223_vm0, %v11059_v1  ;;  %9542 = vmatmul.mubr.msk.f32.gmra.mxu1 %vm223_vm0, %v11334_v61  ;;  %v11581_v1 = vld [vmem:[#allocation2 + $0x182] sm:$0xff] }
  0xf1   : > { %9480 = vmatprep.mubr.msk.f32.mxu0 %vm223_vm0, %v11063_v3  ;;  %9544 = vmatprep.mubr.msk.f32.mxu1 %vm223_vm0, %v11338_v63  ;;  %v11589_v3 = vld [vmem:[#allocation2 + $0x189] sm:$0xff]  ;;  %v8064_v61 = vld [vmem:[%s14043_s1 + $0x220] sm:$0xff] }
  0xf4   : > { %9481 = vmatmul.mubr.msk.f32.gmra.mxu0 %vm223_vm0, %v11078_v8  ;;  %9545 = vmatmul.mubr.msk.f32.gmra.mxu1 %vm223_vm0, %v11346_v2  ;;  %v11593_v8 = vld [vmem:[#allocation2 + $0x18a] sm:$0xff] }
  0xf5   : > { %9483 = vmatprep.mubr.msk.f32.mxu0 %vm223_vm0, %v11082_v18  ;;  %9547 = vmatprep.mubr.msk.f32.mxu1 %vm223_vm0, %v11350_v49  ;;  %v2676_v18 = vld [vmem:[#allocation2 + $0x30] sm:$0xff] }
  0xf8   : > { %9484 = vmatmul.mubr.msk.f32.gmra.mxu0 %vm223_vm0, %v11099_v34  ;;  %9548 = vmatmul.mubr.msk.f32.gmra.mxu1 %vm223_vm0, %v11358_v6  ;;  %v3070_v34 = vld [vmem:[#allocation2 + $0x31] sm:$0xff]  ;;  %v2683_v6 = vld [vmem:[#allocation2 + $0x80] sm:$0xff] }
  0xf9   : > { %9486 = vmatprep.mubr.msk.f32.mxu0 %vm223_vm0, %v11103_v38  ;;  %9550 = vmatprep.mubr.msk.f32.mxu1 %vm223_vm0, %v11362_v13  ;;  %v2677_v38 = vld [vmem:[#allocation2 + $0x38] sm:$0xff]  ;;  %v3077_v13 = vld [vmem:[#allocation2 + $0x81] sm:$0xff] }
  0xfc   : > { %9487 = vmatmul.mubr.msk.f32.gmra.mxu0 %vm223_vm0, %v11120_v42  ;;  %9551 = vmatmul.mubr.msk.f32.gmra.mxu1 %vm223_vm0, %v11370_v23  ;;  %v3071_v42 = vld [vmem:[#allocation2 + $0x39] sm:$0xff] }
  0xfd   : > { %9489 = vmatprep.mubr.msk.f32.mxu0 %vm223_vm0, %v11124_v44  ;;  %9553 = vmatprep.mubr.msk.f32.mxu1 %vm223_vm0, %v11374_v35  ;;  %v2678_v44 = vld [vmem:[#allocation2 + $0x48] sm:$0xff] }
 0x100   : > { %9490 = vmatmul.mubr.msk.f32.gmra.mxu0 %vm223_vm0, %v11139_v47  ;;  %9554 = vmatmul.mubr.msk.f32.gmra.mxu1 %vm223_vm0, %v11382_v39  ;;  %v3072_v47 = vld [vmem:[#allocation2 + $0x49] sm:$0xff]  ;;  %v9199_v28 = vpop.f32.mrf.mxu0 }
 0x101   : > { %9492 = vmatprep.mubr.msk.f32.mxu0 %vm223_vm0, %v11143_v53  ;;  %9556 = vmatprep.mubr.msk.f32.mxu1 %vm223_vm0, %v11386_v43  ;;  %v8066_v53 = vld [vmem:[%s14043_s1 + $0x230] sm:$0xff] }
 0x102   : > { %v619_v12 = vpop.f32.mrf.mxu0  ;;  %v2684_v39 = vld [vmem:[#allocation2 + $0x90] sm:$0xff] }
 0x103   : > { %v3078_v43 = vld [vmem:[#allocation2 + $0x91] sm:$0xff] }
 0x104   : > { %9493 = vmatmul.mubr.msk.f32.gmra.mxu0 %vm223_vm0, %v14059_v56  ;;  %9557 = vmatmul.mubr.msk.f32.gmra.mxu1 %vm223_vm0, %v11394_v45 }
 0x105   : > { %9495 = vmatprep.mubr.msk.f32.mxu0 %vm223_vm0, %v14060_v60  ;;  %9559 = vmatprep.mubr.msk.f32.mxu1 %vm223_vm0, %v11398_v52  ;;  %v8063_v52 = vld [vmem:[%s14043_s1 + $0x218] sm:$0xff] }
 0x108   : > { %9496 = vmatmul.mubr.msk.f32.gmra.mxu0 %vm223_vm0, %v11171_v30  ;;  %9560 = vmatmul.mubr.msk.f32.gmra.mxu1 %vm223_vm0, %v11408_v58  ;;  %v9263_v30 = vpop.f32.mrf.mxu1 }
 0x109   : > { %9498 = vmatprep.mubr.msk.f32.mxu0 %vm223_vm0, %v11579_v62  ;;  %9562 = vmatprep.mubr.msk.f32.mxu1 %vm223_vm0, %v11581_v1  ;;  %v11606_v32 = vadd.f32 %v9263_v30, %v9199_v28  ;;  %v2689_v28 = vld [vmem:[#allocation2 + $0xc8] sm:$0xff] }
 0x10a   : > { %v940_v59 = vpop.f32.mrf.mxu1  ;;  %v3083_v30 = vld [vmem:[#allocation2 + $0xc9] sm:$0xff] }
 0x10b   : > { %v11610_v22 = vadd.f32 %v940_v59, %v619_v12  ;;  %v2690_v12 = vld [vmem:[#allocation2 + $0xd8] sm:$0xff] }
 0x10c   : > { %9499 = vmatmul.mubr.msk.f32.gmra.mxu0 %vm223_vm0, %v11589_v3  ;;  %9563 = vmatmul.mubr.msk.f32.gmra.mxu1 %vm223_vm0, %v11593_v8  ;;  %v3084_v59 = vld [vmem:[#allocation2 + $0xd9] sm:$0xff] }
 0x10d   : > { %9581 = vmatprep.mubr.msk.f32.mxu0 %vm223_vm0, %v2676_v18  ;;  %9645 = vmatprep.mubr.msk.f32.mxu1 %vm223_vm0, %v3070_v34  ;;  %v2688_v18 = vld [vmem:[#allocation2 + $0xc0] sm:$0xff] }
 0x10e   : > { %v3082_v34 = vld [vmem:[#allocation2 + $0xc1] sm:$0xff] }
 0x110   : > { %9582 = vmatmul.mubr.msk.f32.vlgmr.msra.gmra.mxu0 %vm223_vm0, %v2677_v38  ;;  %9646 = vmatmul.mubr.msk.f32.vlgmr.msra.gmra.mxu1 %vm223_vm0, %v3071_v42  ;;  %v8061_v42 = vld [vmem:[%s14043_s1 + $0x208] sm:$0xff] }
 0x111   : > { %9694 = vmatpush3.msra.mxu0 %v8067_v54  ;;  %9584 = vmatprep.mubr.msk.f32.mxu0 %vm223_vm0, %v2678_v44  ;;  %v3081_v54 = vld [vmem:[#allocation2 + $0xb1] sm:$0xff] }
 0x112   : > { %9648 = vmatprep.mubr.msk.f32.mxu1 %vm223_vm0, %v3072_v47  ;;  %9695 = vmatprep.subr.mxu0 %v8066_v53 }
 0x113   : > { %9696 = vmatpush3.msra.mxu0 %v8066_v53  ;;  %v9202_v27 = vpop.f32.mrf.mxu0 }
 0x114   : > { %v9266_v15 = vpop.f32.mrf.mxu1  ;;  %9585 = vmatmul.mubr.msk.f32.gmra.mxu0 %vm223_vm0, %v2679_v33  ;;  %9649 = vmatmul.mubr.msk.f32.gmra.mxu1 %vm223_vm0, %v3073_v5 }
 0x115   : > { %v11617_v40 = vadd.f32 %v9266_v15, %v9202_v27  ;;  %9587 = vmatprep.mubr.msk.f32.mxu0 %vm223_vm0, %v2680_v17  ;;  %9651 = vmatprep.mubr.msk.f32.mxu1 %vm223_vm0, %v3074_v0  ;;  %v629_v25 = vpop.f32.mrf.mxu0  ;;  %v8060_v0 = vld [vmem:[%s14043_s1 + $0x200] sm:$0xff] }
 0x116   : > { %v950_v55 = vpop.f32.mrf.mxu1  ;;  %9697 = vmatprep.subr.mxu0 %v8065_v10 }
 0x117   : > { %v11621_v46 = vadd.f32 %v950_v55, %v629_v25  ;;  %9698 = vmatpush3.msra.mxu0 %v8065_v10  ;;  %v9205_v63 = vpop.f32.mrf.mxu0 }
 0x118   : > { %v9269_v2 = vpop.f32.mrf.mxu1  ;;  %9588 = vmatmul.mubr.msk.f32.gmra.mxu0 %vm223_vm0, %v2681_v20  ;;  %9652 = vmatmul.mubr.msk.f32.gmra.mxu1 %vm223_vm0, %v3075_v51  ;;  %v2691_v20 = vld [vmem:[#allocation2 + $0xe0] sm:$0xff] }
 0x119   : > { %v11628_v49 = vadd.f32 %v9269_v2, %v9205_v63  ;;  %9590 = vmatprep.mubr.msk.f32.mxu0 %vm223_vm0, %v2682_v57  ;;  %9654 = vmatprep.mubr.msk.f32.mxu1 %vm223_vm0, %v3076_v36  ;;  %v639_v23 = vpop.f32.mrf.mxu0  ;;  %v3085_v51 = vld [vmem:[#allocation2 + $0xe1] sm:$0xff]  ;;  %v2692_v57 = vld [vmem:[#allocation2 + $0xf0] sm:$0xff] }
 0x11a   : > { %v960_v35 = vpop.f32.mrf.mxu1  ;;  %9699 = vmatprep.subr.mxu0 %v8064_v61  ;;  %v3086_v36 = vld [vmem:[#allocation2 + $0xf1] sm:$0xff] }
 0x11b   : > { %v11632_v45 = vadd.f32 %v960_v35, %v639_v23  ;;  %9700 = vmatpush3.msra.mxu0 %v8064_v61  ;;  %v9208_v58 = vpop.f32.mrf.mxu0  ;;  %v3087_v23 = vld [vmem:[#allocation2 + $0xf9] sm:$0xff] }
 0x11c   : > { %v9272_v29 = vpop.f32.mrf.mxu1  ;;  %9591 = vmatmul.mubr.msk.f32.gmra.mxu0 %vm223_vm0, %v2683_v6  ;;  %9655 = vmatmul.mubr.msk.f32.gmra.mxu1 %vm223_vm0, %v3077_v13  ;;  %v2693_v13 = vld [vmem:[#allocation2 + $0xf8] sm:$0xff] }
 0x11d   : > { %v11639_v4 = vadd.f32 %v9272_v29, %v9208_v58  ;;  %9593 = vmatprep.mubr.msk.f32.mxu0 %vm223_vm0, %v2684_v39  ;;  %9657 = vmatprep.mubr.msk.f32.mxu1 %vm223_vm0, %v3078_v43  ;;  %v649_v14 = vpop.f32.mrf.mxu0  ;;  %v2694_v43 = vld [vmem:[#allocation2 + $0x108] sm:$0xff] }
 0x11e   : > { %v970_v16 = vpop.f32.mrf.mxu1  ;;  %9701 = vmatprep.subr.mxu0 %v8063_v52 }
 0x11f   : > { %v11643_v24 = vadd.f32 %v970_v16, %v649_v14  ;;  %9702 = vmatpush3.msra.mxu0 %v8063_v52  ;;  %v9211_v31 = vpop.f32.mrf.mxu0  ;;  %v3088_v52 = vld [vmem:[#allocation2 + $0x109] sm:$0xff]  ;;  %v3089_v16 = vld [vmem:[#allocation2 + $0x111] sm:$0xff] }
 0x120   : > { %v9275_v37 = vpop.f32.mrf.mxu1  ;;  %9594 = vmatmul.mubr.msk.f32.gmra.mxu0 %vm223_vm0, %v2685_v9  ;;  %9658 = vmatmul.mubr.msk.f32.gmra.mxu1 %vm223_vm0, %v3079_v11  ;;  %v2695_v14 = vld [vmem:[#allocation2 + $0x110] sm:$0xff] }
 0x121   : > { %v11650_v48 = vadd.f32 %v9275_v37, %v9211_v31  ;;  %9596 = vmatprep.mubr.msk.f32.mxu0 %vm223_vm0, %v2686_v19  ;;  %9660 = vmatprep.mubr.msk.f32.mxu1 %vm223_vm0, %v3080_v21  ;;  %v659_v56 = vpop.f32.mrf.mxu0  ;;  %v3090_v31 = vld [vmem:[#allocation2 + $0x121] sm:$0xff] }
 0x122   : > { %v980_v60 = vpop.f32.mrf.mxu1  ;;  %9703 = vmatprep.subr.mxu0 %v8062_v26 }
 0x123   : > { %v11654_v38 = vadd.f32 %v980_v60, %v659_v56  ;;  %9704 = vmatpush3.msra.mxu0 %v8062_v26  ;;  %v9214_v44 = vpop.f32.mrf.mxu0  ;;  %v2696_v26 = vld [vmem:[#allocation2 + $0x120] sm:$0xff]  ;;  %v2697_v56 = vld [vmem:[#allocation2 + $0x128] sm:$0xff] }
 0x124   : > { %v9278_v47 = vpop.f32.mrf.mxu1  ;;  %9597 = vmatmul.mubr.msk.f32.gmra.mxu0 %vm223_vm0, %v2687_v50  ;;  %9661 = vmatmul.mubr.msk.f32.gmra.mxu1 %vm223_vm0, %v3081_v54  ;;  %v3091_v60 = vld [vmem:[#allocation2 + $0x129] sm:$0xff] }
 0x125   : > { %v11661_v53 = vadd.f32 %v9278_v47, %v9214_v44  ;;  %9599 = vmatprep.mubr.msk.f32.mxu0 %vm223_vm0, %v2688_v18  ;;  %9663 = vmatprep.mubr.msk.f32.mxu1 %vm223_vm0, %v3082_v34  ;;  %v669_v33 = vpop.f32.mrf.mxu0  ;;  %v3092_v44 = vld [vmem:[#allocation2 + $0x139] sm:$0xff] }
 0x126   : > { %v990_v5 = vpop.f32.mrf.mxu1  ;;  %9705 = vmatprep.subr.mxu0 %v8061_v42 }
 0x127   : > { %v11665_v17 = vadd.f32 %v990_v5, %v669_v33  ;;  %9706 = vmatpush3.msra.mxu0 %v8061_v42  ;;  %v9217_v10 = vpop.f32.mrf.mxu0  ;;  %v2698_v42 = vld [vmem:[#allocation2 + $0x138] sm:$0xff]  ;;  %v2699_v33 = vld [vmem:[#allocation2 + $0x140] sm:$0xff] }
 0x128   : > { %v9281_v27 = vpop.f32.mrf.mxu1  ;;  %9600 = vmatmul.mubr.msk.f32.gmra.mxu0 %vm223_vm0, %v2689_v28  ;;  %9664 = vmatmul.mubr.msk.f32.gmra.mxu1 %vm223_vm0, %v3083_v30  ;;  %v3093_v5 = vld [vmem:[#allocation2 + $0x141] sm:$0xff] }
 0x129   : > { %v11672_v15 = vadd.f32 %v9281_v27, %v9217_v10  ;;  %9602 = vmatprep.mubr.msk.f32.mxu0 %vm223_vm0, %v2690_v12  ;;  %9666 = vmatprep.mubr.msk.f32.mxu1 %vm223_vm0, %v3084_v59  ;;  %v679_v25 = vpop.f32.mrf.mxu0  ;;  %v3094_v10 = vld [vmem:[#allocation2 + $0x151] sm:$0xff] }
 0x12a   : > { %v1000_v55 = vpop.f32.mrf.mxu1  ;;  %9707 = vmatprep.subr.mxu0 %v8060_v0 }
 0x12b   : > { %v11676_v61 = vadd.f32 %v1000_v55, %v679_v25  ;;  %9708 = vmatpush3.msra.mxu0 %v8060_v0  ;;  %v9220_v63 = vpop.f32.mrf.mxu0  ;;  %v2700_v0 = vld [vmem:[#allocation2 + $0x150] sm:$0xff]  ;;  %v2701_v25 = vld [vmem:[#allocation2 + $0x158] sm:$0xff] }
 0x12c   : > { %v9284_v2 = vpop.f32.mrf.mxu1  ;;  %9603 = vmatmul.mubr.msk.f32.gmra.mxu0 %vm223_vm0, %v2691_v20  ;;  %9667 = vmatmul.mubr.msk.f32.gmra.mxu1 %vm223_vm0, %v3085_v51  ;;  %v3095_v55 = vld [vmem:[#allocation2 + $0x159] sm:$0xff] }
 0x12d   : > { %v11680_v6 = vadd.f32 %v9284_v2, %v9220_v63  ;;  %9605 = vmatprep.mubr.msk.f32.mxu0 %vm223_vm0, %v2692_v57  ;;  %9669 = vmatprep.mubr.msk.f32.mxu1 %vm223_vm0, %v3086_v36  ;;  %v689_v35 = vpop.f32.mrf.mxu0  ;;  %v2702_v63 = vld [vmem:[#allocation2 + $0x168] sm:$0xff] }
 0x12e   : > { %v1010_v39 = vpop.f32.mrf.mxu1  ;;  %v3096_v2 = vld [vmem:[#allocation2 + $0x169] sm:$0xff] }
 0x12f   : > { %v11684_v58 = vadd.f32 %v1010_v39, %v689_v35  ;;  %v9223_v29 = vpop.f32.mrf.mxu0  ;;  %v2703_v39 = vld [vmem:[#allocation2 + $0x170] sm:$0xff] }
 0x130   : > { %v9287_v9 = vpop.f32.mrf.mxu1  ;;  %9606 = vmatmul.mubr.msk.f32.gmra.mxu0 %vm223_vm0, %v2693_v13  ;;  %9670 = vmatmul.mubr.msk.f32.gmra.mxu1 %vm223_vm0, %v3087_v23 }
 0x131   : > { %v11688_v11 = vadd.f32 %v9287_v9, %v9223_v29  ;;  %9608 = vmatprep.mubr.msk.f32.mxu0 %vm223_vm0, %v2694_v43  ;;  %9672 = vmatprep.mubr.msk.f32.mxu1 %vm223_vm0, %v3088_v52  ;;  %v11692_v19 = vpop.f32.mrf.mxu0  ;;  %v3097_v43 = vld [vmem:[#allocation2 + $0x171] sm:$0xff] }
 0x132   : > { %v11694_v21 = vpop.f32.mrf.mxu1 }
 0x133   : > { %v9226_v37 = vpop.f32.mrf.mxu0 }
 0x134   : > { %v9290_v50 = vpop.f32.mrf.mxu1  ;;  %9609 = vmatmul.mubr.msk.f32.gmra.mxu0 %vm223_vm0, %v2695_v14  ;;  %9673 = vmatmul.mubr.msk.f32.gmra.mxu1 %vm223_vm0, %v3089_v16 }
 0x135   : > { %v11698_v54 = vadd.f32 %v9290_v50, %v9226_v37  ;;  %9611 = vmatprep.mubr.msk.f32.mxu0 %vm223_vm0, %v2696_v26  ;;  %9675 = vmatprep.mubr.msk.f32.mxu1 %vm223_vm0, %v3090_v31  ;;  %v11702_v18 = vpop.f32.mrf.mxu0  ;;  %v2706_v37 = vld [vmem:[#allocation2 + $0x198] sm:$0xff] }
 0x136   : > { %v11704_v34 = vpop.f32.mrf.mxu1  ;;  %v3100_v50 = vld [vmem:[#allocation2 + $0x199] sm:$0xff] }
 0x137   : > { %v9229_v47 = vpop.f32.mrf.mxu0 }
 0x138   : > { %v9293_v28 = vpop.f32.mrf.mxu1  ;;  %9612 = vmatmul.mubr.msk.f32.gmra.mxu0 %vm223_vm0, %v2697_v56  ;;  %9676 = vmatmul.mubr.msk.f32.gmra.mxu1 %vm223_vm0, %v3091_v60 }
 0x139   : > { %v11708_v30 = vadd.f32 %v9293_v28, %v9229_v47  ;;  %9614 = vmatprep.mubr.msk.f32.mxu0 %vm223_vm0, %v2698_v42  ;;  %9678 = vmatprep.mubr.msk.f32.mxu1 %vm223_vm0, %v3092_v44  ;;  %v11712_v12 = vpop.f32.mrf.mxu0  ;;  %v3464_v28 = vld [vmem:[#allocation2 + $0x32] sm:$0xff] }
 0x13a   : > { %v11714_v59 = vpop.f32.mrf.mxu1 }
 0x13b   : > { %v9232_v27 = vpop.f32.mrf.mxu0 }
 0x13c   : > { %v9296_v20 = vpop.f32.mrf.mxu1  ;;  %9615 = vmatmul.mubr.msk.f32.gmra.mxu0 %vm223_vm0, %v2699_v33  ;;  %9679 = vmatmul.mubr.msk.f32.gmra.mxu1 %vm223_vm0, %v3093_v5 }
 0x13d   : > { %v11718_v51 = vadd.f32 %v9296_v20, %v9232_v27  ;;  %9617 = vmatprep.mubr.msk.f32.mxu0 %vm223_vm0, %v2700_v0  ;;  %9681 = vmatprep.mubr.msk.f32.mxu1 %vm223_vm0, %v3094_v10  ;;  %v11722_v57 = vpop.f32.mrf.mxu0  ;;  %v3466_v27 = vld [vmem:[#allocation2 + $0x4a] sm:$0xff] }
 0x13e   : > { %v11724_v36 = vpop.f32.mrf.mxu1 }
 0x13f   : > { %v9235_v13 = vpop.f32.mrf.mxu0 }
 0x140   : > { %v9299_v23 = vpop.f32.mrf.mxu1  ;;  %9618 = vmatmul.mubr.msk.f32.gmra.mxu0 %vm223_vm0, %v2701_v25  ;;  %9682 = vmatmul.mubr.msk.f32.gmra.mxu1 %vm223_vm0, %v3095_v55 }
 0x141   : > { %v11728_v35 = vadd.f32 %v9299_v23, %v9235_v13  ;;  %9620 = vmatprep.mubr.msk.f32.mxu0 %vm223_vm0, %v2702_v63  ;;  %9684 = vmatprep.mubr.msk.f32.mxu1 %vm223_vm0, %v3096_v2  ;;  %v11732_v52 = vpop.f32.mrf.mxu0  ;;  %v3467_v63 = vld [vmem:[#allocation2 + $0x52] sm:$0xff]  ;;  %v3468_v23 = vld [vmem:[#allocation2 + $0x62] sm:$0xff] }
 0x142   : > { %v11734_v29 = vpop.f32.mrf.mxu1 }
 0x143   : > { %v9238_v9 = vpop.f32.mrf.mxu0 }
 0x144   : > { %v9302_v14 = vpop.f32.mrf.mxu1  ;;  %9621 = vmatmul.mubr.msk.f32.gmra.mxu0 %vm223_vm0, %v2703_v39  ;;  %9685 = vmatmul.mubr.msk.f32.gmra.mxu1 %vm223_vm0, %v3097_v43 }
 0x145   : > { %v11738_v16 = vadd.f32 %v9302_v14, %v9238_v9  ;;  %9623 = vmatprep.mubr.msk.f32.mxu0 %vm223_vm0, %v11400_v41  ;;  %9687 = vmatprep.mubr.msk.f32.mxu1 %vm223_vm0, %v11579_v62  ;;  %v11744_v26 = vpop.f32.mrf.mxu0  ;;  %v2707_v41 = vld [vmem:[#allocation2 + $0x1a0] sm:$0xff] }
 0x146   : > { %14061 = vst [vmem:[#allocation7_spill] sm:$0xff] %v11744_v26  ;;  %v11746_v31 = vpop.f32.mrf.mxu1  ;;  %v3101_v62 = vld [vmem:[#allocation2 + $0x1a1] sm:$0xff] }
 0x147   : > { %14062 = vst [vmem:[#allocation8_spill] sm:$0xff] %v11746_v31  ;;  %v9241_v56 = vpop.f32.mrf.mxu0 }
 0x148   : > { %v9305_v60 = vpop.f32.mrf.mxu1  ;;  %9624 = vmatmul.mubr.msk.f32.gmra.mxu0 %vm223_vm0, %v11412_v7  ;;  %9688 = vmatmul.mubr.msk.f32.gmra.mxu1 %vm223_vm0, %v11589_v3  ;;  %v3465_v3 = vld [vmem:[#allocation2 + $0x3a] sm:$0xff] }
 0x149   : > { %v11752_v42 = vadd.f32 %v9305_v60, %v9241_v56  ;;  %9626 = vmatprep.mubr.msk.f32.mxu0 %vm223_vm0, %v2706_v37  ;;  %9690 = vmatprep.mubr.msk.f32.mxu1 %vm223_vm0, %v3100_v50  ;;  %v11756_v44 = vpop.f32.mrf.mxu0  ;;  %v3470_v60 = vld [vmem:[#allocation2 + $0x7a] sm:$0xff] }
 0x14a   : > { %14063 = vst [vmem:[#allocation9_spill] sm:$0xff] %v11756_v44  ;;  %v11758_v47 = vpop.f32.mrf.mxu1 }
 0x14b   : > { %14064 = vst [vmem:[#allocation10_spill] sm:$0xff] %v11758_v47  ;;  %v9244_v33 = vpop.f32.mrf.mxu0 }
 0x14c   : > { %v9308_v5 = vpop.f32.mrf.mxu1  ;;  %9627 = vmatmul.mubr.msk.f32.gmra.mxu0 %vm223_vm0, %v2707_v41  ;;  %9691 = vmatmul.mubr.msk.f32.gmra.mxu1 %vm223_vm0, %v3101_v62 }
 0x14d   : > { %v11762_v7 = vadd.f32 %v9308_v5, %v9244_v33  ;;  %9709 = vmatprep.mubr.msk.f32.mxu0 %vm223_vm0, %v3464_v28  ;;  %v11765_v0 = vpop.f32.mrf.mxu0 }
 0x14e   : > { %14065 = vst [vmem:[#allocation11_spill] sm:$0xff] %v11765_v0  ;;  %v11767_v10 = vpop.f32.mrf.mxu1 }
 0x14f   : > { %14066 = vst [vmem:[#allocation12_spill] sm:$0xff] %v11767_v10  ;;  %v9327_v20 = vpop.f32.mrf.mxu0 }
 0x150   : > { %9710 = vmatmul.mubr.msk.f32.vlgmr.msra.gmra.mxu0 %vm223_vm0, %v3465_v3  ;;  %v9391_v25 = vpop.f32.mrf.mxu1  ;;  %v1462_v55 = vadd.f32 %v9327_v20, %v11606_v32  ;;  %v3469_v32 = vld [vmem:[#allocation2 + $0x6a] sm:$0xff] }
 0x151   : > { %9712 = vmatprep.mubr.msk.f32.mxu0 %vm223_vm0, %v3466_v27  ;;  %v1302_v2 = vpop.f32.mrf.mxu0  ;;  %v3472_v27 = vld [vmem:[#allocation2 + $0x92] sm:$0xff] }
 0x152   : > { %v11772_v13 = vpop.f32.mrf.mxu1  ;;  %v11775_v39 = vadd.f32 %v1302_v2, %v11610_v22  ;;  %v11777_v43 = vadd.f32 %v9391_v25, %v1462_v55 }
 0x154   : > { %v9330_v9 = vpop.f32.mrf.mxu0  ;;  %9713 = vmatmul.mubr.msk.f32.gmra.mxu0 %vm223_vm0, %v3467_v63  ;;  %v9394_v14 = vpop.f32.mrf.mxu1 }
 0x155   : > { %v1464_v37 = vadd.f32 %v9330_v9, %v11617_v40  ;;  %9715 = vmatprep.mubr.msk.f32.mxu0 %vm223_vm0, %v3468_v23  ;;  %v3471_v40 = vld [vmem:[#allocation2 + $0x82] sm:$0xff]  ;;  %v3474_v9 = vld [vmem:[#allocation2 + $0xaa] sm:$0xff] }
 0x156   : > { %v1312_v50 = vpop.f32.mrf.mxu0  ;;  %v11782_v56 = vpop.f32.mrf.mxu1 }
 0x157   : > { %v11785_v41 = vadd.f32 %v1312_v50, %v11621_v46  ;;  %v11787_v22 = vadd.f32 %v9394_v14, %v1464_v37  ;;  %v8108_v37 = vld [vmem:[%s14045_s3 + $0x78] sm:$0xff] }
 0x158   : > { %v9333_v62 = vpop.f32.mrf.mxu0  ;;  %9716 = vmatmul.mubr.msk.f32.gmra.mxu0 %vm223_vm0, %v3469_v32  ;;  %v9397_v28 = vpop.f32.mrf.mxu1  ;;  %9757 = vmatprep.subr.mxu1 %v8108_v37 }
 0x159   : > { %v1466_v33 = vadd.f32 %v9333_v62, %v11628_v49  ;;  %9718 = vmatprep.mubr.msk.f32.mxu0 %vm223_vm0, %v3470_v60  ;;  %v3473_v49 = vld [vmem:[#allocation2 + $0x9a] sm:$0xff]  ;;  %v3475_v60 = vld [vmem:[#allocation2 + $0xb2] sm:$0xff]  ;;  %9758 = vmatpush3.msra.mxu1 %v8108_v37 }
 0x15a   : > { %v1322_v5 = vpop.f32.mrf.mxu0  ;;  %v11792_v3 = vpop.f32.mrf.mxu1 }
 0x15b   : > { %v11795_v20 = vadd.f32 %v1322_v5, %v11632_v45  ;;  %v11797_v46 = vadd.f32 %v9397_v28, %v1466_v33  ;;  %v3476_v28 = vld [vmem:[#allocation2 + $0xc2] sm:$0xff] }
 0x15c   : > { %v9336_v25 = vpop.f32.mrf.mxu0  ;;  %9719 = vmatmul.mubr.msk.f32.gmra.mxu0 %vm223_vm0, %v3471_v40  ;;  %v9400_v55 = vpop.f32.mrf.mxu1 }
 0x15d   : > { %v1468_v63 = vadd.f32 %v9336_v25, %v11639_v4  ;;  %9721 = vmatprep.mubr.msk.f32.mxu0 %vm223_vm0, %v3472_v27 }
 0x15e   : > { %v1332_v2 = vpop.f32.mrf.mxu0  ;;  %v11802_v23 = vpop.f32.mrf.mxu1 }
 0x15f   : > { %v11805_v14 = vadd.f32 %v1332_v2, %v11643_v24  ;;  %v11807_v45 = vadd.f32 %v9400_v55, %v1468_v63 }
 0x160   : > { %v9339_v32 = vpop.f32.mrf.mxu0  ;;  %9722 = vmatmul.mubr.msk.f32.gmra.mxu0 %vm223_vm0, %v3473_v49  ;;  %v9403_v4 = vpop.f32.mrf.mxu1  ;;  %v3478_v49 = vld [vmem:[#allocation2 + $0xda] sm:$0xff] }
 0x161   : > { %v1470_v50 = vadd.f32 %v9339_v32, %v11650_v48  ;;  %9724 = vmatprep.mubr.msk.f32.mxu0 %vm223_vm0, %v3474_v9  ;;  %v3477_v48 = vld [vmem:[#allocation2 + $0xca] sm:$0xff] }
 0x162   : > { %v1342_v62 = vpop.f32.mrf.mxu0  ;;  %v11815_v24 = vpop.f32.mrf.mxu1  ;;  %v8107_v9 = vld [vmem:[%s14045_s3 + $0x70] sm:$0xff] }
 0x163   : > { %v11818_v33 = vadd.f32 %v1342_v62, %v11654_v38  ;;  %v11820_v40 = vadd.f32 %v9403_v4, %v1470_v50  ;;  %9759 = vmatprep.subr.mxu1 %v8107_v9  ;;  %v3479_v4 = vld [vmem:[#allocation2 + $0xe2] sm:$0xff] }
 0x164   : > { %v9342_v5 = vpop.f32.mrf.mxu0  ;;  %9725 = vmatmul.mubr.msk.f32.gmra.mxu0 %vm223_vm0, %v3475_v60  ;;  %v9406_v27 = vpop.f32.mrf.mxu1  ;;  %9760 = vmatpush3.msra.mxu1 %v8107_v9  ;;  %v3480_v60 = vld [vmem:[#allocation2 + $0xf2] sm:$0xff] }
 0x165   : > { %v1472_v25 = vadd.f32 %v9342_v5, %v11661_v53  ;;  %9727 = vmatprep.mubr.msk.f32.mxu0 %vm223_vm0, %v3476_v28 }
 0x166   : > { %v1352_v55 = vpop.f32.mrf.mxu0  ;;  %v11825_v63 = vpop.f32.mrf.mxu1 }
 0x167   : > { %v11828_v2 = vadd.f32 %v1352_v55, %v11665_v17  ;;  %v11830_v38 = vadd.f32 %v9406_v27, %v1472_v25 }
 0x168   : > { %v9345_v37 = vpop.f32.mrf.mxu0  ;;  %9728 = vmatmul.mubr.msk.f32.gmra.mxu0 %vm223_vm0, %v3477_v48  ;;  %v9409_v53 = vpop.f32.mrf.mxu1 }
 0x169   : > { %v1474_v32 = vadd.f32 %v9345_v37, %v11672_v15  ;;  %9730 = vmatprep.mubr.msk.f32.mxu0 %vm223_vm0, %v3478_v49  ;;  %v3481_v15 = vld [vmem:[#allocation2 + $0xfa] sm:$0xff]  ;;  %v3482_v49 = vld [vmem:[#allocation2 + $0x10a] sm:$0xff] }
 0x16a   : > { %v1362_v50 = vpop.f32.mrf.mxu0  ;;  %v11838_v17 = vpop.f32.mrf.mxu1  ;;  %v8106_v37 = vld [vmem:[%s14045_s3 + $0x68] sm:$0xff] }
 0x16b   : > { %14067 = vst [vmem:[#allocation13_spill] sm:$0xff] %v11838_v17  ;;  %v11841_v62 = vadd.f32 %v1362_v50, %v11676_v61  ;;  %v11843_v28 = vadd.f32 %v9409_v53, %v1474_v32  ;;  %9761 = vmatprep.subr.mxu1 %v8106_v37  ;;  %v1021_v32 = vadd.f32 %v11694_v21, %v11692_v19 }
 0x16c   : > { %v9348_v5 = vpop.f32.mrf.mxu0  ;;  %9731 = vmatmul.mubr.msk.f32.gmra.mxu0 %vm223_vm0, %v3479_v4  ;;  %v9412_v27 = vpop.f32.mrf.mxu1  ;;  %9762 = vmatpush3.msra.mxu1 %v8106_v37  ;;  %v3486_v37 = vld [vmem:[#allocation2 + $0x13a] sm:$0xff] }
 0x16d   : > { %14068 = vst [vmem:[#allocation14_spill] sm:$0xff] %v11841_v62  ;;  %v1476_v25 = vadd.f32 %v9348_v5, %v11680_v6  ;;  %9733 = vmatprep.mubr.msk.f32.mxu0 %vm223_vm0, %v3480_v60  ;;  %v3484_v5 = vld [vmem:[#allocation2 + $0x122] sm:$0xff] }
 0x16e   : > { %v1372_v48 = vpop.f32.mrf.mxu0  ;;  %v11848_v55 = vpop.f32.mrf.mxu1 }
 0x16f   : > { %14069 = vst [vmem:[#allocation15_spill] sm:$0xff] %v11848_v55  ;;  %v11851_v9 = vadd.f32 %v1372_v48, %v11684_v58  ;;  %v11853_v61 = vadd.f32 %v9412_v27, %v1476_v25  ;;  %v3483_v58 = vld [vmem:[#allocation2 + $0x112] sm:$0xff] }
 0x170   : > { %v9351_v53 = vpop.f32.mrf.mxu0  ;;  %9734 = vmatmul.mubr.msk.f32.gmra.mxu0 %vm223_vm0, %v3481_v15  ;;  %v9415_v6 = vpop.f32.mrf.mxu1 }
 0x171   : > { %14070 = vst [vmem:[#allocation16_spill] sm:$0xff] %v11851_v9  ;;  %v1478_v4 = vadd.f32 %v9351_v53, %v11688_v11  ;;  %9736 = vmatprep.mubr.msk.f32.mxu0 %vm223_vm0, %v3482_v49  ;;  %v3485_v11 = vld [vmem:[#allocation2 + $0x12a] sm:$0xff] }
 0x172   : > { %v1382_v50 = vpop.f32.mrf.mxu0  ;;  %v11863_v60 = vpop.f32.mrf.mxu1 }
 0x173   : > { %14071 = vst [vmem:[#allocation17_spill] sm:$0xff] %v11863_v60  ;;  %v11865_v27 = vadd.f32 %v1382_v50, %v1021_v32  ;;  %v11867_v25 = vadd.f32 %v9415_v6, %v1478_v4  ;;  %v8105_v6 = vld [vmem:[%s14045_s3 + $0x60] sm:$0xff] }
 0x174   : > { %v9354_v15 = vpop.f32.mrf.mxu0  ;;  %9737 = vmatmul.mubr.msk.f32.gmra.mxu0 %vm223_vm0, %v3483_v58  ;;  %v9418_v48 = vpop.f32.mrf.mxu1  ;;  %9763 = vmatprep.subr.mxu1 %v8105_v6  ;;  %v3487_v58 = vld [vmem:[#allocation2 + $0x142] sm:$0xff] }
 0x175   : > { %14072 = vst [vmem:[#allocation18_spill] sm:$0xff] %v11865_v27  ;;  %v1480_v19 = vadd.f32 %v9354_v15, %v11698_v54  ;;  %9739 = vmatprep.mubr.msk.f32.mxu0 %vm223_vm0, %v3484_v5  ;;  %9764 = vmatpush3.msra.mxu1 %v8105_v6  ;;  %v3488_v15 = vld [vmem:[#allocation2 + $0x152] sm:$0xff]  ;;  %v3490_v6 = vld [vmem:[#allocation2 + $0x16a] sm:$0xff] }
 0x176   : > { %v11872_v21 = vpop.f32.mrf.mxu0  ;;  %v11874_v49 = vpop.f32.mrf.mxu1 }
 0x177   : > { %14073 = vst [vmem:[#allocation19_spill] sm:$0xff] %v11872_v21  ;;  %14074 = vst [vmem:[#allocation20_spill] sm:$0xff] %v11874_v49  ;;  %v11876_v53 = vadd.f32 %v9418_v48, %v1480_v19  ;;  %v4016_v21 = vld [vmem:[#allocation3] sm:$0xff] }
 0x178   : > { %v9357_v32 = vpop.f32.mrf.mxu0  ;;  %9740 = vmatmul.mubr.msk.f32.gmra.mxu0 %vm223_vm0, %v3485_v11  ;;  %v9421_v4 = vpop.f32.mrf.mxu1 }
 0x179   : > { %v1482_v54 = vadd.f32 %v9357_v32, %v11708_v30  ;;  %9742 = vmatprep.mubr.msk.f32.mxu0 %vm223_vm0, %v3486_v37  ;;  %v3489_v30 = vld [vmem:[#allocation2 + $0x15a] sm:$0xff] }
 0x17a   : > { %v11884_v50 = vpop.f32.mrf.mxu0  ;;  %v11886_v5 = vpop.f32.mrf.mxu1 }
 0x17b   : > { %14075 = vst [vmem:[#allocation21_spill] sm:$0xff] %v11884_v50  ;;  %14076 = vst [vmem:[#allocation22_spill] sm:$0xff] %v11886_v5  ;;  %v11888_v48 = vadd.f32 %v9421_v4, %v1482_v54  ;;  %v8104_v4 = vld [vmem:[%s14045_s3 + $0x58] sm:$0xff] }
 0x17c   : > { %v9360_v19 = vpop.f32.mrf.mxu0  ;;  %9743 = vmatmul.mubr.msk.f32.gmra.mxu0 %vm223_vm0, %v3487_v58  ;;  %v9424_v49 = vpop.f32.mrf.mxu1  ;;  %9765 = vmatprep.subr.mxu1 %v8104_v4  ;;  %v4056_v5 = vld [vmem:[#allocation3 + $0x1] sm:$0xff] }
 0x17d   : > { %v1484_v11 = vadd.f32 %v9360_v19, %v11718_v51  ;;  %9745 = vmatprep.mubr.msk.f32.mxu0 %vm223_vm0, %v3488_v15  ;;  %v3491_v15 = vld [vmem:[#allocation2 + $0x172] sm:$0xff]  ;;  %9766 = vmatpush3.msra.mxu1 %v8104_v4  ;;  %v3494_v4 = vld [vmem:[#allocation2 + $0x19a] sm:$0xff] }
 0x17e   : > { %v11893_v32 = vpop.f32.mrf.mxu0  ;;  %v11895_v37 = vpop.f32.mrf.mxu1  ;;  %9773 = vmatprep.mubr.msk.f32.mxu1 %vm223_vm0, %v4056_v5 }
 0x17f   : > { %14077 = vst [vmem:[#allocation23_spill] sm:$0xff] %v11893_v32  ;;  %14078 = vst [vmem:[#allocation24_spill] sm:$0xff] %v11895_v37  ;;  %v11897_v50 = vadd.f32 %v9424_v49, %v1484_v11 }
 0x180   : > { %v9363_v54 = vpop.f32.mrf.mxu0  ;;  %9746 = vmatmul.mubr.msk.f32.gmra.mxu0 %vm223_vm0, %v3489_v30  ;;  %v9427_v58 = vpop.f32.mrf.mxu1 }
 0x181   : > { %v1486_v51 = vadd.f32 %v9363_v54, %v11728_v35  ;;  %9748 = vmatprep.mubr.msk.f32.mxu0 %vm223_vm0, %v3490_v6 }
 0x182   : > { %v11905_v19 = vpop.f32.mrf.mxu0  ;;  %v11907_v37 = vpop.f32.mrf.mxu1 }
 0x183   : > { %14079 = vst [vmem:[#allocation25_spill] sm:$0xff] %v11905_v19  ;;  %14080 = vst [vmem:[#allocation26_spill] sm:$0xff] %v11907_v37  ;;  %v11909_v49 = vadd.f32 %v9427_v58, %v1486_v51  ;;  %v8103_v58 = vld [vmem:[%s14045_s3 + $0x50] sm:$0xff] }
 0x184   : > { %v9366_v11 = vpop.f32.mrf.mxu0  ;;  %9749 = vmatmul.mubr.msk.f32.gmra.mxu0 %vm223_vm0, %v3491_v15  ;;  %v9430_v32 = vpop.f32.mrf.mxu1  ;;  %9767 = vmatprep.subr.mxu1 %v8103_v58 }
 0x185   : > { %v1488_v30 = vadd.f32 %v9366_v11, %v11738_v16  ;;  %9751 = vmatprep.mubr.msk.f32.mxu0 %vm223_vm0, %v11581_v1  ;;  %v3495_v1 = vld [vmem:[#allocation2 + $0x1a2] sm:$0xff]  ;;  %9768 = vmatpush3.msra.mxu1 %v8103_v58 }
 0x186   : > { %v11915_v35 = vpop.f32.mrf.mxu0  ;;  %v11917_v6 = vpop.f32.mrf.mxu1 }
 0x187   : > { %14081 = vst [vmem:[#allocation27_spill] sm:$0xff] %v11915_v35  ;;  %14082 = vst [vmem:[#allocation28_spill] sm:$0xff] %v11917_v6  ;;  %v11919_v54 = vadd.f32 %v9430_v32, %v1488_v30  ;;  %v4055_v6 = vld [vmem:[%s14045_s3 + $0x38] sm:$0xff] }
 0x188   : > { %v9369_v51 = vpop.f32.mrf.mxu0  ;;  %9752 = vmatmul.mubr.msk.f32.gmra.mxu0 %vm223_vm0, %v11593_v8  ;;  %v9433_v15 = vpop.f32.mrf.mxu1  ;;  %9821 = vmatprep.subr.mxu0 %v4055_v6 }
 0x189   : > { %v1490_v16 = vadd.f32 %v9369_v51, %v11752_v42  ;;  %9754 = vmatprep.mubr.msk.f32.mxu0 %vm223_vm0, %v3494_v4  ;;  %9822 = vmatpush3.msra.mxu0 %v4055_v6  ;;  %v4054_v4 = vld [vmem:[%s14045_s3 + $0x30] sm:$0xff] }
 0x18a   : > { %v11928_v11 = vpop.f32.mrf.mxu0  ;;  %v11930_v32 = vpop.f32.mrf.mxu1  ;;  %9823 = vmatprep.subr.mxu0 %v4054_v4 }
 0x18b   : > { %14083 = vst [vmem:[#allocation29_spill] sm:$0xff] %v11928_v11  ;;  %14084 = vst [vmem:[#allocation30_spill] sm:$0xff] %v11930_v32  ;;  %v11932_v30 = vadd.f32 %v9433_v15, %v1490_v16  ;;  %v8102_v16 = vld [vmem:[%s14045_s3 + $0x48] sm:$0xff]  ;;  %9824 = vmatpush3.msra.mxu0 %v4054_v4 }
 0x18c   : > { %v9372_v35 = vpop.f32.mrf.mxu0  ;;  %9755 = vmatmul.mubr.msk.f32.gmra.mxu0 %vm223_vm0, %v3495_v1  ;;  %v9436_v8 = vpop.f32.mrf.mxu1  ;;  %9769 = vmatprep.subr.mxu1 %v8102_v16 }
 0x18d   : > { %v1492_v42 = vadd.f32 %v9372_v35, %v11762_v7  ;;  %v4053_v7 = vld [vmem:[%s14045_s3 + $0x28] sm:$0xff]  ;;  %9770 = vmatpush3.msra.mxu1 %v8102_v16  ;;  %v4050_v16 = vld [vmem:[%s14045_s3 + $0x10] sm:$0xff]  ;;  %9837 = vmatprep.mubr.msk.f32.mxu0 %vm223_vm0, %v4016_v21 }
 0x18e   : > { %v11942_v58 = vpop.f32.mrf.mxu0  ;;  %v11944_v51 = vpop.f32.mrf.mxu1  ;;  %9825 = vmatprep.subr.mxu0 %v4053_v7 }
 0x18f   : > { %14085 = vst [vmem:[#allocation31_spill] sm:$0xff] %v11942_v58  ;;  %14086 = vst [vmem:[#allocation32_spill] sm:$0xff] %v11944_v51  ;;  %v11946_v15 = vadd.f32 %v9436_v8, %v1492_v42  ;;  %9826 = vmatpush3.msra.mxu0 %v4053_v7  ;;  %v4052_v8 = vld [vmem:[%s14045_s3 + $0x20] sm:$0xff]  ;;  %v4051_v51 = vld [vmem:[%s14045_s3 + $0x18] sm:$0xff] }
 0x190   : > { %v9455_v35 = vpop.f32.mrf.mxu0  ;;  %v11954_v6 = vpop.f32.mrf.mxu1  ;;  %9827 = vmatprep.subr.mxu0 %v4052_v8 }
 0x191   : > { %v11957_v1 = vadd.f32 %v9455_v35, %v11777_v43  ;;  %9828 = vmatpush3.msra.mxu0 %v4052_v8  ;;  %v4049_v8 = vld [vmem:[%s14045_s3 + $0x8] sm:$0xff] }
 0x192   : > { %v11962_v42 = vpop.f32.mrf.mxu0  ;;  %v11964_v4 = vpop.f32.mrf.mxu1  ;;  %9829 = vmatprep.subr.mxu0 %v4051_v51 }
 0x193   : > { %9830 = vmatpush3.msra.mxu0 %v4051_v51  ;;  %v4048_v51 = vld [vmem:[%s14045_s3] sm:$0xff] }
 0x194   : > { %v9458_v58 = vpop.f32.mrf.mxu0  ;;  %v11969_v32 = vpop.f32.mrf.mxu1  ;;  %9831 = vmatprep.subr.mxu0 %v4050_v16 }
 0x195   : > { %v11972_v43 = vadd.f32 %v9458_v58, %v11787_v22  ;;  %9832 = vmatpush3.msra.mxu0 %v4050_v16  ;;  %v8101_v58 = vld [vmem:[%s14045_s3 + $0x40] sm:$0xff] }
 0x196   : > { %v11977_v7 = vpop.f32.mrf.mxu0  ;;  %v11979_v35 = vpop.f32.mrf.mxu1  ;;  %9833 = vmatprep.subr.mxu0 %v4049_v8  ;;  %9771 = vmatprep.subr.mxu1 %v8101_v58 }
 0x197   : > { %9834 = vmatpush3.msra.mxu0 %v4049_v8  ;;  %9772 = vmatpush3.msra.mxu1 %v8101_v58 }
 0x198   : > { %v9461_v11 = vpop.f32.mrf.mxu0  ;;  %v11984_v37 = vpop.f32.mrf.mxu1  ;;  %9835 = vmatprep.subr.mxu0 %v4048_v51 }
 0x199   : > { %v11987_v22 = vadd.f32 %v9461_v11, %v11797_v46  ;;  %v4057_v46 = vld [vmem:[#allocation3 + $0x9] sm:$0xff]  ;;  %9836 = vmatpush3.msra.mxu0 %v4048_v51 }
 0x19a   : > { %v11995_v16 = vpop.f32.mrf.mxu0  ;;  %v11997_v19 = vpop.f32.mrf.mxu1  ;;  %v4017_v11 = vld [vmem:[#allocation3 + $0x8] sm:$0xff]  ;;  %9774 = vmatmul.mubr.msk.f32.vlgmr.msra.gmra.mxu1 %vm223_vm0, %v4057_v46 }
 0x19b   : > { %9838 = vmatmul.mubr.msk.f32.vlgmr.msra.gmra.mxu0 %vm223_vm0, %v4017_v11  ;;  %v8180_v11 = vld [vmem:[%s14045_s3 + $0xb8] sm:$0xff] }
 0x19c   : > { %v9464_v60 = vpop.f32.mrf.mxu0  ;;  %v12000_v27 = vpop.f32.mrf.mxu1  ;;  %9885 = vmatprep.subr.mxu1 %v8180_v11 }
 0x19d   : > { %v12004_v8 = vadd.f32 %v9464_v60, %v11807_v45  ;;  %9886 = vmatpush3.msra.mxu1 %v8180_v11  ;;  %v8179_v11 = vld [vmem:[%s14045_s3 + $0xb0] sm:$0xff] }
 0x19e   : > { %v12008_v55 = vpop.f32.mrf.mxu0  ;;  %v12010_v58 = vpop.f32.mrf.mxu1  ;;  %9887 = vmatprep.subr.mxu1 %v8179_v11 }
 0x19f   : > { %9888 = vmatpush3.msra.mxu1 %v8179_v11  ;;  %v8178_v11 = vld [vmem:[%s14045_s3 + $0xa8] sm:$0xff] }
 0x1a0   : > { %v9467_v5 = vpop.f32.mrf.mxu0  ;;  %v12012_v9 = vpop.f32.mrf.mxu1  ;;  %9889 = vmatprep.subr.mxu1 %v8178_v11 }
 0x1a1   : > { %v12015_v10 = vadd.f32 %v9467_v5, %v11820_v40  ;;  %9890 = vmatpush3.msra.mxu1 %v8178_v11  ;;  %v8177_v11 = vld [vmem:[%s14045_s3 + $0xa0] sm:$0xff] }
 0x1a2   : > { %v12017_v51 = vpop.f32.mrf.mxu0  ;;  %v12019_v21 = vpop.f32.mrf.mxu1  ;;  %9891 = vmatprep.subr.mxu1 %v8177_v11 }
 0x1a3   : > { %14087 = vst [vmem:[#allocation33_spill] sm:$0xff] %v12019_v21  ;;  %9892 = vmatpush3.msra.mxu1 %v8177_v11  ;;  %v8176_v11 = vld [vmem:[%s14045_s3 + $0x98] sm:$0xff] }
 0x1a4   : > { %v9470_v45 = vpop.f32.mrf.mxu0  ;;  %v12021_v60 = vpop.f32.mrf.mxu1  ;;  %9893 = vmatprep.subr.mxu1 %v8176_v11 }
 0x1a5   : > { %14088 = vst [vmem:[#allocation34_spill] sm:$0xff] %v12021_v60  ;;  %v12024_v46 = vadd.f32 %v9470_v45, %v11830_v38  ;;  %9894 = vmatpush3.msra.mxu1 %v8176_v11  ;;  %v8175_v11 = vld [vmem:[%s14045_s3 + $0x90] sm:$0xff] }
 0x1a6   : > { %v12029_v0 = vpop.f32.mrf.mxu0  ;;  %v12031_v47 = vpop.f32.mrf.mxu1  ;;  %9895 = vmatprep.subr.mxu1 %v8175_v11 }
 0x1a7   : > { %14089 = vst [vmem:[#allocation35_spill] sm:$0xff] %v12024_v46  ;;  %14090 = vst [vmem:[#allocation36_spill] sm:$0xff] %v12029_v0  ;;  %9896 = vmatpush3.msra.mxu1 %v8175_v11 }
 0x1a8   : > { %14091 = vst [vmem:[#allocation37_spill] sm:$0xff] %v12031_v47  ;;  %v9473_v40 = vpop.f32.mrf.mxu0  ;;  %v12033_v5 = vpop.f32.mrf.mxu1 }
 0x1a9   : > { %14092 = vst [vmem:[#allocation38_spill] sm:$0xff] %v12033_v5  ;;  %v12036_v44 = vadd.f32 %v9473_v40, %v11843_v28 }
 0x1aa   : > { %v12038_v60 = vpop.f32.mrf.mxu0  ;;  %v12040_v38 = vpop.f32.mrf.mxu1 }
 0x1ab   : > { %14093 = vst [vmem:[#allocation39_spill] sm:$0xff] %v12036_v44  ;;  %14094 = vst [vmem:[#allocation40_spill] sm:$0xff] %v12038_v60 }
 0x1ac   : > { %14095 = vst [vmem:[#allocation41_spill] sm:$0xff] %v12040_v38  ;;  %v9476_v45 = vpop.f32.mrf.mxu0  ;;  %v12042_v46 = vpop.f32.mrf.mxu1 }
 0x1ad   : > { %14096 = vst [vmem:[#allocation42_spill] sm:$0xff] %v12042_v46  ;;  %v12045_v17 = vadd.f32 %v9476_v45, %v11853_v61 }
 0x1ae   : > { %v12050_v47 = vpop.f32.mrf.mxu0  ;;  %v12052_v5 = vpop.f32.mrf.mxu1 }
 0x1af   : > { %14097 = vst [vmem:[#allocation43_spill] sm:$0xff] %v12045_v17  ;;  %14098 = vst [vmem:[#allocation44_spill] sm:$0xff] %v12050_v47 }
 0x1b0   : > { %14099 = vst [vmem:[#allocation45_spill] sm:$0xff] %v12052_v5  ;;  %v9479_v28 = vpop.f32.mrf.mxu0  ;;  %v12054_v40 = vpop.f32.mrf.mxu1 }
 0x1b1   : > { %14100 = vst [vmem:[#allocation46_spill] sm:$0xff] %v12054_v40  ;;  %v12057_v38 = vadd.f32 %v9479_v28, %v11867_v25 }
 0x1b2   : > { %v12059_v46 = vpop.f32.mrf.mxu0  ;;  %v12061_v61 = vpop.f32.mrf.mxu1 }
 0x1b3   : > { %14101 = vst [vmem:[#allocation47_spill] sm:$0xff] %v12057_v38  ;;  %14102 = vst [vmem:[#allocation48_spill] sm:$0xff] %v12059_v46 }
 0x1b4   : > { %14103 = vst [vmem:[#allocation49_spill] sm:$0xff] %v12061_v61  ;;  %v9482_v45 = vpop.f32.mrf.mxu0  ;;  %v12063_v17 = vpop.f32.mrf.mxu1 }
 0x1b5   : > { %14104 = vst [vmem:[#allocation50_spill] sm:$0xff] %v12063_v17  ;;  %v12066_v44 = vadd.f32 %v9482_v45, %v11876_v53 }
 0x1b6   : > { %v12071_v5 = vpop.f32.mrf.mxu0  ;;  %v12073_v40 = vpop.f32.mrf.mxu1 }
 0x1b7   : > { %14105 = vst [vmem:[#allocation51_spill] sm:$0xff] %v12066_v44  ;;  %14106 = vst [vmem:[#allocation52_spill] sm:$0xff] %v12071_v5 }
 0x1b8   : > { %14107 = vst [vmem:[#allocation53_spill] sm:$0xff] %v12073_v40  ;;  %v9485_v25 = vpop.f32.mrf.mxu0  ;;  %v12075_v28 = vpop.f32.mrf.mxu1 }
 0x1b9   : > { %14108 = vst [vmem:[#allocation54_spill] sm:$0xff] %v12075_v28  ;;  %v12078_v61 = vadd.f32 %v9485_v25, %v11888_v48 }
 0x1ba   : > { %v12080_v17 = vpop.f32.mrf.mxu0  ;;  %v12082_v53 = vpop.f32.mrf.mxu1 }
 0x1bb   : > { %14109 = vst [vmem:[#allocation55_spill] sm:$0xff] %v12078_v61  ;;  %14110 = vst [vmem:[#allocation56_spill] sm:$0xff] %v12080_v17  ;;  %v12197_v17 = vld [vmem:[%s14045_s3 + $0x138] sm:$0xff] }
 0x1bc   : > { %14111 = vst [vmem:[#allocation57_spill] sm:$0xff] %v12082_v53  ;;  %v9488_v45 = vpop.f32.mrf.mxu0  ;;  %v12084_v44 = vpop.f32.mrf.mxu1  ;;  %14132 = vst [vmem:[#allocation78_spill] sm:$0xff] %v12197_v17 }
 0x1bd   : > { %14112 = vst [vmem:[#allocation58_spill] sm:$0xff] %v12084_v44  ;;  %v12087_v38 = vadd.f32 %v9488_v45, %v11897_v50 }
 0x1be   : > { %v12092_v40 = vpop.f32.mrf.mxu0  ;;  %v12094_v28 = vpop.f32.mrf.mxu1 }
 0x1bf   : > { %14113 = vst [vmem:[#allocation59_spill] sm:$0xff] %v12087_v38  ;;  %14114 = vst [vmem:[#allocation60_spill] sm:$0xff] %v12092_v40 }
 0x1c0   : > { %14115 = vst [vmem:[#allocation61_spill] sm:$0xff] %v12094_v28  ;;  %v9491_v48 = vpop.f32.mrf.mxu0  ;;  %v12096_v25 = vpop.f32.mrf.mxu1 }
 0x1c1   : > { %14116 = vst [vmem:[#allocation62_spill] sm:$0xff] %v12096_v25  ;;  %v12099_v53 = vadd.f32 %v9491_v48, %v11909_v49 }
 0x1c2   : > { %v12101_v44 = vpop.f32.mrf.mxu0  ;;  %v12103_v50 = vpop.f32.mrf.mxu1 }
 0x1c3   : > { %14117 = vst [vmem:[#allocation63_spill] sm:$0xff] %v12099_v53  ;;  %14118 = vst [vmem:[#allocation64_spill] sm:$0xff] %v12101_v44 }
 0x1c4   : > { %14119 = vst [vmem:[#allocation65_spill] sm:$0xff] %v12103_v50  ;;  %v9494_v45 = vpop.f32.mrf.mxu0  ;;  %v12105_v38 = vpop.f32.mrf.mxu1 }
 0x1c5   : > { %14120 = vst [vmem:[#allocation66_spill] sm:$0xff] %v12105_v38  ;;  %v12108_v61 = vadd.f32 %v9494_v45, %v11919_v54 }
 0x1c6   : > { %v12113_v28 = vpop.f32.mrf.mxu0  ;;  %v12115_v25 = vpop.f32.mrf.mxu1 }
 0x1c7   : > { %14121 = vst [vmem:[#allocation67_spill] sm:$0xff] %v12108_v61  ;;  %14122 = vst [vmem:[#allocation68_spill] sm:$0xff] %v12113_v28  ;;  %v8214_v28 = vld [vmem:[%s14045_s3 + $0xc8] sm:$0xff] }
 0x1c8   : > { %14123 = vst [vmem:[#allocation69_spill] sm:$0xff] %v12115_v25  ;;  %v9497_v49 = vpop.f32.mrf.mxu0  ;;  %v12117_v48 = vpop.f32.mrf.mxu1  ;;  %v8215_v25 = vld [vmem:[%s14045_s3 + $0xd0] sm:$0xff] }
 0x1c9   : > { %14124 = vst [vmem:[#allocation70_spill] sm:$0xff] %v12117_v48  ;;  %v12120_v50 = vadd.f32 %v9497_v49, %v11932_v30  ;;  %v8220_v48 = vld [vmem:[%s14045_s3 + $0xf8] sm:$0xff] }
 0x1ca   : > { %v12122_v38 = vpop.f32.mrf.mxu0  ;;  %v12124_v54 = vpop.f32.mrf.mxu1  ;;  %9949 = vmatprep.subr.mxu0 %v8220_v48 }
 0x1cb   : > { %14125 = vst [vmem:[#allocation71_spill] sm:$0xff] %v12120_v50  ;;  %14126 = vst [vmem:[#allocation72_spill] sm:$0xff] %v12122_v38  ;;  %9950 = vmatpush3.msra.mxu0 %v8220_v48  ;;  %v8217_v48 = vld [vmem:[%s14045_s3 + $0xe0] sm:$0xff] }
 0x1cc   : > { %14127 = vst [vmem:[#allocation73_spill] sm:$0xff] %v12124_v54  ;;  %v9500_v45 = vpop.f32.mrf.mxu0  ;;  %v12126_v61 = vpop.f32.mrf.mxu1  ;;  %v8216_v54 = vld [vmem:[%s14045_s3 + $0xd8] sm:$0xff] }
 0x1cd   : > { %14128 = vst [vmem:[#allocation74_spill] sm:$0xff] %v12126_v61  ;;  %v12129_v53 = vadd.f32 %v9500_v45, %v11946_v15  ;;  %v8219_v15 = vld [vmem:[%s14045_s3 + $0xf0] sm:$0xff] }
 0x1ce   : > { %v12137_v30 = vpop.f32.mrf.mxu0  ;;  %v12139_v49 = vpop.f32.mrf.mxu1  ;;  %9951 = vmatprep.subr.mxu0 %v8219_v15 }
 0x1cf   : > { %14129 = vst [vmem:[#allocation75_spill] sm:$0xff] %v12129_v53  ;;  %14130 = vst [vmem:[#allocation76_spill] sm:$0xff] %v12137_v30  ;;  %9952 = vmatpush3.msra.mxu0 %v8219_v15  ;;  %v8218_v53 = vld [vmem:[%s14045_s3 + $0xe8] sm:$0xff] }
 0x1d0   : > { %14131 = vst [vmem:[#allocation77_spill] sm:$0xff] %v12139_v49  ;;  %v12144_v45 = vpop.f32.mrf.mxu0  ;;  %v12146_v61 = vpop.f32.mrf.mxu1  ;;  %9953 = vmatprep.subr.mxu0 %v8218_v53  ;;  %v8174_v15 = vld [vmem:[%s14045_s3 + $0x88] sm:$0xff] }
 0x1d1   : > { %9954 = vmatpush3.msra.mxu0 %v8218_v53  ;;  %9897 = vmatprep.subr.mxu1 %v8174_v15  ;;  %v8173_v53 = vld [vmem:[%s14045_s3 + $0x80] sm:$0xff] }
 0x1d2   : > { %v12151_v30 = vpop.f32.mrf.mxu0  ;;  %v12153_v49 = vpop.f32.mrf.mxu1  ;;  %9955 = vmatprep.subr.mxu0 %v8217_v48  ;;  %9898 = vmatpush3.msra.mxu1 %v8174_v15 }
 0x1d3   : > { %9956 = vmatpush3.msra.mxu0 %v8217_v48  ;;  %9899 = vmatprep.subr.mxu1 %v8173_v53 }
 0x1d4   : > { %v12158_v11 = vpop.f32.mrf.mxu0  ;;  %v12168_v38 = vpop.f32.mrf.mxu1  ;;  %9957 = vmatprep.subr.mxu0 %v8216_v54  ;;  %9900 = vmatpush3.msra.mxu1 %v8173_v53 }
 0x1d5   : > { %9958 = vmatpush3.msra.mxu0 %v8216_v54  ;;  %v8213_v54 = vld [vmem:[%s14045_s3 + $0xc0] sm:$0xff]  ;;  %10013 = vmatprep.subr.mxu1 %v12197_v17 }
 0x1d6   : > { %v12166_v50 = vpop.f32.mrf.mxu0  ;;  %9959 = vmatprep.subr.mxu0 %v8215_v25  ;;  %v12181_v44 = vpop.f32.mrf.mxu1 }
 0x1d7   : > { %9960 = vmatpush3.msra.mxu0 %v8215_v25 }
 0x1d8   : > { %v12176_v48 = vpop.f32.mrf.mxu0  ;;  %9961 = vmatprep.subr.mxu0 %v8214_v28  ;;  %v12190_v53 = vpop.f32.mrf.mxu1 }
 0x1d9   : > { %9962 = vmatpush3.msra.mxu0 %v8214_v28 }
 0x1da   : > { %v12183_v40 = vpop.f32.mrf.mxu0  ;;  %9963 = vmatprep.subr.mxu0 %v8213_v54  ;;  %v12202_v5 = vpop.f32.mrf.mxu1 }
 0x1db   : > { %9964 = vmatpush3.msra.mxu0 %v8213_v54 }
 0x1dc   : > { %v12188_v15 = vpop.f32.mrf.mxu0  ;;  %v12208_v54 = vpop.f32.mrf.mxu1 }
 0x1dd   : > { %14136 = vst [vmem:[#allocation82_spill] sm:$0xff] %v12208_v54 }
 0x1de   : > { %v12192_v25 = vpop.f32.mrf.mxu0  ;;  %v12214_v31 = vpop.f32.mrf.mxu1 }
 0x1df   : > { %14139 = vst [vmem:[#allocation85_spill] sm:$0xff] %v12214_v31 }
 0x1e0   : > { %v12200_v28 = vpop.f32.mrf.mxu0  ;;  %v12220_v17 = vpop.f32.mrf.mxu1 }
 0x1e1   : > { %14133 = vst [vmem:[#allocation79_spill] sm:$0xff] %v12200_v28  ;;  %14142 = vst [vmem:[#allocation88_spill] sm:$0xff] %v12220_v17 }
 0x1e2   : > { %v12204_v46 = vpop.f32.mrf.mxu0 }
 0x1e3   : > { %14134 = vst [vmem:[#allocation80_spill] sm:$0xff] %v12204_v46  ;;  %v12226_v46 = vpop.f32.mrf.mxu1 }
 0x1e4   : > { %v12206_v47 = vpop.f32.mrf.mxu0  ;;  %14145 = vst [vmem:[#allocation91_spill] sm:$0xff] %v12226_v46 }
 0x1e5   : > { %14135 = vst [vmem:[#allocation81_spill] sm:$0xff] %v12206_v47 }
 0x1e6   : > { %v12210_v60 = vpop.f32.mrf.mxu0 }
 0x1e7   : > { %14137 = vst [vmem:[#allocation83_spill] sm:$0xff] %v12210_v60  ;;  %v12232_v60 = vpop.f32.mrf.mxu1 }
 0x1e8   : > { %v12212_v62 = vpop.f32.mrf.mxu0  ;;  %14148 = vst [vmem:[#allocation94_spill] sm:$0xff] %v12232_v60 }
 0x1e9   : > { %14138 = vst [vmem:[#allocation84_spill] sm:$0xff] %v12212_v62 }
 0x1ea   : > { %v12216_v26 = vpop.f32.mrf.mxu0 }
 0x1eb   : > { %14140 = vst [vmem:[#allocation86_spill] sm:$0xff] %v12216_v26  ;;  %v12238_v26 = vpop.f32.mrf.mxu1 }
 0x1ec   : > { %v12218_v0 = vpop.f32.mrf.mxu0 }
 0x1ed   : > { %14141 = vst [vmem:[#allocation87_spill] sm:$0xff] %v12218_v0 }
 0x1ee   : > { %v12222_v28 = vpop.f32.mrf.mxu0 }
 0x1ef   : > { %14143 = vst [vmem:[#allocation89_spill] sm:$0xff] %v12222_v28  ;;  %v12244_v28 = vpop.f32.mrf.mxu1 }
 0x1f0   : > { %v12224_v21 = vpop.f32.mrf.mxu0  ;;  %14153 = vst [vmem:[#allocation99_spill] sm:$0xff] %v12244_v28 }
 0x1f1   : > { %14144 = vst [vmem:[#allocation90_spill] sm:$0xff] %v12224_v21 }
 0x1f2   : > { %v12228_v47 = vpop.f32.mrf.mxu0 }
 0x1f3   : > { %14146 = vst [vmem:[#allocation92_spill] sm:$0xff] %v12228_v47  ;;  %v12250_v47 = vpop.f32.mrf.mxu1 }
 0x1f4   : > { %v12230_v54 = vpop.f32.mrf.mxu0 }
 0x1f5   : > { %14147 = vst [vmem:[#allocation93_spill] sm:$0xff] %v12230_v54 }
 0x1f6   : > { %v12234_v62 = vpop.f32.mrf.mxu0 }
 0x1f7   : > { %14149 = vst [vmem:[#allocation95_spill] sm:$0xff] %v12234_v62  ;;  %v12258_v62 = vpop.f32.mrf.mxu1 }
 0x1f8   : > { %v12236_v31 = vpop.f32.mrf.mxu0 }
 0x1f9   : > { %14150 = vst [vmem:[#allocation96_spill] sm:$0xff] %v12236_v31  ;;  %v1855_v31 = vadd.f32 %v11772_v13, %v11775_v39 }
 0x1fa   : > { %v12240_v0 = vpop.f32.mrf.mxu0 }
 0x1fb   : > { %14151 = vst [vmem:[#allocation97_spill] sm:$0xff] %v12240_v0 }
 0x1fc   : > { %v12242_v17 = vpop.f32.mrf.mxu0 }
 0x1fd   : > { %14152 = vst [vmem:[#allocation98_spill] sm:$0xff] %v12242_v17  ;;  %v2249_v17 = vadd.f32 %v11962_v42, %v1855_v31  ;;  %v1859_v31 = vadd.f32 %v11792_v3, %v11795_v20 }
 0x1fe   : > { %v12246_v21 = vpop.f32.mrf.mxu0 }
 0x1ff   : > { %14154 = vst [vmem:[#allocation100_spill] sm:$0xff] %v12246_v21  ;;  %v2644_v21 = vadd.f32 %v11954_v6, %v11957_v1  ;;  %v2643_v13 = vadd.f32 %v11964_v4, %v2249_v17  ;;  %v2253_v6 = vadd.f32 %v11995_v16, %v1859_v31  ;;  %v12291_v17 = vld [vmem:[%s14045_s3 + $0x178] sm:$0xff]  ;;  %v12304_v16 = vld [vmem:[%s14044_s2] ss:$0 sm:$0xff]  ;;  %v12328_v31 = vadd.f32 %v11714_v59, %v11712_v12 }
 0x200   : > { %v12248_v46 = vpop.f32.mrf.mxu0  ;;  %10077 = vmatprep.subr.mxu0 %v12291_v17  ;;  %v12340_v12 = vadd.f32 %v11724_v36, %v11722_v57  ;;  %v1865_v59 = vadd.f32 %v11825_v63, %v11828_v2  ;;  %v12352_v57 = vadd.f32 %v11734_v29, %v11732_v52  ;;  %v14160_v36 = vld [vmem:[#allocation33_spill] sm:$0xff]  ;;  %v14161_v2 = vld [vmem:[#allocation36_spill] sm:$0xff] }
 0x201   : > { %14155 = vst [vmem:[#allocation101_spill] sm:$0xff] %v12248_v46  ;;  %v1857_v46 = vadd.f32 %v11782_v56, %v11785_v41  ;;  %v2646_v56 = vadd.f32 %v11969_v32, %v11972_v43  ;;  %v3038_v41 = vadd.f32 %v12151_v30, %v2643_v13  ;;  %v1861_v32 = vadd.f32 %v11802_v23, %v11805_v14  ;;  %v14165_v52 = vld [vmem:[#allocation8_spill] sm:$0xff] }
 0x202   : > { %v12252_v54 = vpop.f32.mrf.mxu0  ;;  %v2648_v43 = vadd.f32 %v11984_v37, %v11987_v22 }
 0x203   : > { %14156 = vst [vmem:[#allocation102_spill] sm:$0xff] %v12252_v54  ;;  %v12269_v54 = vpop.f32.mrf.mxu1  ;;  %v2251_v39 = vadd.f32 %v11977_v7, %v1857_v46  ;;  %v3041_v4 = vadd.f32 %v12158_v11, %v2646_v56  ;;  %v2647_v46 = vadd.f32 %v11997_v19, %v2253_v6 }
 0x204   : > { %v12254_v60 = vpop.f32.mrf.mxu0  ;;  %v3043_v23 = vadd.f32 %v12176_v48, %v2648_v43 }
 0x205   : > { %14157 = vst [vmem:[#allocation103_spill] sm:$0xff] %v12254_v60  ;;  %v12284_v1 = vpop.f32.mrf.mxu1  ;;  %v2645_v3 = vadd.f32 %v11979_v35, %v2251_v39  ;;  %v3432_v35 = vadd.f32 %v12153_v49, %v3038_v41  ;;  %v3435_v22 = vadd.f32 %v12168_v38, %v3041_v4  ;;  %v12317_v49 = vadd.f32 %v11704_v34, %v11702_v18 }
 0x206   : > { %v12260_v0 = vpop.f32.mrf.mxu0  ;;  %v3042_v19 = vadd.f32 %v12183_v40, %v2647_v46  ;;  %v14167_v46 = vld [vmem:[#allocation13_spill] sm:$0xff] }
 0x207   : > { %14158 = vst [vmem:[#allocation104_spill] sm:$0xff] %v12260_v0  ;;  %v3039_v0 = vadd.f32 %v12144_v45, %v2644_v21  ;;  %v12311_v14 = vpop.f32.mrf.mxu1 }
 0x208   : > { %v12263_v28 = vpop.f32.mrf.mxu0 }
 0x209   : > { %v3433_v20 = vadd.f32 %v12146_v61, %v3039_v0  ;;  %v3040_v0 = vadd.f32 %v12166_v50, %v2645_v3  ;;  %v2255_v61 = vadd.f32 %v12008_v55, %v1861_v32  ;;  %v1863_v50 = vadd.f32 %v11815_v24, %v11818_v33  ;;  %v12333_v33 = vpop.f32.mrf.mxu1 }
 0x20a   : > { %v12271_v60 = vpop.f32.mrf.mxu0  ;;  %v2650_v55 = vadd.f32 %v12000_v27, %v12004_v8  ;;  %v3437_v24 = vadd.f32 %v12190_v53, %v3043_v23  ;;  %v14168_v23 = vld [vmem:[#allocation35_spill] sm:$0xff] }
 0x20b   : > { %14159 = vst [vmem:[#allocation105_spill] sm:$0xff] %v12271_v60  ;;  %v3434_v48 = vadd.f32 %v12181_v44, %v3040_v0  ;;  %v2649_v18 = vadd.f32 %v12010_v58, %v2255_v61  ;;  %v2257_v34 = vadd.f32 %v12017_v51, %v1863_v50  ;;  %v2652_v58 = vadd.f32 %v12012_v9, %v12015_v10  ;;  %v14162_v10 = vld [vmem:[#allocation79_spill] sm:$0xff] }
 0x20c   : > { %v12278_v42 = vpop.f32.mrf.mxu0  ;;  %v3045_v8 = vadd.f32 %v12188_v15, %v2650_v55  ;;  %v3436_v51 = vadd.f32 %v12202_v5, %v3042_v19  ;;  %v12357_v5 = vpop.f32.mrf.mxu1  ;;  %v14164_v0 = vld [vmem:[#allocation7_spill] sm:$0xff]  ;;  %v14171_v55 = vld [vmem:[#allocation85_spill] sm:$0xff] }
 0x20d   : > { %v3044_v15 = vadd.f32 %v12192_v25, %v2649_v18  ;;  %v2651_v63 = vadd.f32 %v14160_v36, %v2257_v34  ;;  %v3047_v9 = vadd.f32 %v14162_v10, %v2652_v58  ;;  %v14163_v25 = vld [vmem:[#allocation82_spill] sm:$0xff]  ;;  %v12364_v29 = vadd.f32 %v14165_v52, %v14164_v0  ;;  %v14174_v34 = vld [vmem:[#allocation37_spill] sm:$0xff]  ;;  %v14182_v10 = vld [vmem:[#allocation39_spill] sm:$0xff] }
 0x20e   : > { %v12286_v60 = vpop.f32.mrf.mxu0  ;;  %v3439_v32 = vadd.f32 %v14163_v25, %v3045_v8  ;;  %v14177_v58 = vld [vmem:[#allocation81_spill] sm:$0xff]  ;;  %v14184_v25 = vld [vmem:[#allocation91_spill] sm:$0xff] }
 0x20f   : > { %v3438_v19 = vadd.f32 %v14171_v55, %v3044_v15  ;;  %v14185_v52 = vld [vmem:[#allocation83_spill] sm:$0xff]  ;;  %v14188_v55 = vld [vmem:[#allocation84_spill] sm:$0xff] }
 0x210   : > { %v9711_v7 = vpop.f32.mrf.mxu0 }
 0x211   : > { %v3827_v21 = vadd.f32 %v9711_v7, %v3433_v20  ;;  %v2259_v20 = vadd.f32 %v14161_v2, %v1865_v59  ;;  %v14181_v2 = vld [vmem:[#allocation15_spill] sm:$0xff] }
 0x212   : > { %v3667_v37 = vpop.f32.mrf.mxu0 }
 0x213   : > { %v3866_v30 = vadd.f32 %v12304_v16, %v3827_v21  ;;  %v3826_v45 = vadd.f32 %v3667_v37, %v3432_v35  ;;  %v14166_v21 = vld [vmem:[#allocation14_spill] sm:$0xff] }
 0x214   : > { %v9714_v11 = vpop.f32.mrf.mxu0  ;;  %v1867_v61 = vadd.f32 %v14167_v46, %v14166_v21  ;;  %v14169_v37 = vld [vmem:[#allocation34_spill] sm:$0xff] }
 0x215   : > { %v3898_v13 = vmax.f32 %v3866_v30, 0.0  ;;  %v3865_v38 = vadd.f32 %v12304_v16, %v3826_v45  ;;  %v3829_v39 = vadd.f32 %v9714_v11, %v3435_v22  ;;  %v2654_v22 = vadd.f32 %v14169_v37, %v14168_v23  ;;  %v14170_v30 = vld [vmem:[#allocation80_spill] sm:$0xff] }
 0x216   : > { %v3677_v27 = vpop.f32.mrf.mxu0  ;;  %v3046_v45 = vadd.f32 %v14170_v30, %v2651_v63  ;;  %v14180_v63 = vld [vmem:[#allocation16_spill] sm:$0xff] }
 0x217   : > { %3985 = vst.msk [vmem:[#allocation3 + $0x21] sm:$0xff] %vm223_vm0, %v3898_v13  ;;  %v3897_v44 = vmax.f32 %v3865_v38, 0.0  ;;  %v3868_v40 = vadd.f32 %v12304_v16, %v3829_v39  ;;  %v3828_v56 = vadd.f32 %v3677_v27, %v3434_v48  ;;  %v14172_v38 = vld [vmem:[#allocation9_spill] sm:$0xff]  ;;  %v14173_v39 = vld [vmem:[#allocation10_spill] sm:$0xff]  ;;  %v14175_v27 = vld [vmem:[#allocation40_spill] sm:$0xff] }
 0x218   : > { %v9717_v53 = vpop.f32.mrf.mxu0  ;;  %v12376_v18 = vadd.f32 %v14173_v39, %v14172_v38  ;;  %v2261_v8 = vadd.f32 %v14175_v27, %v1867_v61  ;;  %v14190_v27 = vld [vmem:[#allocation18_spill] sm:$0xff] }
 0x219   : > { %3984 = vst.msk [vmem:[#allocation3 + $0x19] sm:$0xff] %vm223_vm0, %v3897_v44  ;;  %v3900_v41 = vmax.f32 %v3868_v40, 0.0  ;;  %v3867_v6 = vadd.f32 %v12304_v16, %v3828_v56  ;;  %v3831_v3 = vadd.f32 %v9717_v53, %v3437_v24  ;;  %v2653_v24 = vadd.f32 %v14174_v34, %v2259_v20  ;;  %v14176_v44 = vld [vmem:[#allocation88_spill] sm:$0xff]  ;;  %v12381_v56 = vpop.f32.mrf.mxu1 }
 0x21a   : > { %v3687_v4 = vpop.f32.mrf.mxu0  ;;  %v3441_v40 = vadd.f32 %v14176_v44, %v3047_v9  ;;  %v1869_v20 = vadd.f32 %v14181_v2, %v14180_v63  ;;  %v14183_v9 = vld [vmem:[#allocation38_spill] sm:$0xff] }
 0x21b   : > { %3987 = vst.msk [vmem:[#allocation3 + $0x39] sm:$0xff] %vm223_vm0, %v3900_v41  ;;  %v3899_v43 = vmax.f32 %v3867_v6, 0.0  ;;  %v3870_v7 = vadd.f32 %v12304_v16, %v3831_v3  ;;  %v3830_v35 = vadd.f32 %v3687_v4, %v3436_v51  ;;  %v3049_v51 = vadd.f32 %v14177_v58, %v2654_v22  ;;  %v14178_v6 = vld [vmem:[#allocation11_spill] sm:$0xff]  ;;  %v14179_v3 = vld [vmem:[#allocation12_spill] sm:$0xff]  ;;  %v14186_v22 = vld [vmem:[#allocation41_spill] sm:$0xff] }
 0x21c   : > { %v9720_v50 = vpop.f32.mrf.mxu0  ;;  %v12388_v36 = vadd.f32 %v14179_v3, %v14178_v6  ;;  %v2656_v4 = vadd.f32 %v14183_v9, %v14182_v10  ;;  %v3048_v21 = vadd.f32 %v14185_v52, %v2653_v24  ;;  %v2655_v30 = vadd.f32 %v14186_v22, %v2261_v8  ;;  %v14191_v8 = vld [vmem:[#allocation17_spill] sm:$0xff]  ;;  %v14193_v58 = vld [vmem:[#allocation43_spill] sm:$0xff] }
 0x21d   : > { %3986 = vst.msk [vmem:[#allocation3 + $0x31] sm:$0xff] %vm223_vm0, %v3899_v43  ;;  %v3902_v11 = vmax.f32 %v3870_v7, 0.0  ;;  %v3869_v48 = vadd.f32 %v12304_v16, %v3830_v35  ;;  %v3833_v13 = vadd.f32 %v9720_v50, %v3439_v32  ;;  %v3440_v32 = vadd.f32 %v14184_v25, %v3046_v45  ;;  %v14187_v45 = vld [vmem:[#allocation44_spill] sm:$0xff]  ;;  %v14196_v25 = vld [vmem:[#allocation45_spill] sm:$0xff] }
 0x21e   : > { %v3697_v59 = vpop.f32.mrf.mxu0  ;;  %v12408_v37 = vld [vmem:[#allocation3 + $0x21] sm:$0xff]  ;;  %v2263_v50 = vadd.f32 %v14187_v45, %v1869_v20  ;;  %v1871_v44 = vadd.f32 %v14191_v8, %v14190_v27  ;;  %v3442_v20 = vadd.f32 %v12238_v26, %v3048_v21 }
 0x21f   : > { %3989 = vst.msk [vmem:[#allocation3 + $0x51] sm:$0xff] %vm223_vm0, %v3902_v11  ;;  %v3901_v53 = vmax.f32 %v3869_v48, 0.0  ;;  %v3872_v15 = vadd.f32 %v12304_v16, %v3833_v13  ;;  %v3832_v41 = vadd.f32 %v3697_v59, %v3438_v19  ;;  %v3051_v19 = vadd.f32 %v14188_v55, %v2656_v4  ;;  %v12413_v11 = vpop.f32.mrf.mxu1  ;;  %v14189_v13 = vld [vmem:[#allocation94_spill] sm:$0xff]  ;;  %v14200_v55 = vld [vmem:[#allocation20_spill] sm:$0xff] }
 0x220   : > { %v9723_v43 = vpop.f32.mrf.mxu0  ;;  %v12395_v7 = vld [vmem:[#allocation3 + $0x19] sm:$0xff]  ;;  %v3443_v38 = vadd.f32 %v14189_v13, %v3049_v51 }
 0x221   : > { %v12397_v35 = vld [vmem:[#allocation3 + $0x18] sm:$0xff]  ;;  %v12399_v0 = vld [vmem:[#allocation3 + $0x20] sm:$0xff]  ;;  %3988 = vst.msk [vmem:[#allocation3 + $0x49] sm:$0xff] %vm223_vm0, %v3901_v53  ;;  %v3904_v46 = vmax.f32 %v3872_v15, 0.0  ;;  %v3871_v61 = vadd.f32 %v12304_v16, %v3832_v41  ;;  %v3835_v23 = vadd.f32 %v9723_v43, %v3441_v40  ;;  %9776 = vmatprep.mubr.msk.f32.mxu1 %vm223_vm0, %v12395_v7  ;;  %v14192_v40 = vld [vmem:[#allocation19_spill] sm:$0xff]  ;;  %v12447_v21 = vpop.f32.mrf.mxu1 }
 0x222   : > { %9840 = vmatprep.mubr.msk.f32.mxu0 %vm223_vm0, %v12397_v35  ;;  %v3707_v48 = vpop.f32.mrf.mxu0  ;;  %9777 = vmatmul.mubr.msk.f32.gmra.mxu1 %vm223_vm0, %v12408_v37  ;;  %v1479_v59 = vadd.f32 %v14192_v40, %v12317_v49  ;;  %v14194_v53 = vld [vmem:[#allocation42_spill] sm:$0xff]  ;;  %v12442_v4 = vld [vmem:[#allocation3 + $0x39] sm:$0xff] }
 0x223   : > { %9841 = vmatmul.mubr.msk.f32.gmra.mxu0 %vm223_vm0, %v12399_v0  ;;  %3991 = vst.msk [vmem:[#allocation3 + $0x69] sm:$0xff] %vm223_vm0, %v3904_v46  ;;  %v3903_v39 = vmax.f32 %v3871_v61, 0.0  ;;  %v3874_v34 = vadd.f32 %v12304_v16, %v3835_v23  ;;  %v3834_v24 = vadd.f32 %v3707_v48, %v3440_v32  ;;  %v2658_v15 = vadd.f32 %v14194_v53, %v14193_v58  ;;  %v14195_v41 = vld [vmem:[#allocation86_spill] sm:$0xff]  ;;  %v14197_v43 = vld [vmem:[#allocation48_spill] sm:$0xff]  ;;  %v14198_v46 = vld [vmem:[#allocation99_spill] sm:$0xff] }
 0x224   : > { %v3050_v6 = vadd.f32 %v14195_v41, %v2655_v30  ;;  %v9726_v3 = vpop.f32.mrf.mxu0  ;;  %v12429_v63 = vld [vmem:[#allocation3 + $0x31] sm:$0xff]  ;;  %v2657_v32 = vadd.f32 %v14196_v25, %v2263_v50  ;;  %v2265_v52 = vadd.f32 %v14197_v43, %v1871_v44  ;;  %v3445_v26 = vadd.f32 %v14198_v46, %v3051_v19  ;;  %v14201_v19 = vld [vmem:[#allocation21_spill] sm:$0xff] }
 0x225   : > { %v12431_v51 = vld [vmem:[#allocation3 + $0x30] sm:$0xff]  ;;  %v12433_v2 = vld [vmem:[#allocation3 + $0x38] sm:$0xff]  ;;  %3990 = vst.msk [vmem:[#allocation3 + $0x61] sm:$0xff] %vm223_vm0, %v3903_v39  ;;  %v3906_v10 = vmax.f32 %v3874_v34, 0.0  ;;  %v3873_v9 = vadd.f32 %v12304_v16, %v3834_v24  ;;  %v3837_v49 = vadd.f32 %v9726_v3, %v3443_v38  ;;  %9779 = vmatprep.mubr.msk.f32.mxu1 %vm223_vm0, %v12429_v63  ;;  %v1873_v48 = vadd.f32 %v14200_v55, %v1479_v59  ;;  %v14203_v39 = vld [vmem:[#allocation46_spill] sm:$0xff] }
 0x226   : > { %9843 = vmatprep.mubr.msk.f32.mxu0 %vm223_vm0, %v12431_v51  ;;  %v3717_v61 = vpop.f32.mrf.mxu0  ;;  %9780 = vmatmul.mubr.msk.f32.gmra.mxu1 %vm223_vm0, %v12442_v4  ;;  %v14199_v23 = vld [vmem:[#allocation87_spill] sm:$0xff]  ;;  %v1481_v13 = vadd.f32 %v14201_v19, %v12328_v31  ;;  %v3444_v24 = vadd.f32 %v12250_v47, %v3050_v6  ;;  %v14204_v58 = vld [vmem:[#allocation89_spill] sm:$0xff]  ;;  %v14206_v3 = vld [vmem:[#allocation52_spill] sm:$0xff] }
 0x227   : > { %9844 = vmatmul.mubr.msk.f32.gmra.mxu0 %vm223_vm0, %v12433_v2  ;;  %v3053_v22 = vadd.f32 %v14199_v23, %v2658_v15  ;;  %3993 = vst.msk [vmem:[#allocation3 + $0x81] sm:$0xff] %vm223_vm0, %v3906_v10  ;;  %v3905_v30 = vmax.f32 %v3873_v9, 0.0  ;;  %v3876_v45 = vadd.f32 %v12304_v16, %v3837_v49  ;;  %v3836_v50 = vadd.f32 %v3717_v61, %v3442_v20  ;;  %v14202_v38 = vld [vmem:[#allocation47_spill] sm:$0xff]  ;;  %v14205_v41 = vld [vmem:[#allocation49_spill] sm:$0xff]  ;;  %v14207_v10 = vld [vmem:[#allocation90_spill] sm:$0xff]  ;;  %v12480_v49 = vpop.f32.mrf.mxu1 }
 0x228   : > { %v2660_v34 = vadd.f32 %v14203_v39, %v14202_v38  ;;  %v9729_v27 = vpop.f32.mrf.mxu0  ;;  %v12462_v8 = vld [vmem:[#allocation3 + $0x49] sm:$0xff]  ;;  %v3052_v53 = vadd.f32 %v14204_v58, %v2657_v32  ;;  %v12475_v47 = vld [vmem:[#allocation3 + $0x51] sm:$0xff]  ;;  %v2659_v6 = vadd.f32 %v14205_v41, %v2265_v52  ;;  %v2267_v20 = vadd.f32 %v14206_v3, %v1873_v48  ;;  %v14213_v58 = vld [vmem:[#allocation53_spill] sm:$0xff] }
 0x229   : > { %v12464_v44 = vld [vmem:[#allocation3 + $0x48] sm:$0xff]  ;;  %v12466_v40 = vld [vmem:[#allocation3 + $0x50] sm:$0xff]  ;;  %3992 = vst.msk [vmem:[#allocation3 + $0x79] sm:$0xff] %vm223_vm0, %v3905_v30  ;;  %v3908_v59 = vmax.f32 %v3876_v45, 0.0  ;;  %v3875_v15 = vadd.f32 %v12304_v16, %v3836_v50  ;;  %v3839_v31 = vadd.f32 %v9729_v27, %v3445_v26  ;;  %9782 = vmatprep.mubr.msk.f32.mxu1 %vm223_vm0, %v12462_v8  ;;  %v3447_v32 = vadd.f32 %v12258_v62, %v3053_v22  ;;  %v14212_v48 = vld [vmem:[#allocation92_spill] sm:$0xff] }
 0x22a   : > { %9846 = vmatprep.mubr.msk.f32.mxu0 %vm223_vm0, %v12464_v44  ;;  %v3055_v9 = vadd.f32 %v14207_v10, %v2660_v34  ;;  %v3727_v25 = vpop.f32.mrf.mxu0  ;;  %9783 = vmatmul.mubr.msk.f32.gmra.mxu1 %vm223_vm0, %v12475_v47  ;;  %v14208_v26 = vld [vmem:[#allocation22_spill] sm:$0xff]  ;;  %v14209_v23 = vld [vmem:[#allocation23_spill] sm:$0xff]  ;;  %v3054_v19 = vadd.f32 %v14212_v48, %v2659_v6  ;;  %v3446_v34 = vadd.f32 %v12269_v54, %v3052_v53  ;;  %v12513_v53 = vpop.f32.mrf.mxu1  ;;  %v14215_v6 = vld [vmem:[#allocation93_spill] sm:$0xff] }
 0x22b   : > { %9847 = vmatmul.mubr.msk.f32.gmra.mxu0 %vm223_vm0, %v12466_v40  ;;  %3995 = vst.msk [vmem:[#allocation3 + $0x99] sm:$0xff] %vm223_vm0, %v3908_v59  ;;  %v3907_v43 = vmax.f32 %v3875_v15, 0.0  ;;  %v3878_v52 = vadd.f32 %v12304_v16, %v3839_v31  ;;  %v3838_v46 = vadd.f32 %v3727_v25, %v3444_v24  ;;  %v1875_v61 = vadd.f32 %v14208_v26, %v1481_v13  ;;  %v14210_v45 = vld [vmem:[#allocation51_spill] sm:$0xff]  ;;  %v14211_v50 = vld [vmem:[#allocation50_spill] sm:$0xff]  ;;  %v14214_v15 = vld [vmem:[#allocation56_spill] sm:$0xff] }
 0x22c   : > { %v1483_v30 = vadd.f32 %v14209_v23, %v12340_v12  ;;  %v2662_v55 = vadd.f32 %v14211_v50, %v14210_v45  ;;  %v9732_v38 = vpop.f32.mrf.mxu0  ;;  %v12495_v39 = vld [vmem:[#allocation3 + $0x61] sm:$0xff]  ;;  %v12508_v27 = vld [vmem:[#allocation3 + $0x69] sm:$0xff]  ;;  %v2661_v59 = vadd.f32 %v14213_v58, %v2267_v20  ;;  %v3449_v54 = vadd.f32 %v12284_v1, %v3055_v9  ;;  %v14223_v58 = vld [vmem:[#allocation96_spill] sm:$0xff] }
 0x22d   : > { %v12497_v62 = vld [vmem:[#allocation3 + $0x60] sm:$0xff]  ;;  %v12499_v22 = vld [vmem:[#allocation3 + $0x68] sm:$0xff]  ;;  %3994 = vst.msk [vmem:[#allocation3 + $0x91] sm:$0xff] %vm223_vm0, %v3907_v43  ;;  %v3910_v13 = vmax.f32 %v3878_v52, 0.0  ;;  %v3877_v24 = vadd.f32 %v12304_v16, %v3838_v46  ;;  %v3841_v12 = vadd.f32 %v9732_v38, %v3447_v32  ;;  %9785 = vmatprep.mubr.msk.f32.mxu1 %vm223_vm0, %v12495_v39  ;;  %v2269_v31 = vadd.f32 %v14214_v15, %v1875_v61  ;;  %v14216_v32 = vld [vmem:[#allocation24_spill] sm:$0xff]  ;;  %v12546_v15 = vpop.f32.mrf.mxu1 }
 0x22e   : > { %9849 = vmatprep.mubr.msk.f32.mxu0 %vm223_vm0, %v12497_v62  ;;  %v3737_v41 = vpop.f32.mrf.mxu0  ;;  %9786 = vmatmul.mubr.msk.f32.gmra.mxu1 %vm223_vm0, %v12508_v27  ;;  %v3057_v3 = vadd.f32 %v14215_v6, %v2662_v55  ;;  %v1877_v43 = vadd.f32 %v14216_v32, %v1483_v30  ;;  %v14217_v1 = vld [vmem:[#allocation25_spill] sm:$0xff]  ;;  %v14218_v52 = vld [vmem:[#allocation55_spill] sm:$0xff]  ;;  %v14219_v46 = vld [vmem:[#allocation54_spill] sm:$0xff]  ;;  %v3448_v61 = vadd.f32 %v12311_v14, %v3054_v19 }
 0x22f   : > { %9850 = vmatmul.mubr.msk.f32.gmra.mxu0 %vm223_vm0, %v12499_v22  ;;  %3997 = vst.msk [vmem:[#allocation3 + $0xb1] sm:$0xff] %vm223_vm0, %v3910_v13  ;;  %v3909_v10 = vmax.f32 %v3877_v24, 0.0  ;;  %v3880_v20 = vadd.f32 %v12304_v16, %v3841_v12  ;;  %v3840_v25 = vadd.f32 %v3737_v41, %v3446_v34  ;;  %v1485_v9 = vadd.f32 %v14217_v1, %v12352_v57  ;;  %v14220_v48 = vld [vmem:[#allocation95_spill] sm:$0xff]  ;;  %v12541_v14 = vld [vmem:[#allocation3 + $0x81] sm:$0xff]  ;;  %v14222_v24 = vld [vmem:[#allocation60_spill] sm:$0xff] }
 0x230   : > { %v2664_v26 = vadd.f32 %v14219_v46, %v14218_v52  ;;  %v9735_v23 = vpop.f32.mrf.mxu0  ;;  %v12528_v45 = vld [vmem:[#allocation3 + $0x79] sm:$0xff]  ;;  %v3056_v38 = vadd.f32 %v14220_v48, %v2661_v59  ;;  %v2271_v12 = vadd.f32 %v14222_v24, %v1877_v43  ;;  %v14225_v32 = vld [vmem:[#allocation27_spill] sm:$0xff]  ;;  %v14227_v52 = vld [vmem:[#allocation58_spill] sm:$0xff] }
 0x231   : > { %v12530_v50 = vld [vmem:[#allocation3 + $0x78] sm:$0xff]  ;;  %v12532_v55 = vld [vmem:[#allocation3 + $0x80] sm:$0xff]  ;;  %3996 = vst.msk [vmem:[#allocation3 + $0xa9] sm:$0xff] %vm223_vm0, %v3909_v10  ;;  %v3912_v30 = vmax.f32 %v3880_v20, 0.0  ;;  %v3879_v34 = vadd.f32 %v12304_v16, %v3840_v25  ;;  %v3843_v57 = vadd.f32 %v9735_v23, %v3449_v54  ;;  %9788 = vmatprep.mubr.msk.f32.mxu1 %vm223_vm0, %v12528_v45  ;;  %v3451_v54 = vadd.f32 %v12333_v33, %v3057_v3  ;;  %v14224_v20 = vld [vmem:[#allocation26_spill] sm:$0xff] }
 0x232   : > { %9852 = vmatprep.mubr.msk.f32.mxu0 %vm223_vm0, %v12530_v50  ;;  %v14221_v19 = vld [vmem:[#allocation57_spill] sm:$0xff]  ;;  %v3059_v59 = vadd.f32 %v14223_v58, %v2664_v26  ;;  %v3747_v41 = vpop.f32.mrf.mxu0  ;;  %9789 = vmatmul.mubr.msk.f32.gmra.mxu1 %vm223_vm0, %v12541_v14  ;;  %v1879_v25 = vadd.f32 %v14224_v20, %v1485_v9  ;;  %v1487_v43 = vadd.f32 %v14225_v32, %v12364_v29  ;;  %v14226_v1 = vld [vmem:[#allocation59_spill] sm:$0xff]  ;;  %v14230_v24 = vld [vmem:[#allocation64_spill] sm:$0xff] }
 0x233   : > { %v2663_v13 = vadd.f32 %v14221_v19, %v2269_v31  ;;  %9853 = vmatmul.mubr.msk.f32.gmra.mxu0 %vm223_vm0, %v12532_v55  ;;  %3999 = vst.msk [vmem:[#allocation3 + $0xc9] sm:$0xff] %vm223_vm0, %v3912_v30  ;;  %v3911_v6 = vmax.f32 %v3879_v34, 0.0  ;;  %v3882_v31 = vadd.f32 %v12304_v16, %v3843_v57  ;;  %v3842_v10 = vadd.f32 %v3747_v41, %v3448_v61  ;;  %v14228_v26 = vld [vmem:[#allocation97_spill] sm:$0xff]  ;;  %v14232_v20 = vld [vmem:[#allocation28_spill] sm:$0xff]  ;;  %v14234_v32 = vld [vmem:[#allocation63_spill] sm:$0xff] }
 0x234   : > { %v2666_v46 = vadd.f32 %v14227_v52, %v14226_v1  ;;  %v9738_v48 = vpop.f32.mrf.mxu0  ;;  %v12561_v19 = vld [vmem:[#allocation3 + $0x91] sm:$0xff]  ;;  %v3450_v30 = vadd.f32 %v12357_v5, %v3056_v38  ;;  %v12574_v34 = vld [vmem:[#allocation3 + $0x99] sm:$0xff]  ;;  %v2273_v58 = vadd.f32 %v14230_v24, %v1879_v25  ;;  %v3453_v5 = vadd.f32 %v12381_v56, %v3059_v59  ;;  %v12579_v38 = vpop.f32.mrf.mxu1  ;;  %v14235_v1 = vld [vmem:[#allocation62_spill] sm:$0xff] }
 0x235   : > { %v3058_v23 = vadd.f32 %v14228_v26, %v2663_v13  ;;  %v12563_v33 = vld [vmem:[#allocation3 + $0x90] sm:$0xff]  ;;  %v12565_v3 = vld [vmem:[#allocation3 + $0x98] sm:$0xff]  ;;  %3998 = vst.msk [vmem:[#allocation3 + $0xc1] sm:$0xff] %vm223_vm0, %v3911_v6  ;;  %v3914_v9 = vmax.f32 %v3882_v31, 0.0  ;;  %v3881_v61 = vadd.f32 %v12304_v16, %v3842_v10  ;;  %v3845_v29 = vadd.f32 %v9738_v48, %v3451_v54  ;;  %9791 = vmatprep.mubr.msk.f32.mxu1 %vm223_vm0, %v12561_v19  ;;  %v14229_v57 = vld [vmem:[#allocation61_spill] sm:$0xff] }
 0x236   : > { %9855 = vmatprep.mubr.msk.f32.mxu0 %vm223_vm0, %v12563_v33  ;;  %v2665_v13 = vadd.f32 %v14229_v57, %v2271_v12  ;;  %v3757_v41 = vpop.f32.mrf.mxu0  ;;  %9792 = vmatmul.mubr.msk.f32.gmra.mxu1 %vm223_vm0, %v12574_v34  ;;  %v14231_v54 = vld [vmem:[#allocation98_spill] sm:$0xff]  ;;  %v1881_v25 = vadd.f32 %v14232_v20, %v1487_v43  ;;  %v14233_v56 = vld [vmem:[#allocation29_spill] sm:$0xff]  ;;  %v2668_v52 = vadd.f32 %v14235_v1, %v14234_v32  ;;  %v14243_v1 = vld [vmem:[#allocation31_spill] sm:$0xff] }
 0x237   : > { %9856 = vmatmul.mubr.msk.f32.gmra.mxu0 %vm223_vm0, %v12565_v3  ;;  %v3061_v6 = vadd.f32 %v14231_v54, %v2666_v46  ;;  %4001 = vst.msk [vmem:[#allocation3 + $0xe1] sm:$0xff] %vm223_vm0, %v3914_v9  ;;  %v3913_v31 = vmax.f32 %v3881_v61, 0.0  ;;  %v3884_v12 = vadd.f32 %v12304_v16, %v3845_v29  ;;  %v3844_v10 = vadd.f32 %v3757_v41, %v3450_v30  ;;  %v14237_v61 = vld [vmem:[#allocation100_spill] sm:$0xff]  ;;  %v14241_v20 = vld [vmem:[#allocation101_spill] sm:$0xff] }
 0x238   : > { %v1489_v59 = vadd.f32 %v14233_v56, %v12376_v18  ;;  %v3452_v26 = vadd.f32 %v12413_v11, %v3058_v23  ;;  %v9741_v48 = vpop.f32.mrf.mxu0  ;;  %v12594_v57 = vld [vmem:[#allocation3 + $0xa9] sm:$0xff]  ;;  %v3060_v29 = vadd.f32 %v14237_v61, %v2665_v13  ;;  %v12607_v11 = vld [vmem:[#allocation3 + $0xb1] sm:$0xff]  ;;  %v14239_v23 = vld [vmem:[#allocation65_spill] sm:$0xff]  ;;  %v3063_v13 = vadd.f32 %v14241_v20, %v2668_v52  ;;  %v12612_v56 = vpop.f32.mrf.mxu1 }
 0x239   : > { %14236 = vst [vmem:[#allocation33_spill] sm:$0xff] %v12594_v57  ;;  %v12596_v46 = vld [vmem:[#allocation3 + $0xa8] sm:$0xff]  ;;  %v12598_v9 = vld [vmem:[#allocation3 + $0xb0] sm:$0xff]  ;;  %4000 = vst.msk [vmem:[#allocation3 + $0xd9] sm:$0xff] %vm223_vm0, %v3913_v31  ;;  %v3916_v43 = vmax.f32 %v3884_v12, 0.0  ;;  %v3883_v30 = vadd.f32 %v12304_v16, %v3844_v10  ;;  %v3847_v18 = vadd.f32 %v9741_v48, %v3453_v5  ;;  %9794 = vmatprep.mubr.msk.f32.mxu1 %vm223_vm0, %v12594_v57 }
 0x23a   : > { %9858 = vmatprep.mubr.msk.f32.mxu0 %vm223_vm0, %v12596_v46  ;;  %14238 = vst [vmem:[#allocation36_spill] sm:$0xff] %v12607_v11  ;;  %v2667_v24 = vadd.f32 %v14239_v23, %v2273_v58  ;;  %v14240_v41 = vld [vmem:[#allocation68_spill] sm:$0xff]  ;;  %v3767_v31 = vpop.f32.mrf.mxu0  ;;  %9795 = vmatmul.mubr.msk.f32.gmra.mxu1 %vm223_vm0, %v12607_v11  ;;  %v3455_v5 = vadd.f32 %v12447_v21, %v3061_v6  ;;  %v14244_v48 = vld [vmem:[#allocation67_spill] sm:$0xff]  ;;  %v14245_v61 = vld [vmem:[#allocation66_spill] sm:$0xff] }
 0x23b   : > { %v2275_v54 = vadd.f32 %v14240_v41, %v1881_v25  ;;  %9859 = vmatmul.mubr.msk.f32.gmra.mxu0 %vm223_vm0, %v12598_v9  ;;  %4003 = vst.msk [vmem:[#allocation3 + $0xf9] sm:$0xff] %vm223_vm0, %v3916_v43  ;;  %v3915_v12 = vmax.f32 %v3883_v30, 0.0  ;;  %v3886_v58 = vadd.f32 %v12304_v16, %v3847_v18  ;;  %v3846_v10 = vadd.f32 %v3767_v31, %v3452_v26  ;;  %v14242_v25 = vld [vmem:[#allocation30_spill] sm:$0xff]  ;;  %v14248_v18 = vld [vmem:[#allocation69_spill] sm:$0xff]  ;;  %v14249_v31 = vld [vmem:[#allocation72_spill] sm:$0xff] }
 0x23c   : > { %v1883_v32 = vadd.f32 %v14242_v25, %v1489_v59  ;;  %v1491_v52 = vadd.f32 %v14243_v1, %v12388_v36  ;;  %v2670_v23 = vadd.f32 %v14245_v61, %v14244_v48  ;;  %v14246_v41 = vld [vmem:[#allocation102_spill] sm:$0xff]  ;;  %v9744_v11 = vpop.f32.mrf.mxu0  ;;  %v12629_v21 = vld [vmem:[#allocation3 + $0xc0] sm:$0xff]  ;;  %v3454_v43 = vadd.f32 %v12480_v49, %v3060_v29  ;;  %v9689_v29 = vpop.f32.mrf.mxu1  ;;  %v14251_v1 = vld [vmem:[#allocation32_spill] sm:$0xff] }
 0x23d   : > { %v3062_v20 = vadd.f32 %v14246_v41, %v2667_v24  ;;  %v12627_v57 = vld [vmem:[#allocation3 + $0xc1] sm:$0xff]  ;;  %4002 = vst.msk [vmem:[#allocation3 + $0xf1] sm:$0xff] %vm223_vm0, %v3915_v12  ;;  %v3918_v59 = vmax.f32 %v3886_v58, 0.0  ;;  %v3885_v26 = vadd.f32 %v12304_v16, %v3846_v10  ;;  %v3849_v36 = vadd.f32 %v9744_v11, %v3455_v5  ;;  %9861 = vmatprep.mubr.msk.f32.mxu0 %vm223_vm0, %v12629_v21  ;;  %v12640_v30 = vld [vmem:[#allocation3 + $0xc9] sm:$0xff] }
 0x23e   : > { %v12631_v6 = vld [vmem:[#allocation3 + $0xc8] sm:$0xff]  ;;  %9797 = vmatprep.mubr.msk.f32.mxu1 %vm223_vm0, %v12627_v57  ;;  %14247 = vst [vmem:[#allocation79_spill] sm:$0xff] %v12640_v30  ;;  %v2669_v24 = vadd.f32 %v14248_v18, %v2275_v54  ;;  %v2277_v25 = vadd.f32 %v14249_v31, %v1883_v32  ;;  %v3457_v49 = vadd.f32 %v12513_v53, %v3063_v13  ;;  %v3777_v12 = vpop.f32.mrf.mxu0  ;;  %v14250_v11 = vld [vmem:[#allocation103_spill] sm:$0xff] }
 0x23f   : > { %9798 = vmatmul.mubr.msk.f32.gmra.mxu1 %vm223_vm0, %v12640_v30  ;;  %9862 = vmatmul.mubr.msk.f32.gmra.mxu0 %vm223_vm0, %v12631_v6  ;;  %v3065_v5 = vadd.f32 %v14250_v11, %v2670_v23  ;;  %4005 = vst.msk [vmem:[#allocation3 + $0x111] sm:$0xff] %vm223_vm0, %v3918_v59  ;;  %v3917_v58 = vmax.f32 %v3885_v26, 0.0  ;;  %v3888_v10 = vadd.f32 %v12304_v16, %v3849_v36  ;;  %v14252_v48 = vld [vmem:[#allocation71_spill] sm:$0xff]  ;;  %v14253_v53 = vld [vmem:[#allocation70_spill] sm:$0xff]  ;;  %v14254_v23 = vld [vmem:[#allocation104_spill] sm:$0xff] }
 0x240   : > { %v3848_v54 = vadd.f32 %v3777_v12, %v3454_v43  ;;  %v1885_v32 = vadd.f32 %v14251_v1, %v1491_v52  ;;  %v2672_v13 = vadd.f32 %v14253_v53, %v14252_v48  ;;  %v3456_v61 = vadd.f32 %v12546_v15, %v3062_v20  ;;  %v9747_v41 = vpop.f32.mrf.mxu0  ;;  %v12656_v18 = vld [vmem:[#allocation3 + $0xd9] sm:$0xff]  ;;  %v12669_v15 = vld [vmem:[#allocation3 + $0xe1] sm:$0xff]  ;;  %v3413_v1 = vpop.f32.mrf.mxu1  ;;  %v14257_v48 = vld [vmem:[#allocation75_spill] sm:$0xff] }
 0x241   : > { %v12658_v31 = vld [vmem:[#allocation3 + $0xd8] sm:$0xff]  ;;  %v12660_v30 = vld [vmem:[#allocation3 + $0xe0] sm:$0xff]  ;;  %v3064_v59 = vadd.f32 %v14254_v23, %v2669_v24  ;;  %4004 = vst.msk [vmem:[#allocation3 + $0x109] sm:$0xff] %vm223_vm0, %v3917_v58  ;;  %v3920_v26 = vmax.f32 %v3888_v10, 0.0  ;;  %v3851_v52 = vadd.f32 %v9747_v41, %v3457_v49  ;;  %9800 = vmatprep.mubr.msk.f32.mxu1 %vm223_vm0, %v12656_v18  ;;  %v3459_v49 = vadd.f32 %v12579_v38, %v3065_v5 }
 0x242   : > { %v3887_v43 = vadd.f32 %v12304_v16, %v3848_v54  ;;  %9864 = vmatprep.mubr.msk.f32.mxu0 %vm223_vm0, %v12658_v31  ;;  %v14255_v20 = vld [vmem:[#allocation73_spill] sm:$0xff]  ;;  %v14256_v12 = vld [vmem:[#allocation76_spill] sm:$0xff]  ;;  %v3067_v24 = vadd.f32 %v12263_v28, %v2672_v13  ;;  %v3787_v58 = vpop.f32.mrf.mxu0 }
 0x243   : > { %v2671_v36 = vadd.f32 %v14255_v20, %v2277_v25  ;;  %v2279_v11 = vadd.f32 %v14256_v12, %v1885_v32  ;;  %9801 = vmatmul.mubr.msk.f32.gmra.mxu1 %vm223_vm0, %v12669_v15  ;;  %9865 = vmatmul.mubr.msk.f32.gmra.mxu0 %vm223_vm0, %v12660_v30  ;;  %4007 = vst.msk [vmem:[#allocation3 + $0x129] sm:$0xff] %vm223_vm0, %v3920_v26  ;;  %v14258_v32 = vld [vmem:[#allocation74_spill] sm:$0xff]  ;;  %v14259_v28 = vld [vmem:[#allocation105_spill] sm:$0xff] }
 0x244   : > { %v3919_v10 = vmax.f32 %v3887_v43, 0.0  ;;  %v3890_v54 = vadd.f32 %v12304_v16, %v3851_v52  ;;  %v3850_v25 = vadd.f32 %v3787_v58, %v3456_v61  ;;  %v2674_v53 = vadd.f32 %v14258_v32, %v14257_v48  ;;  %v9750_v41 = vpop.f32.mrf.mxu0  ;;  %v12684_v23 = vld [vmem:[#allocation3 + $0xf1] sm:$0xff]  ;;  %v12697_v43 = vld [vmem:[#allocation3 + $0xf9] sm:$0xff]  ;;  %v9692_v48 = vpop.f32.mrf.mxu1 }
 0x245   : > { %v3066_v13 = vadd.f32 %v14259_v28, %v2671_v36  ;;  %v12686_v20 = vld [vmem:[#allocation3 + $0xf0] sm:$0xff]  ;;  %v12688_v12 = vld [vmem:[#allocation3 + $0xf8] sm:$0xff]  ;;  %v3458_v38 = vadd.f32 %v12612_v56, %v3064_v59  ;;  %v3853_v61 = vadd.f32 %v9750_v41, %v3459_v49  ;;  %9803 = vmatprep.mubr.msk.f32.mxu1 %vm223_vm0, %v12684_v23  ;;  %v14260_v52 = vld [vmem:[#allocation77_spill] sm:$0xff]  ;;  %v3461_v58 = vadd.f32 %v9689_v29, %v3067_v24 }
 0x246   : > { %4006 = vst.msk [vmem:[#allocation3 + $0x121] sm:$0xff] %vm223_vm0, %v3919_v10  ;;  %v3922_v5 = vmax.f32 %v3890_v54, 0.0  ;;  %v3889_v26 = vadd.f32 %v12304_v16, %v3850_v25  ;;  %9867 = vmatprep.mubr.msk.f32.mxu0 %vm223_vm0, %v12686_v20  ;;  %v2673_v36 = vadd.f32 %v14260_v52, %v2279_v11  ;;  %v3797_v32 = vpop.f32.mrf.mxu0  ;;  %v3069_v56 = vadd.f32 %v12278_v42, %v2674_v53 }
 0x247   : > { %9804 = vmatmul.mubr.msk.f32.gmra.mxu1 %vm223_vm0, %v12697_v43  ;;  %9868 = vmatmul.mubr.msk.f32.gmra.mxu0 %vm223_vm0, %v12688_v12  ;;  %v3892_v49 = vadd.f32 %v12304_v16, %v3853_v61  ;;  %v3852_v10 = vadd.f32 %v3797_v32, %v3458_v38  ;;  %v3460_v54 = vadd.f32 %v3413_v1, %v3066_v13  ;;  %v12720_v1 = vld [vmem:[#allocation3 + $0x111] sm:$0xff]  ;;  %v3423_v13 = vpop.f32.mrf.mxu1 }
 0x248   : > { %4009 = vst.msk [vmem:[#allocation3 + $0x141] sm:$0xff] %vm223_vm0, %v3922_v5  ;;  %v3921_v59 = vmax.f32 %v3889_v26, 0.0  ;;  %v9753_v25 = vpop.f32.mrf.mxu0  ;;  %v12707_v11 = vld [vmem:[#allocation3 + $0x109] sm:$0xff]  ;;  %v3068_v28 = vadd.f32 %v12286_v60, %v2673_v36  ;;  %v3463_v60 = vadd.f32 %v9692_v48, %v3069_v56 }
 0x249   : > { %v12709_v29 = vld [vmem:[#allocation3 + $0x108] sm:$0xff]  ;;  %v12711_v24 = vld [vmem:[#allocation3 + $0x110] sm:$0xff]  ;;  %v3924_v41 = vmax.f32 %v3892_v49, 0.0  ;;  %v3891_v42 = vadd.f32 %v12304_v16, %v3852_v10  ;;  %v3855_v53 = vadd.f32 %v9753_v25, %v3461_v58  ;;  %9806 = vmatprep.mubr.msk.f32.mxu1 %vm223_vm0, %v12707_v11 }
 0x24a   : > { %4008 = vst.msk [vmem:[#allocation3 + $0x139] sm:$0xff] %vm223_vm0, %v3921_v59  ;;  %9870 = vmatprep.mubr.msk.f32.mxu0 %vm223_vm0, %v12709_v29  ;;  %v3807_v38 = vpop.f32.mrf.mxu0  ;;  %v3462_v59 = vadd.f32 %v3423_v13, %v3068_v28  ;;  %v12740_v56 = vld [vmem:[#allocation3 + $0x129] sm:$0xff] }
 0x24b   : > { %9807 = vmatmul.mubr.msk.f32.gmra.mxu1 %vm223_vm0, %v12720_v1  ;;  %9871 = vmatmul.mubr.msk.f32.gmra.mxu0 %vm223_vm0, %v12711_v24  ;;  %4011 = vst.msk [vmem:[#allocation3 + $0x159] sm:$0xff] %vm223_vm0, %v3924_v41  ;;  %v3923_v5 = vmax.f32 %v3891_v42, 0.0  ;;  %v3894_v26 = vadd.f32 %v12304_v16, %v3855_v53  ;;  %v3854_v61 = vadd.f32 %v3807_v38, %v3460_v54 }
 0x24c   : > { %v9756_v52 = vpop.f32.mrf.mxu0 }
 0x24d   : > { %v12728_v36 = vld [vmem:[#allocation3 + $0x121] sm:$0xff]  ;;  %4010 = vst.msk [vmem:[#allocation3 + $0x151] sm:$0xff] %vm223_vm0, %v3923_v5  ;;  %v3926_v49 = vmax.f32 %v3894_v26, 0.0  ;;  %v3893_v10 = vadd.f32 %v12304_v16, %v3854_v61  ;;  %v3857_v48 = vadd.f32 %v9756_v52, %v3463_v60 }
 0x24e   : > { %v12730_v58 = vld [vmem:[#allocation3 + $0x120] sm:$0xff]  ;;  %v12732_v32 = vld [vmem:[#allocation3 + $0x128] sm:$0xff]  ;;  %9809 = vmatprep.mubr.msk.f32.mxu1 %vm223_vm0, %v12728_v36  ;;  %v3817_v54 = vpop.f32.mrf.mxu0 }
 0x24f   : > { %9873 = vmatprep.mubr.msk.f32.mxu0 %vm223_vm0, %v12730_v58  ;;  %9810 = vmatmul.mubr.msk.f32.gmra.mxu1 %vm223_vm0, %v12740_v56  ;;  %4013 = vst.msk [vmem:[#allocation3 + $0x171] sm:$0xff] %vm223_vm0, %v3926_v49  ;;  %v3925_v25 = vmax.f32 %v3893_v10, 0.0  ;;  %v3896_v28 = vadd.f32 %v12304_v16, %v3857_v48  ;;  %v3856_v41 = vadd.f32 %v3817_v54, %v3462_v59  ;;  %v12760_v5 = vld [vmem:[#allocation3 + $0x141] sm:$0xff] }
 0x250   : > { %9874 = vmatmul.mubr.msk.f32.gmra.mxu0 %vm223_vm0, %v12732_v32  ;;  %v4739_v49 = vld [vmem:[#allocation3 + $0x2] sm:$0xff] }
 0x251   : > { %v12748_v42 = vld [vmem:[#allocation3 + $0x139] sm:$0xff]  ;;  %4012 = vst.msk [vmem:[#allocation3 + $0x169] sm:$0xff] %vm223_vm0, %v3925_v25  ;;  %v3928_v38 = vmax.f32 %v3896_v28, 0.0  ;;  %v3895_v60 = vadd.f32 %v12304_v16, %v3856_v41  ;;  %v4740_v28 = vld [vmem:[#allocation3 + $0xa] sm:$0xff] }
 0x252   : > { %v12750_v53 = vld [vmem:[#allocation3 + $0x138] sm:$0xff]  ;;  %v12752_v13 = vld [vmem:[#allocation3 + $0x140] sm:$0xff]  ;;  %9812 = vmatprep.mubr.msk.f32.mxu1 %vm223_vm0, %v12748_v42 }
 0x253   : > { %9876 = vmatprep.mubr.msk.f32.mxu0 %vm223_vm0, %v12750_v53  ;;  %9813 = vmatmul.mubr.msk.f32.gmra.mxu1 %vm223_vm0, %v12760_v5  ;;  %4015 = vst.msk [vmem:[#allocation3 + $0x189] sm:$0xff] %vm223_vm0, %v3928_v38  ;;  %v3927_v26 = vmax.f32 %v3895_v60, 0.0  ;;  %v12778_v59 = vld [vmem:[#allocation3 + $0x159] sm:$0xff] }
 0x254   : > { %9877 = vmatmul.mubr.msk.f32.gmra.mxu0 %vm223_vm0, %v12752_v13  ;;  %v12767_v61 = vld [vmem:[#allocation3 + $0x151] sm:$0xff]  ;;  %v12806_v60 = vld [vmem:[#allocation3 + $0x1a] sm:$0xff] }
 0x255   : > { %v12769_v16 = vld [vmem:[#allocation3 + $0x150] sm:$0xff]  ;;  %v12771_v52 = vld [vmem:[#allocation3 + $0x158] sm:$0xff]  ;;  %4014 = vst.msk [vmem:[#allocation3 + $0x181] sm:$0xff] %vm223_vm0, %v3927_v26  ;;  %9815 = vmatprep.mubr.msk.f32.mxu1 %vm223_vm0, %v12767_v61  ;;  %v8259_v26 = vld [vmem:[%s14045_s3 + $0x130] sm:$0xff] }
 0x256   : > { %9879 = vmatprep.mubr.msk.f32.mxu0 %vm223_vm0, %v12769_v16  ;;  %v12794_v25 = vld [vmem:[#allocation3 + $0x171] sm:$0xff] }
 0x257   : > { %9816 = vmatmul.mubr.msk.f32.gmra.mxu1 %vm223_vm0, %v12778_v59  ;;  %14261 = vst [vmem:[#allocation82_spill] sm:$0xff] %v12794_v25 }
 0x258   : > { %9880 = vmatmul.mubr.msk.f32.gmra.mxu0 %vm223_vm0, %v12771_v52  ;;  %v12784_v10 = vld [vmem:[#allocation3 + $0x169] sm:$0xff] }
 0x259   : > { %v12786_v48 = vld [vmem:[#allocation3 + $0x168] sm:$0xff]  ;;  %v12788_v54 = vld [vmem:[#allocation3 + $0x170] sm:$0xff]  ;;  %9818 = vmatprep.mubr.msk.f32.mxu1 %vm223_vm0, %v12784_v10 }
 0x25a   : > { %9882 = vmatprep.mubr.msk.f32.mxu0 %vm223_vm0, %v12786_v48  ;;  %v9775_v41 = vpop.f32.mrf.mxu1 }
 0x25b   : > { %9819 = vmatmul.mubr.msk.f32.gmra.mxu1 %vm223_vm0, %v12794_v25  ;;  %v9839_v38 = vpop.f32.mrf.mxu0 }
 0x25c   : > { %9883 = vmatmul.mubr.msk.f32.gmra.mxu0 %vm223_vm0, %v12788_v54  ;;  %9901 = vmatprep.mubr.msk.f32.mxu1 %vm223_vm0, %v4739_v49  ;;  %v12814_v25 = vadd.f32 %v9839_v38, %v9775_v41  ;;  %v14262_v49 = vld [vmem:[#allocation78_spill] sm:$0xff]  ;;  %v12840_v41 = vld [vmem:[#allocation3 + $0x3a] sm:$0xff]  ;;  %v8257_v38 = vld [vmem:[%s14045_s3 + $0x120] sm:$0xff] }
 0x25d   : > { %9965 = vmatprep.mubr.msk.f32.mxu0 %vm223_vm0, %v12397_v35  ;;  %v8299_v35 = vld [vmem:[%s14045_s3 + $0x170] sm:$0xff] }
 0x25f   : > { %9902 = vmatmul.mubr.msk.f32.vlgmr.msra.gmra.mxu1 %vm223_vm0, %v4740_v28  ;;  %v12828_v28 = vld [vmem:[#allocation3 + $0x32] sm:$0xff] }
 0x260   : > { %9966 = vmatmul.mubr.msk.f32.vlgmr.msra.gmra.mxu0 %vm223_vm0, %v12399_v0  ;;  %9904 = vmatprep.mubr.msk.f32.mxu1 %vm223_vm0, %v12806_v60  ;;  %v12822_v0 = vld [vmem:[#allocation3 + $0x22] sm:$0xff] }
 0x261   : > { %9968 = vmatprep.mubr.msk.f32.mxu0 %vm223_vm0, %v12431_v51  ;;  %10014 = vmatpush3.msra.mxu1 %v14262_v49  ;;  %v8258_v51 = vld [vmem:[%s14045_s3 + $0x128] sm:$0xff]  ;;  %v12876_v49 = vld [vmem:[#allocation3 + $0x6a] sm:$0xff] }
 0x262   : > { %10078 = vmatpush3.msra.mxu0 %v12291_v17  ;;  %10015 = vmatprep.subr.mxu1 %v8259_v26  ;;  %v8298_v17 = vld [vmem:[%s14045_s3 + $0x168] sm:$0xff] }
 0x263   : > { %10079 = vmatprep.subr.mxu0 %v8299_v35  ;;  %9905 = vmatmul.mubr.msk.f32.gmra.mxu1 %vm223_vm0, %v12822_v0 }
 0x264   : > { %9969 = vmatmul.mubr.msk.f32.gmra.mxu0 %vm223_vm0, %v12433_v2  ;;  %9907 = vmatprep.mubr.msk.f32.mxu1 %vm223_vm0, %v12828_v28  ;;  %v12846_v2 = vld [vmem:[#allocation3 + $0x4a] sm:$0xff] }
 0x265   : > { %9971 = vmatprep.mubr.msk.f32.mxu0 %vm223_vm0, %v12464_v44  ;;  %10016 = vmatpush3.msra.mxu1 %v8259_v26  ;;  %v8297_v44 = vld [vmem:[%s14045_s3 + $0x160] sm:$0xff] }
 0x266   : > { %10080 = vmatpush3.msra.mxu0 %v8299_v35  ;;  %10017 = vmatprep.subr.mxu1 %v8258_v51  ;;  %v12858_v26 = vld [vmem:[#allocation3 + $0x52] sm:$0xff]  ;;  %v8256_v35 = vld [vmem:[%s14045_s3 + $0x118] sm:$0xff] }
 0x267   : > { %10081 = vmatprep.subr.mxu0 %v8298_v17  ;;  %9908 = vmatmul.mubr.msk.f32.gmra.mxu1 %vm223_vm0, %v12840_v41 }
 0x268   : > { %9972 = vmatmul.mubr.msk.f32.gmra.mxu0 %vm223_vm0, %v12466_v40  ;;  %9910 = vmatprep.mubr.msk.f32.mxu1 %vm223_vm0, %v12846_v2  ;;  %v12864_v40 = vld [vmem:[#allocation3 + $0x62] sm:$0xff] }
 0x269   : > { %9974 = vmatprep.mubr.msk.f32.mxu0 %vm223_vm0, %v12497_v62  ;;  %10018 = vmatpush3.msra.mxu1 %v8258_v51  ;;  %v8296_v62 = vld [vmem:[%s14045_s3 + $0x158] sm:$0xff]  ;;  %v8255_v51 = vld [vmem:[%s14045_s3 + $0x110] sm:$0xff] }
 0x26a   : > { %10082 = vmatpush3.msra.mxu0 %v8298_v17  ;;  %10019 = vmatprep.subr.mxu1 %v8257_v38  ;;  %v12894_v17 = vld [vmem:[#allocation3 + $0x82] sm:$0xff] }
 0x26b   : > { %10083 = vmatprep.subr.mxu0 %v8297_v44  ;;  %9911 = vmatmul.mubr.msk.f32.gmra.mxu1 %vm223_vm0, %v12858_v26 }
 0x26c   : > { %9975 = vmatmul.mubr.msk.f32.gmra.mxu0 %vm223_vm0, %v12499_v22  ;;  %9913 = vmatprep.mubr.msk.f32.mxu1 %vm223_vm0, %v12864_v40  ;;  %v12882_v22 = vld [vmem:[#allocation3 + $0x7a] sm:$0xff] }
 0x26d   : > { %9977 = vmatprep.mubr.msk.f32.mxu0 %vm223_vm0, %v12530_v50  ;;  %10020 = vmatpush3.msra.mxu1 %v8257_v38  ;;  %v8295_v50 = vld [vmem:[%s14045_s3 + $0x150] sm:$0xff]  ;;  %v8254_v38 = vld [vmem:[%s14045_s3 + $0x108] sm:$0xff] }
 0x26e   : > { %10084 = vmatpush3.msra.mxu0 %v8297_v44  ;;  %10021 = vmatprep.subr.mxu1 %v8256_v35  ;;  %v12912_v44 = vld [vmem:[#allocation3 + $0x9a] sm:$0xff] }
 0x26f   : > { %10085 = vmatprep.subr.mxu0 %v8296_v62  ;;  %9914 = vmatmul.mubr.msk.f32.gmra.mxu1 %vm223_vm0, %v12876_v49 }
 0x270   : > { %9978 = vmatmul.mubr.msk.f32.gmra.mxu0 %vm223_vm0, %v12532_v55  ;;  %9916 = vmatprep.mubr.msk.f32.mxu1 %vm223_vm0, %v12882_v22  ;;  %v12900_v55 = vld [vmem:[#allocation3 + $0x92] sm:$0xff] }
 0x271   : > { %9980 = vmatprep.mubr.msk.f32.mxu0 %vm223_vm0, %v12563_v33  ;;  %10022 = vmatpush3.msra.mxu1 %v8256_v35  ;;  %v8294_v33 = vld [vmem:[%s14045_s3 + $0x148] sm:$0xff]  ;;  %v8253_v35 = vld [vmem:[%s14045_s3 + $0x100] sm:$0xff] }
 0x272   : > { %10086 = vmatpush3.msra.mxu0 %v8296_v62  ;;  %10023 = vmatprep.subr.mxu1 %v8255_v51  ;;  %v12930_v62 = vld [vmem:[#allocation3 + $0xb2] sm:$0xff] }
 0x273   : > { %10087 = vmatprep.subr.mxu0 %v8295_v50  ;;  %9917 = vmatmul.mubr.msk.f32.gmra.mxu1 %vm223_vm0, %v12894_v17 }
 0x274   : > { %9981 = vmatmul.mubr.msk.f32.gmra.mxu0 %vm223_vm0, %v12565_v3  ;;  %9919 = vmatprep.mubr.msk.f32.mxu1 %vm223_vm0, %v12900_v55  ;;  %v12918_v3 = vld [vmem:[#allocation3 + $0xaa] sm:$0xff] }
 0x275   : > { %9983 = vmatprep.mubr.msk.f32.mxu0 %vm223_vm0, %v12596_v46  ;;  %10024 = vmatpush3.msra.mxu1 %v8255_v51  ;;  %v8293_v46 = vld [vmem:[%s14045_s3 + $0x140] sm:$0xff]  ;;  %v12941_v51 = vld [vmem:[%s14045_s3 + $0x1b8] sm:$0xff] }
 0x276   : > { %10088 = vmatpush3.msra.mxu0 %v8295_v50  ;;  %10025 = vmatprep.subr.mxu1 %v8254_v38  ;;  %v12957_v50 = vld [vmem:[#allocation3 + $0xda] sm:$0xff] }
 0x277   : > { %10089 = vmatprep.subr.mxu0 %v8294_v33  ;;  %9920 = vmatmul.mubr.msk.f32.gmra.mxu1 %vm223_vm0, %v12912_v44 }
 0x278   : > { %9984 = vmatmul.mubr.msk.f32.gmra.mxu0 %vm223_vm0, %v12598_v9  ;;  %9922 = vmatprep.mubr.msk.f32.mxu1 %vm223_vm0, %v12918_v3  ;;  %v12936_v9 = vld [vmem:[#allocation3 + $0xc2] sm:$0xff] }
 0x279   : > { %9986 = vmatprep.mubr.msk.f32.mxu0 %vm223_vm0, %v12629_v21  ;;  %10026 = vmatpush3.msra.mxu1 %v8254_v38  ;;  %v8380_v21 = vld [vmem:[%s14045_s3 + $0x1f8] sm:$0xff]  ;;  %v12969_v38 = vld [vmem:[#allocation3 + $0xf2] sm:$0xff] }
 0x27a   : > { %10090 = vmatpush3.msra.mxu0 %v8294_v33  ;;  %10027 = vmatprep.subr.mxu1 %v8253_v35  ;;  %v13031_v33 = vld [vmem:[#allocation3 + $0x180] sm:$0xff] }
 0x27b   : > { %10091 = vmatprep.subr.mxu0 %v8293_v46  ;;  %9923 = vmatmul.mubr.msk.f32.gmra.mxu1 %vm223_vm0, %v12930_v62 }
 0x27c   : > { %9987 = vmatmul.mubr.msk.f32.gmra.mxu0 %vm223_vm0, %v12631_v6  ;;  %9925 = vmatprep.mubr.msk.f32.mxu1 %vm223_vm0, %v12936_v9  ;;  %v12950_v6 = vld [vmem:[#allocation3 + $0xca] sm:$0xff] }
 0x27d   : > { %9989 = vmatprep.mubr.msk.f32.mxu0 %vm223_vm0, %v12658_v31  ;;  %10028 = vmatpush3.msra.mxu1 %v8253_v35  ;;  %v12963_v31 = vld [vmem:[#allocation3 + $0xe2] sm:$0xff] }
 0x27e   : > { %10092 = vmatpush3.msra.mxu0 %v8293_v46  ;;  %10141 = vmatprep.subr.mxu1 %v12941_v51  ;;  %v8379_v35 = vld [vmem:[%s14045_s3 + $0x1f0] sm:$0xff] }
 0x27f   : > { %10205 = vmatprep.subr.mxu0 %v8380_v21  ;;  %9926 = vmatmul.mubr.msk.f32.gmra.mxu1 %vm223_vm0, %v12950_v6 }
 0x280   : > { %9990 = vmatmul.mubr.msk.f32.gmra.mxu0 %vm223_vm0, %v12660_v30  ;;  %9928 = vmatprep.mubr.msk.f32.mxu1 %vm223_vm0, %v12957_v50  ;;  %v12975_v30 = vld [vmem:[#allocation3 + $0xfa] sm:$0xff] }
 0x281   : > { %9992 = vmatprep.mubr.msk.f32.mxu0 %vm223_vm0, %v12686_v20  ;;  %v12981_v20 = vld [vmem:[#allocation3 + $0x10a] sm:$0xff] }
 0x283   : > { %9929 = vmatmul.mubr.msk.f32.gmra.mxu1 %vm223_vm0, %v12963_v31 }
 0x284   : > { %9993 = vmatmul.mubr.msk.f32.gmra.mxu0 %vm223_vm0, %v12688_v12  ;;  %9931 = vmatprep.mubr.msk.f32.mxu1 %vm223_vm0, %v12969_v38  ;;  %v12987_v12 = vld [vmem:[#allocation3 + $0x112] sm:$0xff] }
 0x285   : > { %9995 = vmatprep.mubr.msk.f32.mxu0 %vm223_vm0, %v12709_v29  ;;  %v12993_v29 = vld [vmem:[#allocation3 + $0x122] sm:$0xff] }
 0x287   : > { %9932 = vmatmul.mubr.msk.f32.gmra.mxu1 %vm223_vm0, %v12975_v30 }
 0x288   : > { %9996 = vmatmul.mubr.msk.f32.gmra.mxu0 %vm223_vm0, %v12711_v24  ;;  %9934 = vmatprep.mubr.msk.f32.mxu1 %vm223_vm0, %v12981_v20  ;;  %v12999_v24 = vld [vmem:[#allocation3 + $0x12a] sm:$0xff] }
 0x289   : > { %9998 = vmatprep.mubr.msk.f32.mxu0 %vm223_vm0, %v12730_v58  ;;  %v13005_v58 = vld [vmem:[#allocation3 + $0x13a] sm:$0xff] }
 0x28b   : > { %9935 = vmatmul.mubr.msk.f32.gmra.mxu1 %vm223_vm0, %v12987_v12 }
 0x28c   : > { %9999 = vmatmul.mubr.msk.f32.gmra.mxu0 %vm223_vm0, %v12732_v32  ;;  %9937 = vmatprep.mubr.msk.f32.mxu1 %vm223_vm0, %v12993_v29  ;;  %v13011_v32 = vld [vmem:[#allocation3 + $0x142] sm:$0xff] }
 0x28d   : > { %10001 = vmatprep.mubr.msk.f32.mxu0 %vm223_vm0, %v12750_v53  ;;  %v13017_v53 = vld [vmem:[#allocation3 + $0x152] sm:$0xff] }
 0x28f   : > { %9938 = vmatmul.mubr.msk.f32.gmra.mxu1 %vm223_vm0, %v12999_v24 }
 0x290   : > { %10002 = vmatmul.mubr.msk.f32.gmra.mxu0 %vm223_vm0, %v12752_v13  ;;  %9940 = vmatprep.mubr.msk.f32.mxu1 %vm223_vm0, %v13005_v58  ;;  %v13023_v13 = vld [vmem:[#allocation3 + $0x15a] sm:$0xff] }
 0x291   : > { %10004 = vmatprep.mubr.msk.f32.mxu0 %vm223_vm0, %v12769_v16  ;;  %v13029_v16 = vld [vmem:[#allocation3 + $0x16a] sm:$0xff] }
 0x293   : > { %9941 = vmatmul.mubr.msk.f32.gmra.mxu1 %vm223_vm0, %v13011_v32 }
 0x294   : > { %10005 = vmatmul.mubr.msk.f32.gmra.mxu0 %vm223_vm0, %v12771_v52  ;;  %9943 = vmatprep.mubr.msk.f32.mxu1 %vm223_vm0, %v13017_v53  ;;  %v13037_v52 = vld [vmem:[#allocation3 + $0x172] sm:$0xff] }
 0x295   : > { %10007 = vmatprep.mubr.msk.f32.mxu0 %vm223_vm0, %v12786_v48  ;;  %v13039_v48 = vld [vmem:[#allocation3 + $0x188] sm:$0xff] }
 0x297   : > { %9944 = vmatmul.mubr.msk.f32.gmra.mxu1 %vm223_vm0, %v13023_v13 }
 0x298   : > { %10008 = vmatmul.mubr.msk.f32.gmra.mxu0 %vm223_vm0, %v12788_v54  ;;  %9946 = vmatprep.mubr.msk.f32.mxu1 %vm223_vm0, %v13029_v16  ;;  %v8339_v54 = vld [vmem:[%s14045_s3 + $0x1b0] sm:$0xff] }
 0x299   : > { %10010 = vmatprep.mubr.msk.f32.mxu0 %vm223_vm0, %v13031_v33 }
 0x29b   : > { %9947 = vmatmul.mubr.msk.f32.gmra.mxu1 %vm223_vm0, %v13037_v52 }
 0x29c   : > { %10011 = vmatmul.mubr.msk.f32.gmra.mxu0 %vm223_vm0, %v13039_v48  ;;  %10029 = vmatprep.mubr.msk.f32.mxu1 %vm223_vm0, %v12395_v7  ;;  %v8338_v7 = vld [vmem:[%s14045_s3 + $0x1a8] sm:$0xff] }
 0x29d   : > { %10093 = vmatprep.mubr.msk.f32.mxu0 %vm223_vm0, %v12806_v60  ;;  %v8333_v60 = vld [vmem:[%s14045_s3 + $0x180] sm:$0xff] }
 0x29f   : > { %10030 = vmatmul.mubr.msk.f32.vlgmr.msra.gmra.mxu1 %vm223_vm0, %v12408_v37  ;;  %v8378_v37 = vld [vmem:[%s14045_s3 + $0x1e8] sm:$0xff] }
 0x2a0   : > { %10094 = vmatmul.mubr.msk.f32.vlgmr.msra.gmra.mxu0 %vm223_vm0, %v12822_v0  ;;  %10032 = vmatprep.mubr.msk.f32.mxu1 %vm223_vm0, %v12429_v63  ;;  %v8337_v63 = vld [vmem:[%s14045_s3 + $0x1a0] sm:$0xff] }
 0x2a1   : > { %10096 = vmatprep.mubr.msk.f32.mxu0 %vm223_vm0, %v12828_v28  ;;  %10142 = vmatpush3.msra.mxu1 %v12941_v51  ;;  %v8373_v0 = vld [vmem:[%s14045_s3 + $0x1c0] sm:$0xff] }
 0x2a2   : > { %10206 = vmatpush3.msra.mxu0 %v8380_v21  ;;  %10143 = vmatprep.subr.mxu1 %v8339_v54  ;;  %v14265_v28 = vld [vmem:[#allocation79_spill] sm:$0xff] }
 0x2a3   : > { %10207 = vmatprep.subr.mxu0 %v8379_v35  ;;  %10033 = vmatmul.mubr.msk.f32.gmra.mxu1 %vm223_vm0, %v12442_v4  ;;  %v8377_v4 = vld [vmem:[%s14045_s3 + $0x1e0] sm:$0xff] }
 0x2a4   : > { %10097 = vmatmul.mubr.msk.f32.gmra.mxu0 %vm223_vm0, %v12840_v41  ;;  %10035 = vmatprep.mubr.msk.f32.mxu1 %vm223_vm0, %v12462_v8  ;;  %v8336_v8 = vld [vmem:[%s14045_s3 + $0x198] sm:$0xff] }
 0x2a5   : > { %10099 = vmatprep.mubr.msk.f32.mxu0 %vm223_vm0, %v12846_v2  ;;  %10144 = vmatpush3.msra.mxu1 %v8339_v54  ;;  %v8420_v41 = vld [vmem:[%s14045_s3 + $0x238] sm:$0xff]  ;;  %v6319_v2 = vld [vmem:[#allocation3 + $0x50] sm:$0xff] }
 0x2a6   : > { %10208 = vmatpush3.msra.mxu0 %v8379_v35  ;;  %10145 = vmatprep.subr.mxu1 %v8338_v7  ;;  %v6715_v51 = vld [vmem:[#allocation3 + $0x69] sm:$0xff] }
 0x2a7   : > { %10209 = vmatprep.subr.mxu0 %v8378_v37  ;;  %10036 = vmatmul.mubr.msk.f32.gmra.mxu1 %vm223_vm0, %v12475_v47  ;;  %v8376_v47 = vld [vmem:[%s14045_s3 + $0x1d8] sm:$0xff] }
 0x2a8   : > { %10100 = vmatmul.mubr.msk.f32.gmra.mxu0 %vm223_vm0, %v12858_v26  ;;  %10038 = vmatprep.mubr.msk.f32.mxu1 %vm223_vm0, %v12495_v39  ;;  %v8335_v39 = vld [vmem:[%s14045_s3 + $0x190] sm:$0xff]  ;;  %v6713_v26 = vld [vmem:[#allocation3 + $0x51] sm:$0xff] }
 0x2a9   : > { %10102 = vmatprep.mubr.msk.f32.mxu0 %vm223_vm0, %v12864_v40  ;;  %10146 = vmatpush3.msra.mxu1 %v8338_v7 }
 0x2aa   : > { %10210 = vmatpush3.msra.mxu0 %v8378_v37  ;;  %10147 = vmatprep.subr.mxu1 %v8337_v63 }
 0x2ab   : > { %10211 = vmatprep.subr.mxu0 %v8377_v4  ;;  %10039 = vmatmul.mubr.msk.f32.gmra.mxu1 %vm223_vm0, %v12508_v27  ;;  %v8375_v27 = vld [vmem:[%s14045_s3 + $0x1d0] sm:$0xff] }
 0x2ac   : > { %10103 = vmatmul.mubr.msk.f32.gmra.mxu0 %vm223_vm0, %v12876_v49  ;;  %10041 = vmatprep.mubr.msk.f32.mxu1 %vm223_vm0, %v12528_v45  ;;  %v8334_v45 = vld [vmem:[%s14045_s3 + $0x188] sm:$0xff] }
 0x2ad   : > { %10105 = vmatprep.mubr.msk.f32.mxu0 %vm223_vm0, %v12882_v22  ;;  %10148 = vmatpush3.msra.mxu1 %v8337_v63  ;;  %v6320_v22 = vld [vmem:[#allocation3 + $0x60] sm:$0xff]  ;;  %v6325_v63 = vld [vmem:[#allocation3 + $0x98] sm:$0xff] }
 0x2ae   : > { %10212 = vmatpush3.msra.mxu0 %v8377_v4  ;;  %10149 = vmatprep.subr.mxu1 %v8336_v8  ;;  %v6719_v4 = vld [vmem:[#allocation3 + $0x99] sm:$0xff] }
 0x2af   : > { %10213 = vmatprep.subr.mxu0 %v8376_v47  ;;  %10042 = vmatmul.mubr.msk.f32.gmra.mxu1 %vm223_vm0, %v12541_v14  ;;  %v8374_v14 = vld [vmem:[%s14045_s3 + $0x1c8] sm:$0xff] }
 0x2b0   : > { %10106 = vmatmul.mubr.msk.f32.gmra.mxu0 %vm223_vm0, %v12894_v17  ;;  %10044 = vmatprep.mubr.msk.f32.mxu1 %vm223_vm0, %v12561_v19  ;;  %v14263_v19 = vld [vmem:[#allocation33_spill] sm:$0xff] }
 0x2b1   : > { %10108 = vmatprep.mubr.msk.f32.mxu0 %vm223_vm0, %v12900_v55  ;;  %10150 = vmatpush3.msra.mxu1 %v8336_v8  ;;  %v6714_v17 = vld [vmem:[#allocation3 + $0x61] sm:$0xff]  ;;  %v8418_v55 = vld [vmem:[%s14045_s3 + $0x228] sm:$0xff] }
 0x2b2   : > { %10214 = vmatpush3.msra.mxu0 %v8376_v47  ;;  %10151 = vmatprep.subr.mxu1 %v8335_v39 }
 0x2b3   : > { %10215 = vmatprep.subr.mxu0 %v8375_v27  ;;  %10045 = vmatmul.mubr.msk.f32.gmra.mxu1 %vm223_vm0, %v12574_v34  ;;  %v14264_v34 = vld [vmem:[#allocation36_spill] sm:$0xff] }
 0x2b4   : > { %10109 = vmatmul.mubr.msk.f32.gmra.mxu0 %vm223_vm0, %v12912_v44  ;;  %10047 = vmatprep.mubr.msk.f32.mxu1 %vm223_vm0, %v14263_v19 }
 0x2b5   : > { %10111 = vmatprep.mubr.msk.f32.mxu0 %vm223_vm0, %v12918_v3  ;;  %10152 = vmatpush3.msra.mxu1 %v8335_v39  ;;  %v6326_v39 = vld [vmem:[#allocation3 + $0xa8] sm:$0xff] }
 0x2b6   : > { %10216 = vmatpush3.msra.mxu0 %v8375_v27  ;;  %10153 = vmatprep.subr.mxu1 %v8334_v45  ;;  %v6720_v27 = vld [vmem:[#allocation3 + $0xa9] sm:$0xff] }
 0x2b7   : > { %10217 = vmatprep.subr.mxu0 %v8374_v14  ;;  %10048 = vmatmul.mubr.msk.f32.gmra.mxu1 %vm223_vm0, %v14264_v34 }
 0x2b8   : > { %10112 = vmatmul.mubr.msk.f32.gmra.mxu0 %vm223_vm0, %v12930_v62  ;;  %10050 = vmatprep.mubr.msk.f32.mxu1 %vm223_vm0, %v12627_v57  ;;  %v14266_v57 = vld [vmem:[#allocation82_spill] sm:$0xff] }
 0x2b9   : > { %10114 = vmatprep.mubr.msk.f32.mxu0 %vm223_vm0, %v12936_v9  ;;  %10154 = vmatpush3.msra.mxu1 %v8334_v45  ;;  %v6321_v9 = vld [vmem:[#allocation3 + $0x68] sm:$0xff]  ;;  %v8415_v45 = vld [vmem:[%s14045_s3 + $0x210] sm:$0xff] }
 0x2ba   : > { %10218 = vmatpush3.msra.mxu0 %v8374_v14  ;;  %10155 = vmatprep.subr.mxu1 %v8333_v60 }
 0x2bb   : > { %10219 = vmatprep.subr.mxu0 %v8373_v0  ;;  %10051 = vmatmul.mubr.msk.f32.gmra.mxu1 %vm223_vm0, %v14265_v28  ;;  %v6721_v28 = vld [vmem:[#allocation3 + $0xb1] sm:$0xff] }
 0x2bc   : > { %10115 = vmatmul.mubr.msk.f32.gmra.mxu0 %vm223_vm0, %v12950_v6  ;;  %10053 = vmatprep.mubr.msk.f32.mxu1 %vm223_vm0, %v12656_v18  ;;  %v13211_v18 = vld [vmem:[#allocation3 + $0x181] sm:$0xff] }
 0x2bd   : > { %10117 = vmatprep.mubr.msk.f32.mxu0 %vm223_vm0, %v12957_v50  ;;  %10156 = vmatpush3.msra.mxu1 %v8333_v60  ;;  %v6322_v50 = vld [vmem:[#allocation3 + $0x78] sm:$0xff] }
 0x2be   : > { %10220 = vmatpush3.msra.mxu0 %v8373_v0  ;;  %10269 = vmatprep.subr.mxu1 %v8420_v41  ;;  %v6327_v0 = vld [vmem:[#allocation3 + $0xb0] sm:$0xff] }
 0x2bf   : > { %10054 = vmatmul.mubr.msk.f32.gmra.mxu1 %vm223_vm0, %v12669_v15  ;;  %v13213_v15 = vld [vmem:[#allocation3 + $0x182] sm:$0xff] }
 0x2c0   : > { %10118 = vmatmul.mubr.msk.f32.gmra.mxu0 %vm223_vm0, %v12963_v31  ;;  %10056 = vmatprep.mubr.msk.f32.mxu1 %vm223_vm0, %v12684_v23  ;;  %v13219_v23 = vld [vmem:[#allocation3 + $0x189] sm:$0xff]  ;;  %v6716_v31 = vld [vmem:[#allocation3 + $0x79] sm:$0xff] }
 0x2c1   : > { %10120 = vmatprep.mubr.msk.f32.mxu0 %vm223_vm0, %v12969_v38  ;;  %v8417_v38 = vld [vmem:[%s14045_s3 + $0x220] sm:$0xff] }
 0x2c3   : > { %10057 = vmatmul.mubr.msk.f32.gmra.mxu1 %vm223_vm0, %v12697_v43  ;;  %v13221_v43 = vld [vmem:[#allocation3 + $0x18a] sm:$0xff] }
 0x2c4   : > { %10121 = vmatmul.mubr.msk.f32.gmra.mxu0 %vm223_vm0, %v12975_v30  ;;  %10059 = vmatprep.mubr.msk.f32.mxu1 %vm223_vm0, %v12707_v11  ;;  %v6316_v11 = vld [vmem:[#allocation3 + $0x30] sm:$0xff] }
 0x2c5   : > { %10123 = vmatprep.mubr.msk.f32.mxu0 %vm223_vm0, %v12981_v20 }
 0x2c7   : > { %10060 = vmatmul.mubr.msk.f32.gmra.mxu1 %vm223_vm0, %v12720_v1  ;;  %v6710_v1 = vld [vmem:[#allocation3 + $0x31] sm:$0xff] }
 0x2c8   : > { %10124 = vmatmul.mubr.msk.f32.gmra.mxu0 %vm223_vm0, %v12987_v12  ;;  %10062 = vmatprep.mubr.msk.f32.mxu1 %vm223_vm0, %v12728_v36  ;;  %v6317_v36 = vld [vmem:[#allocation3 + $0x38] sm:$0xff] }
 0x2c9   : > { %10126 = vmatprep.mubr.msk.f32.mxu0 %vm223_vm0, %v12993_v29 }
 0x2cb   : > { %10063 = vmatmul.mubr.msk.f32.gmra.mxu1 %vm223_vm0, %v12740_v56  ;;  %v6711_v56 = vld [vmem:[#allocation3 + $0x39] sm:$0xff] }
 0x2cc   : > { %10127 = vmatmul.mubr.msk.f32.gmra.mxu0 %vm223_vm0, %v12999_v24  ;;  %10065 = vmatprep.mubr.msk.f32.mxu1 %vm223_vm0, %v12748_v42  ;;  %v6318_v42 = vld [vmem:[#allocation3 + $0x48] sm:$0xff]  ;;  %v6323_v24 = vld [vmem:[#allocation3 + $0x80] sm:$0xff] }
 0x2cd   : > { %10129 = vmatprep.mubr.msk.f32.mxu0 %vm223_vm0, %v13005_v58  ;;  %v6717_v58 = vld [vmem:[#allocation3 + $0x81] sm:$0xff] }
 0x2cf   : > { %10066 = vmatmul.mubr.msk.f32.gmra.mxu1 %vm223_vm0, %v12760_v5  ;;  %v6712_v5 = vld [vmem:[#allocation3 + $0x49] sm:$0xff] }
 0x2d0   : > { %10130 = vmatmul.mubr.msk.f32.gmra.mxu0 %vm223_vm0, %v13011_v32  ;;  %10068 = vmatprep.mubr.msk.f32.mxu1 %vm223_vm0, %v12767_v61  ;;  %v8419_v61 = vld [vmem:[%s14045_s3 + $0x230] sm:$0xff] }
 0x2d1   : > { %10132 = vmatprep.mubr.msk.f32.mxu0 %vm223_vm0, %v13017_v53 }
 0x2d3   : > { %10069 = vmatmul.mubr.msk.f32.gmra.mxu1 %vm223_vm0, %v12778_v59  ;;  %v13236_v59 = vpop.f32.mrf.mxu1 }
 0x2d4   : > { %10133 = vmatmul.mubr.msk.f32.gmra.mxu0 %vm223_vm0, %v13023_v13  ;;  %10071 = vmatprep.mubr.msk.f32.mxu1 %vm223_vm0, %v12784_v10  ;;  %v13238_v10 = vpop.f32.mrf.mxu0  ;;  %v6324_v13 = vld [vmem:[#allocation3 + $0x90] sm:$0xff] }
 0x2d5   : > { %10135 = vmatprep.mubr.msk.f32.mxu0 %vm223_vm0, %v13029_v16  ;;  %v6718_v16 = vld [vmem:[#allocation3 + $0x91] sm:$0xff] }
 0x2d7   : > { %10072 = vmatmul.mubr.msk.f32.gmra.mxu1 %vm223_vm0, %v14266_v57 }
 0x2d8   : > { %10136 = vmatmul.mubr.msk.f32.gmra.mxu0 %vm223_vm0, %v13037_v52  ;;  %10074 = vmatprep.mubr.msk.f32.mxu1 %vm223_vm0, %v13211_v18  ;;  %v8416_v52 = vld [vmem:[%s14045_s3 + $0x218] sm:$0xff] }
 0x2d9   : > { %10138 = vmatprep.mubr.msk.f32.mxu0 %vm223_vm0, %v13213_v15 }
 0x2db   : > { %10075 = vmatmul.mubr.msk.f32.gmra.mxu1 %vm223_vm0, %v13219_v23 }
 0x2dc   : > { %10139 = vmatmul.mubr.msk.f32.gmra.mxu0 %vm223_vm0, %v13221_v43  ;;  %10157 = vmatprep.mubr.msk.f32.mxu1 %vm223_vm0, %v6316_v11  ;;  %v6328_v11 = vld [vmem:[#allocation3 + $0xc0] sm:$0xff] }
 0x2dd   : > { %10221 = vmatprep.mubr.msk.f32.mxu0 %vm223_vm0, %v6710_v1  ;;  %v6722_v1 = vld [vmem:[#allocation3 + $0xc1] sm:$0xff] }
 0x2df   : > { %10158 = vmatmul.mubr.msk.f32.vlgmr.msra.gmra.mxu1 %vm223_vm0, %v6317_v36  ;;  %v8414_v36 = vld [vmem:[%s14045_s3 + $0x208] sm:$0xff] }
 0x2e0   : > { %10222 = vmatmul.mubr.msk.f32.vlgmr.msra.gmra.mxu0 %vm223_vm0, %v6711_v56  ;;  %10160 = vmatprep.mubr.msk.f32.mxu1 %vm223_vm0, %v6318_v42 }
 0x2e1   : > { %10224 = vmatprep.mubr.msk.f32.mxu0 %vm223_vm0, %v6712_v5  ;;  %10270 = vmatpush3.msra.mxu1 %v8420_v41 }
 0x2e2   : > { %10271 = vmatprep.subr.mxu1 %v8419_v61  ;;  %v9778_v40 = vpop.f32.mrf.mxu1 }
 0x2e3   : > { %v9842_v49 = vpop.f32.mrf.mxu0  ;;  %10161 = vmatmul.mubr.msk.f32.gmra.mxu1 %vm223_vm0, %v6319_v2  ;;  %v6329_v2 = vld [vmem:[#allocation3 + $0xc8] sm:$0xff] }
 0x2e4   : > { %10225 = vmatmul.mubr.msk.f32.gmra.mxu0 %vm223_vm0, %v6713_v26  ;;  %v13245_v44 = vadd.f32 %v9842_v49, %v9778_v40  ;;  %10163 = vmatprep.mubr.msk.f32.mxu1 %vm223_vm0, %v6320_v22  ;;  %v4269_v3 = vpop.f32.mrf.mxu1  ;;  %v6723_v26 = vld [vmem:[#allocation3 + $0xc9] sm:$0xff]  ;;  %v6330_v22 = vld [vmem:[#allocation3 + $0xd8] sm:$0xff] }
 0x2e5   : > { %10227 = vmatprep.mubr.msk.f32.mxu0 %vm223_vm0, %v6714_v17  ;;  %v4590_v46 = vpop.f32.mrf.mxu0  ;;  %10272 = vmatpush3.msra.mxu1 %v8419_v61  ;;  %v6724_v17 = vld [vmem:[#allocation3 + $0xd9] sm:$0xff] }
 0x2e6   : > { %v13249_v62 = vadd.f32 %v4590_v46, %v4269_v3  ;;  %10273 = vmatprep.subr.mxu1 %v8418_v55  ;;  %v9781_v21 = vpop.f32.mrf.mxu1 }
 0x2e7   : > { %v9845_v6 = vpop.f32.mrf.mxu0  ;;  %10164 = vmatmul.mubr.msk.f32.gmra.mxu1 %vm223_vm0, %v6321_v9 }
 0x2e8   : > { %10228 = vmatmul.mubr.msk.f32.gmra.mxu0 %vm223_vm0, %v6715_v51  ;;  %v13256_v30 = vadd.f32 %v9845_v6, %v9781_v21  ;;  %10166 = vmatprep.mubr.msk.f32.mxu1 %vm223_vm0, %v6322_v50  ;;  %v4279_v20 = vpop.f32.mrf.mxu1  ;;  %v6331_v21 = vld [vmem:[#allocation3 + $0xe0] sm:$0xff] }
 0x2e9   : > { %10230 = vmatprep.mubr.msk.f32.mxu0 %vm223_vm0, %v6716_v31  ;;  %v4600_v12 = vpop.f32.mrf.mxu0  ;;  %10274 = vmatpush3.msra.mxu1 %v8418_v55  ;;  %v8413_v55 = vld [vmem:[%s14045_s3 + $0x200] sm:$0xff]  ;;  %v6725_v6 = vld [vmem:[#allocation3 + $0xe1] sm:$0xff] }
 0x2ea   : > { %v13260_v29 = vadd.f32 %v4600_v12, %v4279_v20  ;;  %10275 = vmatprep.subr.mxu1 %v8417_v38  ;;  %v9784_v32 = vpop.f32.mrf.mxu1  ;;  %v6726_v20 = vld [vmem:[#allocation3 + $0xf1] sm:$0xff] }
 0x2eb   : > { %v9848_v53 = vpop.f32.mrf.mxu0  ;;  %10167 = vmatmul.mubr.msk.f32.gmra.mxu1 %vm223_vm0, %v6323_v24 }
 0x2ec   : > { %10231 = vmatmul.mubr.msk.f32.gmra.mxu0 %vm223_vm0, %v6717_v58  ;;  %v13267_v54 = vadd.f32 %v9848_v53, %v9784_v32  ;;  %10169 = vmatprep.mubr.msk.f32.mxu1 %vm223_vm0, %v6324_v13  ;;  %v4289_v35 = vpop.f32.mrf.mxu1  ;;  %v6333_v53 = vld [vmem:[#allocation3 + $0xf8] sm:$0xff] }
 0x2ed   : > { %10233 = vmatprep.mubr.msk.f32.mxu0 %vm223_vm0, %v6718_v16  ;;  %v4610_v7 = vpop.f32.mrf.mxu0  ;;  %10276 = vmatpush3.msra.mxu1 %v8417_v38  ;;  %v6332_v38 = vld [vmem:[#allocation3 + $0xf0] sm:$0xff]  ;;  %v6727_v13 = vld [vmem:[#allocation3 + $0xf9] sm:$0xff] }
 0x2ee   : > { %v13271_v37 = vadd.f32 %v4610_v7, %v4289_v35  ;;  %10277 = vmatprep.subr.mxu1 %v8416_v52  ;;  %v9787_v8 = vpop.f32.mrf.mxu1  ;;  %v6334_v35 = vld [vmem:[#allocation3 + $0x108] sm:$0xff] }
 0x2ef   : > { %v9851_v47 = vpop.f32.mrf.mxu0  ;;  %10170 = vmatmul.mubr.msk.f32.gmra.mxu1 %vm223_vm0, %v6325_v63  ;;  %v6728_v7 = vld [vmem:[#allocation3 + $0x109] sm:$0xff] }
 0x2f0   : > { %10234 = vmatmul.mubr.msk.f32.gmra.mxu0 %vm223_vm0, %v6719_v4  ;;  %v13278_v14 = vadd.f32 %v9851_v47, %v9787_v8  ;;  %10172 = vmatprep.mubr.msk.f32.mxu1 %vm223_vm0, %v6326_v39  ;;  %v4299_v19 = vpop.f32.mrf.mxu1  ;;  %v6335_v39 = vld [vmem:[#allocation3 + $0x110] sm:$0xff] }
 0x2f1   : > { %10236 = vmatprep.mubr.msk.f32.mxu0 %vm223_vm0, %v6720_v27  ;;  %v4620_v34 = vpop.f32.mrf.mxu0  ;;  %10278 = vmatpush3.msra.mxu1 %v8416_v52  ;;  %v6729_v27 = vld [vmem:[#allocation3 + $0x111] sm:$0xff] }
 0x2f2   : > { %v13282_v60 = vadd.f32 %v4620_v34, %v4299_v19  ;;  %10279 = vmatprep.subr.mxu1 %v8415_v45  ;;  %v9790_v41 = vpop.f32.mrf.mxu1  ;;  %v6336_v34 = vld [vmem:[#allocation3 + $0x120] sm:$0xff] }
 0x2f3   : > { %v9854_v57 = vpop.f32.mrf.mxu0  ;;  %10173 = vmatmul.mubr.msk.f32.gmra.mxu1 %vm223_vm0, %v6327_v0  ;;  %v6730_v0 = vld [vmem:[#allocation3 + $0x121] sm:$0xff] }
 0x2f4   : > { %10237 = vmatmul.mubr.msk.f32.gmra.mxu0 %vm223_vm0, %v6721_v28  ;;  %v13289_v56 = vadd.f32 %v9854_v57, %v9790_v41  ;;  %10175 = vmatprep.mubr.msk.f32.mxu1 %vm223_vm0, %v6328_v11  ;;  %v4309_v42 = vpop.f32.mrf.mxu1 }
 0x2f5   : > { %10239 = vmatprep.mubr.msk.f32.mxu0 %vm223_vm0, %v6722_v1  ;;  %v4630_v5 = vpop.f32.mrf.mxu0  ;;  %10280 = vmatpush3.msra.mxu1 %v8415_v45  ;;  %v6337_v1 = vld [vmem:[#allocation3 + $0x128] sm:$0xff] }
 0x2f6   : > { %v13293_v61 = vadd.f32 %v4630_v5, %v4309_v42  ;;  %10281 = vmatprep.subr.mxu1 %v8414_v36  ;;  %v9793_v40 = vpop.f32.mrf.mxu1 }
 0x2f7   : > { %v9857_v49 = vpop.f32.mrf.mxu0  ;;  %10176 = vmatmul.mubr.msk.f32.gmra.mxu1 %vm223_vm0, %v6329_v2  ;;  %v6338_v2 = vld [vmem:[#allocation3 + $0x138] sm:$0xff] }
 0x2f8   : > { %10240 = vmatmul.mubr.msk.f32.gmra.mxu0 %vm223_vm0, %v6723_v26  ;;  %v13300_v3 = vadd.f32 %v9857_v49, %v9793_v40  ;;  %10178 = vmatprep.mubr.msk.f32.mxu1 %vm223_vm0, %v6330_v22  ;;  %v4319_v46 = vpop.f32.mrf.mxu1  ;;  %v6732_v26 = vld [vmem:[#allocation3 + $0x139] sm:$0xff] }
 0x2f9   : > { %10242 = vmatprep.mubr.msk.f32.mxu0 %vm223_vm0, %v6724_v17  ;;  %v4640_v9 = vpop.f32.mrf.mxu0  ;;  %10282 = vmatpush3.msra.mxu1 %v8414_v36  ;;  %v6731_v36 = vld [vmem:[#allocation3 + $0x129] sm:$0xff] }
 0x2fa   : > { %v13304_v51 = vadd.f32 %v4640_v9, %v4319_v46  ;;  %10283 = vmatprep.subr.mxu1 %v8413_v55  ;;  %v9796_v50 = vpop.f32.mrf.mxu1  ;;  %v6733_v46 = vld [vmem:[#allocation3 + $0x141] sm:$0xff] }
 0x2fb   : > { %v9860_v31 = vpop.f32.mrf.mxu0  ;;  %10179 = vmatmul.mubr.msk.f32.gmra.mxu1 %vm223_vm0, %v6331_v21 }
 0x2fc   : > { %10243 = vmatmul.mubr.msk.f32.gmra.mxu0 %vm223_vm0, %v6725_v6  ;;  %v13308_v12 = vadd.f32 %v9860_v31, %v9796_v50  ;;  %10181 = vmatprep.mubr.msk.f32.mxu1 %vm223_vm0, %v6332_v38  ;;  %v4329_v24 = vpop.f32.mrf.mxu1  ;;  %v6340_v6 = vld [vmem:[#allocation3 + $0x150] sm:$0xff] }
 0x2fd   : > { %10245 = vmatprep.mubr.msk.f32.mxu0 %vm223_vm0, %v6726_v20  ;;  %v4650_v58 = vpop.f32.mrf.mxu0  ;;  %10284 = vmatpush3.msra.mxu1 %v8413_v55  ;;  %v6339_v55 = vld [vmem:[#allocation3 + $0x140] sm:$0xff]  ;;  %v6734_v50 = vld [vmem:[#allocation3 + $0x151] sm:$0xff] }
 0x2fe   : > { %v13312_v32 = vadd.f32 %v4650_v58, %v4329_v24  ;;  %v6341_v58 = vld [vmem:[#allocation3 + $0x158] sm:$0xff] }
 0x2ff   : > { %v9799_v16 = vpop.f32.mrf.mxu1  ;;  %v9863_v52 = vpop.f32.mrf.mxu0  ;;  %10182 = vmatmul.mubr.msk.f32.gmra.mxu1 %vm223_vm0, %v6333_v53  ;;  %v6735_v53 = vld [vmem:[#allocation3 + $0x159] sm:$0xff] }
 0x300   : > { %10246 = vmatmul.mubr.msk.f32.gmra.mxu0 %vm223_vm0, %v6727_v13  ;;  %v13316_v63 = vadd.f32 %v9863_v52, %v9799_v16  ;;  %10184 = vmatprep.mubr.msk.f32.mxu1 %vm223_vm0, %v6334_v35  ;;  %v6342_v52 = vld [vmem:[#allocation3 + $0x168] sm:$0xff] }
 0x301   : > { %10248 = vmatprep.mubr.msk.f32.mxu0 %vm223_vm0, %v6728_v7  ;;  %v4339_v4 = vpop.f32.mrf.mxu1  ;;  %v4660_v8 = vpop.f32.mrf.mxu0  ;;  %v6736_v35 = vld [vmem:[#allocation3 + $0x169] sm:$0xff] }
 0x302   : > { %v13320_v47 = vadd.f32 %v4660_v8, %v4339_v4 }
 0x303   : > { %v9802_v45 = vpop.f32.mrf.mxu1  ;;  %v9866_v19 = vpop.f32.mrf.mxu0  ;;  %10185 = vmatmul.mubr.msk.f32.gmra.mxu1 %vm223_vm0, %v6335_v39 }
 0x304   : > { %10249 = vmatmul.mubr.msk.f32.gmra.mxu0 %vm223_vm0, %v6729_v27  ;;  %v13324_v28 = vadd.f32 %v9866_v19, %v9802_v45  ;;  %10187 = vmatprep.mubr.msk.f32.mxu1 %vm223_vm0, %v6336_v34  ;;  %v6343_v27 = vld [vmem:[#allocation3 + $0x170] sm:$0xff] }
 0x305   : > { %10251 = vmatprep.mubr.msk.f32.mxu0 %vm223_vm0, %v6730_v0  ;;  %v4349_v41 = vpop.f32.mrf.mxu1  ;;  %v4670_v57 = vpop.f32.mrf.mxu0  ;;  %v6737_v45 = vld [vmem:[#allocation3 + $0x171] sm:$0xff] }
 0x306   : > { %v13328_v11 = vadd.f32 %v4670_v57, %v4349_v41 }
 0x307   : > { %v9805_v42 = vpop.f32.mrf.mxu1  ;;  %v9869_v5 = vpop.f32.mrf.mxu0  ;;  %10188 = vmatmul.mubr.msk.f32.gmra.mxu1 %vm223_vm0, %v6337_v1  ;;  %v6346_v1 = vld [vmem:[#allocation3 + $0x198] sm:$0xff] }
 0x308   : > { %10252 = vmatmul.mubr.msk.f32.gmra.mxu0 %vm223_vm0, %v6731_v36  ;;  %v13332_v40 = vadd.f32 %v9869_v5, %v9805_v42  ;;  %10190 = vmatprep.mubr.msk.f32.mxu1 %vm223_vm0, %v6338_v2  ;;  %v6740_v36 = vld [vmem:[#allocation3 + $0x199] sm:$0xff] }
 0x309   : > { %10254 = vmatprep.mubr.msk.f32.mxu0 %vm223_vm0, %v6732_v26  ;;  %v4359_v49 = vpop.f32.mrf.mxu1  ;;  %v4680_v22 = vpop.f32.mrf.mxu0 }
 0x30a   : > { %v13336_v17 = vadd.f32 %v4680_v22, %v4359_v49 }
 0x30b   : > { %v9808_v9 = vpop.f32.mrf.mxu1  ;;  %v9872_v21 = vpop.f32.mrf.mxu0  ;;  %10191 = vmatmul.mubr.msk.f32.gmra.mxu1 %vm223_vm0, %v6339_v55 }
 0x30c   : > { %10255 = vmatmul.mubr.msk.f32.gmra.mxu0 %vm223_vm0, %v6733_v46  ;;  %v13340_v31 = vadd.f32 %v9872_v21, %v9808_v9  ;;  %10193 = vmatprep.mubr.msk.f32.mxu1 %vm223_vm0, %v6340_v6 }
 0x30d   : > { %10257 = vmatprep.mubr.msk.f32.mxu0 %vm223_vm0, %v6734_v50  ;;  %v4369_v38 = vpop.f32.mrf.mxu1  ;;  %v4690_v20 = vpop.f32.mrf.mxu0 }
 0x30e   : > { %v13344_v24 = vadd.f32 %v4690_v20, %v4369_v38  ;;  %v7105_v38 = vld [vmem:[#allocation3 + $0x3a] sm:$0xff] }
 0x30f   : > { %v9811_v13 = vpop.f32.mrf.mxu1  ;;  %10194 = vmatmul.mubr.msk.f32.gmra.mxu1 %vm223_vm0, %v6341_v58 }
 0x310   : > { %v9875_v16 = vpop.f32.mrf.mxu0  ;;  %10258 = vmatmul.mubr.msk.f32.gmra.mxu0 %vm223_vm0, %v6735_v53  ;;  %10196 = vmatprep.mubr.msk.f32.mxu1 %vm223_vm0, %v6342_v52  ;;  %v7106_v53 = vld [vmem:[#allocation3 + $0x4a] sm:$0xff] }
 0x311   : > { %v13348_v7 = vadd.f32 %v9875_v16, %v9811_v13  ;;  %10260 = vmatprep.mubr.msk.f32.mxu0 %vm223_vm0, %v6736_v35  ;;  %v4379_v4 = vpop.f32.mrf.mxu1  ;;  %v4581_v13 = vadd.f32 %v13238_v10, %v13236_v59 }
 0x312   : > { %v4700_v8 = vpop.f32.mrf.mxu0 }
 0x313   : > { %v13352_v39 = vadd.f32 %v4700_v8, %v4379_v4  ;;  %v9814_v19 = vpop.f32.mrf.mxu1  ;;  %10197 = vmatmul.mubr.msk.f32.gmra.mxu1 %vm223_vm0, %v6343_v27  ;;  %v7107_v27 = vld [vmem:[#allocation3 + $0x52] sm:$0xff] }
 0x314   : > { %v9878_v34 = vpop.f32.mrf.mxu0  ;;  %10261 = vmatmul.mubr.msk.f32.gmra.mxu0 %vm223_vm0, %v6737_v45  ;;  %10199 = vmatprep.mubr.msk.f32.mxu1 %vm223_vm0, %v13031_v33  ;;  %v6347_v33 = vld [vmem:[#allocation3 + $0x1a0] sm:$0xff] }
 0x315   : > { %v13356_v0 = vadd.f32 %v9878_v34, %v9814_v19  ;;  %10263 = vmatprep.mubr.msk.f32.mxu0 %vm223_vm0, %v13211_v18  ;;  %v4389_v41 = vpop.f32.mrf.mxu1  ;;  %v6741_v18 = vld [vmem:[#allocation3 + $0x1a1] sm:$0xff] }
 0x316   : > { %v4710_v57 = vpop.f32.mrf.mxu0  ;;  %v7108_v34 = vld [vmem:[#allocation3 + $0x62] sm:$0xff] }
 0x317   : > { %v13362_v42 = vadd.f32 %v4710_v57, %v4389_v41  ;;  %v9817_v5 = vpop.f32.mrf.mxu1  ;;  %10200 = vmatmul.mubr.msk.f32.gmra.mxu1 %vm223_vm0, %v13039_v48  ;;  %v7104_v48 = vld [vmem:[#allocation3 + $0x32] sm:$0xff] }
 0x318   : > { %v9881_v2 = vpop.f32.mrf.mxu0  ;;  %10264 = vmatmul.mubr.msk.f32.gmra.mxu0 %vm223_vm0, %v13219_v23  ;;  %10202 = vmatprep.mubr.msk.f32.mxu1 %vm223_vm0, %v6346_v1 }
 0x319   : > { %v13368_v26 = vadd.f32 %v9881_v2, %v9817_v5  ;;  %10266 = vmatprep.mubr.msk.f32.mxu0 %vm223_vm0, %v6740_v36  ;;  %v4399_v49 = vpop.f32.mrf.mxu1  ;;  %v7109_v36 = vld [vmem:[#allocation3 + $0x6a] sm:$0xff] }
 0x31a   : > { %v4720_v22 = vpop.f32.mrf.mxu0 }
 0x31b   : > { %v13372_v55 = vadd.f32 %v4720_v22, %v4399_v49  ;;  %v9820_v46 = vpop.f32.mrf.mxu1  ;;  %10203 = vmatmul.mubr.msk.f32.gmra.mxu1 %vm223_vm0, %v6347_v33  ;;  %v7110_v33 = vld [vmem:[#allocation3 + $0x7a] sm:$0xff] }
 0x31c   : > { %v9884_v9 = vpop.f32.mrf.mxu0  ;;  %10267 = vmatmul.mubr.msk.f32.gmra.mxu0 %vm223_vm0, %v6741_v18  ;;  %10285 = vmatprep.mubr.msk.f32.mxu1 %vm223_vm0, %v7104_v48  ;;  %v7111_v48 = vld [vmem:[#allocation3 + $0x82] sm:$0xff] }
 0x31d   : > { %v13376_v23 = vadd.f32 %v9884_v9, %v9820_v46  ;;  %v4409_v21 = vpop.f32.mrf.mxu1 }
 0x31e   : > { %v4730_v6 = vpop.f32.mrf.mxu0 }
 0x31f   : > { %v13379_v50 = vadd.f32 %v4730_v6, %v4409_v21  ;;  %v9903_v20 = vpop.f32.mrf.mxu1  ;;  %10286 = vmatmul.mubr.msk.f32.vlgmr.msra.gmra.mxu1 %vm223_vm0, %v7105_v38  ;;  %v7112_v6 = vld [vmem:[#allocation3 + $0x92] sm:$0xff] }
 0x320   : > { %v9967_v58 = vpop.f32.mrf.mxu0  ;;  %v5102_v16 = vadd.f32 %v9903_v20, %v12814_v25  ;;  %10288 = vmatprep.mubr.msk.f32.mxu1 %vm223_vm0, %v7106_v53 }
 0x321   : > { %v4942_v52 = vpop.f32.mrf.mxu1 }
 0x322   : > { %v5336_v35 = vpop.f32.mrf.mxu0  ;;  %v13386_v4 = vadd.f32 %v9967_v58, %v5102_v16  ;;  %v5101_v8 = vadd.f32 %v4942_v52, %v4581_v13  ;;  %v7113_v16 = vld [vmem:[#allocation3 + $0x9a] sm:$0xff] }
 0x323   : > { %v9906_v45 = vpop.f32.mrf.mxu1  ;;  %10289 = vmatmul.mubr.msk.f32.gmra.mxu1 %vm223_vm0, %v7107_v27 }
 0x324   : > { %v9970_v19 = vpop.f32.mrf.mxu0  ;;  %v13389_v41 = vadd.f32 %v5336_v35, %v5101_v8  ;;  %v5104_v57 = vadd.f32 %v9906_v45, %v13245_v44  ;;  %10291 = vmatprep.mubr.msk.f32.mxu1 %vm223_vm0, %v7108_v34  ;;  %v7114_v35 = vld [vmem:[#allocation3 + $0xaa] sm:$0xff] }
 0x325   : > { %v4952_v25 = vpop.f32.mrf.mxu1 }
 0x326   : > { %v5346_v59 = vpop.f32.mrf.mxu0  ;;  %v13393_v10 = vadd.f32 %v9970_v19, %v5104_v57  ;;  %v5103_v1 = vadd.f32 %v4952_v25, %v13249_v62  ;;  %v7115_v57 = vld [vmem:[#allocation3 + $0xb2] sm:$0xff] }
 0x327   : > { %v9909_v5 = vpop.f32.mrf.mxu1  ;;  %10292 = vmatmul.mubr.msk.f32.gmra.mxu1 %vm223_vm0, %v7109_v36 }
 0x328   : > { %v9973_v2 = vpop.f32.mrf.mxu0  ;;  %v13397_v18 = vadd.f32 %v5346_v59, %v5103_v1  ;;  %v5106_v49 = vadd.f32 %v9909_v5, %v13256_v30  ;;  %10294 = vmatprep.mubr.msk.f32.mxu1 %vm223_vm0, %v7110_v33  ;;  %v7116_v59 = vld [vmem:[#allocation3 + $0xc2] sm:$0xff] }
 0x329   : > { %v4962_v44 = vpop.f32.mrf.mxu1 }
 0x32a   : > { %v5356_v22 = vpop.f32.mrf.mxu0  ;;  %v13401_v46 = vadd.f32 %v9973_v2, %v5106_v49  ;;  %v5105_v9 = vadd.f32 %v4962_v44, %v13260_v29  ;;  %v7117_v49 = vld [vmem:[#allocation3 + $0xca] sm:$0xff] }
 0x32b   : > { %v9912_v62 = vpop.f32.mrf.mxu1  ;;  %10295 = vmatmul.mubr.msk.f32.gmra.mxu1 %vm223_vm0, %v7111_v48 }
 0x32c   : > { %v9976_v21 = vpop.f32.mrf.mxu0  ;;  %v13405_v38 = vadd.f32 %v5356_v22, %v5105_v9  ;;  %v5108_v20 = vadd.f32 %v9912_v62, %v13267_v54  ;;  %10297 = vmatprep.mubr.msk.f32.mxu1 %vm223_vm0, %v7112_v6  ;;  %v7118_v22 = vld [vmem:[#allocation3 + $0xda] sm:$0xff] }
 0x32d   : > { %v4972_v30 = vpop.f32.mrf.mxu1 }
 0x32e   : > { %v5366_v58 = vpop.f32.mrf.mxu0  ;;  %v13409_v53 = vadd.f32 %v9976_v21, %v5108_v20  ;;  %v5107_v13 = vadd.f32 %v4972_v30, %v13271_v37  ;;  %v7119_v20 = vld [vmem:[#allocation3 + $0xe2] sm:$0xff] }
 0x32f   : > { %v9915_v29 = vpop.f32.mrf.mxu1  ;;  %10298 = vmatmul.mubr.msk.f32.gmra.mxu1 %vm223_vm0, %v7113_v16 }
 0x330   : > { %v9979_v52 = vpop.f32.mrf.mxu0  ;;  %v13413_v8 = vadd.f32 %v5366_v58, %v5107_v13  ;;  %v5110_v27 = vadd.f32 %v9915_v29, %v13278_v14  ;;  %10300 = vmatprep.mubr.msk.f32.mxu1 %vm223_vm0, %v7114_v35  ;;  %v7120_v58 = vld [vmem:[#allocation3 + $0xf2] sm:$0xff] }
 0x331   : > { %v4982_v54 = vpop.f32.mrf.mxu1 }
 0x332   : > { %v5376_v45 = vpop.f32.mrf.mxu0  ;;  %v13417_v19 = vadd.f32 %v9979_v52, %v5110_v27  ;;  %v5109_v34 = vadd.f32 %v4982_v54, %v13282_v60  ;;  %v7121_v27 = vld [vmem:[#allocation3 + $0xfa] sm:$0xff] }
 0x333   : > { %v9918_v37 = vpop.f32.mrf.mxu1  ;;  %10301 = vmatmul.mubr.msk.f32.gmra.mxu1 %vm223_vm0, %v7115_v57 }
 0x334   : > { %v9982_v25 = vpop.f32.mrf.mxu0  ;;  %v13421_v1 = vadd.f32 %v5376_v45, %v5109_v34  ;;  %v5112_v36 = vadd.f32 %v9918_v37, %v13289_v56  ;;  %10303 = vmatprep.mubr.msk.f32.mxu1 %vm223_vm0, %v7116_v59  ;;  %v7122_v45 = vld [vmem:[#allocation3 + $0x10a] sm:$0xff] }
 0x335   : > { %v4992_v14 = vpop.f32.mrf.mxu1 }
 0x336   : > { %v5386_v5 = vpop.f32.mrf.mxu0  ;;  %v13425_v2 = vadd.f32 %v9982_v25, %v5112_v36  ;;  %v5111_v33 = vadd.f32 %v4992_v14, %v13293_v61  ;;  %v7123_v36 = vld [vmem:[#allocation3 + $0x112] sm:$0xff] }
 0x337   : > { %v9921_v60 = vpop.f32.mrf.mxu1  ;;  %10304 = vmatmul.mubr.msk.f32.gmra.mxu1 %vm223_vm0, %v7117_v49 }
 0x338   : > { %v9985_v44 = vpop.f32.mrf.mxu0  ;;  %v13429_v9 = vadd.f32 %v5386_v5, %v5111_v33  ;;  %v5114_v48 = vadd.f32 %v9921_v60, %v13300_v3  ;;  %10306 = vmatprep.mubr.msk.f32.mxu1 %vm223_vm0, %v7118_v22  ;;  %v7124_v5 = vld [vmem:[#allocation3 + $0x122] sm:$0xff] }
 0x339   : > { %v5002_v56 = vpop.f32.mrf.mxu1 }
 0x33a   : > { %v5396_v62 = vpop.f32.mrf.mxu0  ;;  %v13433_v21 = vadd.f32 %v9985_v44, %v5114_v48  ;;  %v5113_v6 = vadd.f32 %v5002_v56, %v13304_v51  ;;  %v7125_v48 = vld [vmem:[#allocation3 + $0x12a] sm:$0xff] }
 0x33b   : > { %v9924_v61 = vpop.f32.mrf.mxu1  ;;  %10307 = vmatmul.mubr.msk.f32.gmra.mxu1 %vm223_vm0, %v7119_v20 }
 0x33c   : > { %v9988_v30 = vpop.f32.mrf.mxu0  ;;  %v13437_v13 = vadd.f32 %v5396_v62, %v5113_v6  ;;  %v5116_v16 = vadd.f32 %v9924_v61, %v13308_v12  ;;  %10309 = vmatprep.mubr.msk.f32.mxu1 %vm223_vm0, %v7120_v58  ;;  %v7126_v62 = vld [vmem:[#allocation3 + $0x13a] sm:$0xff] }
 0x33d   : > { %v5012_v3 = vpop.f32.mrf.mxu1 }
 0x33e   : > { %v5406_v29 = vpop.f32.mrf.mxu0  ;;  %v13441_v52 = vadd.f32 %v9988_v30, %v5116_v16  ;;  %v5115_v35 = vadd.f32 %v5012_v3, %v13312_v32  ;;  %v7127_v16 = vld [vmem:[#allocation3 + $0x142] sm:$0xff] }
 0x33f   : > { %v9927_v51 = vpop.f32.mrf.mxu1  ;;  %10310 = vmatmul.mubr.msk.f32.gmra.mxu1 %vm223_vm0, %v7121_v27 }
 0x340   : > { %v9991_v54 = vpop.f32.mrf.mxu0  ;;  %v13445_v34 = vadd.f32 %v5406_v29, %v5115_v35  ;;  %v5118_v57 = vadd.f32 %v9927_v51, %v13316_v63  ;;  %10312 = vmatprep.mubr.msk.f32.mxu1 %vm223_vm0, %v7122_v45  ;;  %v7128_v29 = vld [vmem:[#allocation3 + $0x152] sm:$0xff] }
 0x341   : > { %v5022_v12 = vpop.f32.mrf.mxu1 }
 0x342   : > { %v5416_v37 = vpop.f32.mrf.mxu0  ;;  %v13449_v25 = vadd.f32 %v9991_v54, %v5118_v57  ;;  %v5117_v59 = vadd.f32 %v5022_v12, %v13320_v47  ;;  %v7129_v57 = vld [vmem:[#allocation3 + $0x15a] sm:$0xff] }
 0x343   : > { %v9930_v32 = vpop.f32.mrf.mxu1  ;;  %10313 = vmatmul.mubr.msk.f32.gmra.mxu1 %vm223_vm0, %v7123_v36 }
 0x344   : > { %v9994_v14 = vpop.f32.mrf.mxu0  ;;  %v13453_v33 = vadd.f32 %v5416_v37, %v5117_v59  ;;  %v5120_v49 = vadd.f32 %v9930_v32, %v13324_v28  ;;  %10315 = vmatprep.mubr.msk.f32.mxu1 %vm223_vm0, %v7124_v5  ;;  %v7130_v37 = vld [vmem:[#allocation3 + $0x16a] sm:$0xff] }
 0x345   : > { %v5032_v63 = vpop.f32.mrf.mxu1 }
 0x346   : > { %v5426_v60 = vpop.f32.mrf.mxu0  ;;  %v13457_v44 = vadd.f32 %v9994_v14, %v5120_v49  ;;  %v5119_v22 = vadd.f32 %v5032_v63, %v13328_v11  ;;  %v7131_v49 = vld [vmem:[#allocation3 + $0x172] sm:$0xff] }
 0x347   : > { %v9933_v47 = vpop.f32.mrf.mxu1  ;;  %10316 = vmatmul.mubr.msk.f32.gmra.mxu1 %vm223_vm0, %v7125_v48 }
 0x348   : > { %v9997_v56 = vpop.f32.mrf.mxu0  ;;  %v13461_v6 = vadd.f32 %v5426_v60, %v5119_v22  ;;  %v5122_v20 = vadd.f32 %v9933_v47, %v13332_v40  ;;  %10318 = vmatprep.mubr.msk.f32.mxu1 %vm223_vm0, %v7126_v62  ;;  %v7134_v47 = vld [vmem:[#allocation3 + $0x19a] sm:$0xff] }
 0x349   : > { %v5042_v28 = vpop.f32.mrf.mxu1 }
 0x34a   : > { %v5436_v61 = vpop.f32.mrf.mxu0  ;;  %v13465_v30 = vadd.f32 %v9997_v56, %v5122_v20  ;;  %v5121_v58 = vadd.f32 %v5042_v28, %v13336_v17 }
 0x34b   : > { %v9936_v11 = vpop.f32.mrf.mxu1  ;;  %10319 = vmatmul.mubr.msk.f32.gmra.mxu1 %vm223_vm0, %v7127_v16 }
 0x34c   : > { %v10000_v3 = vpop.f32.mrf.mxu0  ;;  %v13469_v35 = vadd.f32 %v5436_v61, %v5121_v58  ;;  %v5124_v27 = vadd.f32 %v9936_v11, %v13340_v31  ;;  %10321 = vmatprep.mubr.msk.f32.mxu1 %vm223_vm0, %v7128_v29 }
 0x34d   : > { %v5052_v40 = vpop.f32.mrf.mxu1 }
 0x34e   : > { %v5446_v51 = vpop.f32.mrf.mxu0  ;;  %v13473_v54 = vadd.f32 %v10000_v3, %v5124_v27  ;;  %v5123_v45 = vadd.f32 %v5052_v40, %v13344_v24 }
 0x34f   : > { %v9939_v17 = vpop.f32.mrf.mxu1  ;;  %10322 = vmatmul.mubr.msk.f32.gmra.mxu1 %vm223_vm0, %v7129_v57 }
 0x350   : > { %v10003_v12 = vpop.f32.mrf.mxu0  ;;  %v13477_v59 = vadd.f32 %v5446_v51, %v5123_v45  ;;  %v5126_v36 = vadd.f32 %v9939_v17, %v13348_v7  ;;  %10324 = vmatprep.mubr.msk.f32.mxu1 %vm223_vm0, %v7130_v37 }
 0x351   : > { %v5062_v31 = vpop.f32.mrf.mxu1 }
 0x352   : > { %v5456_v32 = vpop.f32.mrf.mxu0  ;;  %v13481_v14 = vadd.f32 %v10003_v12, %v5126_v36  ;;  %v5125_v5 = vadd.f32 %v5062_v31, %v13352_v39 }
 0x353   : > { %v9942_v24 = vpop.f32.mrf.mxu1  ;;  %10325 = vmatmul.mubr.msk.f32.gmra.mxu1 %vm223_vm0, %v7131_v49 }
 0x354   : > { %v10006_v63 = vpop.f32.mrf.mxu0  ;;  %v13485_v60 = vadd.f32 %v5456_v32, %v5125_v5  ;;  %v5128_v22 = vadd.f32 %v9942_v24, %v13356_v0  ;;  %10327 = vmatprep.mubr.msk.f32.mxu1 %vm223_vm0, %v13213_v15  ;;  %v7135_v0 = vld [vmem:[#allocation3 + $0x1a2] sm:$0xff] }
 0x355   : > { %v5072_v7 = vpop.f32.mrf.mxu1 }
 0x356   : > { %v5466_v48 = vpop.f32.mrf.mxu0  ;;  %v13490_v56 = vadd.f32 %v10006_v63, %v5128_v22  ;;  %v5127_v62 = vadd.f32 %v5072_v7, %v13362_v42 }
 0x357   : > { %v9945_v39 = vpop.f32.mrf.mxu1  ;;  %10328 = vmatmul.mubr.msk.f32.gmra.mxu1 %vm223_vm0, %v13221_v43 }
 0x358   : > { %v10009_v20 = vpop.f32.mrf.mxu0  ;;  %v13495_v28 = vadd.f32 %v5466_v48, %v5127_v62  ;;  %v5130_v61 = vadd.f32 %v9945_v39, %v13368_v26  ;;  %10330 = vmatprep.mubr.msk.f32.mxu1 %vm223_vm0, %v7134_v47 }
 0x359   : > { %v5082_v15 = vpop.f32.mrf.mxu1 }
 0x35a   : > { %v5476_v58 = vpop.f32.mrf.mxu0  ;;  %v13499_v16 = vadd.f32 %v10009_v20, %v5130_v61  ;;  %v5129_v11 = vadd.f32 %v5082_v15, %v13372_v55 }
 0x35b   : > { %v9948_v3 = vpop.f32.mrf.mxu1  ;;  %10331 = vmatmul.mubr.msk.f32.gmra.mxu1 %vm223_vm0, %v7135_v0 }
 0x35c   : > { %v10012_v42 = vpop.f32.mrf.mxu0  ;;  %v13503_v29 = vadd.f32 %v5476_v58, %v5129_v11  ;;  %v5132_v43 = vadd.f32 %v9948_v3, %v13376_v23 }
 0x35d   : > { %v5092_v27 = vpop.f32.mrf.mxu1 }
 0x35e   : > { %v5486_v40 = vpop.f32.mrf.mxu0  ;;  %v13506_v26 = vadd.f32 %v10012_v42, %v5132_v43  ;;  %v5131_v51 = vadd.f32 %v5092_v27, %v13379_v50 }
 0x35f   : > { %v10031_v45 = vpop.f32.mrf.mxu1 }
 0x360   : > { %v13509_v57 = vpop.f32.mrf.mxu0  ;;  %v13511_v17 = vadd.f32 %v5486_v40, %v5131_v51  ;;  %v13514_v55 = vadd.f32 %v10031_v45, %v13386_v4 }
 0x361   : > { %v5730_v12 = vpop.f32.mrf.mxu1 }
 0x362   : > { %v13516_v37 = vpop.f32.mrf.mxu0  ;;  %v13519_v36 = vadd.f32 %v5730_v12, %v13389_v41 }
 0x363   : > { %v10034_v23 = vpop.f32.mrf.mxu1 }
 0x364   : > { %v13521_v31 = vpop.f32.mrf.mxu0  ;;  %v13524_v32 = vadd.f32 %v10034_v23, %v13393_v10 }
 0x365   : > { %v5740_v50 = vpop.f32.mrf.mxu1 }
 0x366   : > { %v13526_v5 = vpop.f32.mrf.mxu0  ;;  %v13529_v49 = vadd.f32 %v5740_v50, %v13397_v18 }
 0x367   : > { %v10037_v4 = vpop.f32.mrf.mxu1 }
 0x368   : > { %v13531_v24 = vpop.f32.mrf.mxu0  ;;  %v13534_v63 = vadd.f32 %v10037_v4, %v13401_v46 }
 0x369   : > { %v5750_v41 = vpop.f32.mrf.mxu1 }
 0x36a   : > { %v13536_v22 = vpop.f32.mrf.mxu0  ;;  %v13539_v7 = vadd.f32 %v5750_v41, %v13405_v38 }
 0x36b   : > { %v10040_v10 = vpop.f32.mrf.mxu1 }
 0x36c   : > { %v13541_v48 = vpop.f32.mrf.mxu0  ;;  %v13544_v47 = vadd.f32 %v10040_v10, %v13409_v53 }
 0x36d   : > { %v5760_v18 = vpop.f32.mrf.mxu1 }
 0x36e   : > { %v13546_v62 = vpop.f32.mrf.mxu0  ;;  %v13549_v39 = vadd.f32 %v5760_v18, %v13413_v8 }
 0x36f   : > { %v10043_v46 = vpop.f32.mrf.mxu1 }
 0x370   : > { %v13551_v20 = vpop.f32.mrf.mxu0  ;;  %v13554_v61 = vadd.f32 %v10043_v46, %v13417_v19 }
 0x371   : > { %v5770_v38 = vpop.f32.mrf.mxu1 }
 0x372   : > { %v13556_v0 = vpop.f32.mrf.mxu0  ;;  %v13559_v15 = vadd.f32 %v5770_v38, %v13421_v1 }
 0x373   : > { %v10046_v53 = vpop.f32.mrf.mxu1 }
 0x374   : > { %v13561_v58 = vpop.f32.mrf.mxu0  ;;  %v13564_v11 = vadd.f32 %v10046_v53, %v13425_v2 }
 0x375   : > { %v5780_v8 = vpop.f32.mrf.mxu1 }
 0x376   : > { %v13566_v3 = vpop.f32.mrf.mxu0  ;;  %v13569_v42 = vadd.f32 %v5780_v8, %v13429_v9 }
 0x377   : > { %v10049_v19 = vpop.f32.mrf.mxu1 }
 0x378   : > { %v13571_v43 = vpop.f32.mrf.mxu0  ;;  %v13574_v27 = vadd.f32 %v10049_v19, %v13433_v21 }
 0x379   : > { %v5790_v1 = vpop.f32.mrf.mxu1 }
 0x37a   : > { %v13576_v40 = vpop.f32.mrf.mxu0  ;;  %v13579_v51 = vadd.f32 %v5790_v1, %v13437_v13 }
 0x37b   : > { %v10052_v2 = vpop.f32.mrf.mxu1 }
 0x37c   : > { %v13581_v45 = vpop.f32.mrf.mxu0  ;;  %v13584_v12 = vadd.f32 %v10052_v2, %v13441_v52 }
 0x37d   : > { %14267 = vst [vmem:[#allocation7_spill] sm:$0xff] %v13581_v45  ;;  %v5800_v9 = vpop.f32.mrf.mxu1 }
 0x37e   : > { %v13586_v23 = vpop.f32.mrf.mxu0  ;;  %v13589_v50 = vadd.f32 %v5800_v9, %v13445_v34 }
 0x37f   : > { %14268 = vst [vmem:[#allocation8_spill] sm:$0xff] %v13586_v23  ;;  %v10055_v21 = vpop.f32.mrf.mxu1 }
 0x380   : > { %14269 = vst [vmem:[#allocation14_spill] sm:$0xff] %v13589_v50  ;;  %v13591_v4 = vpop.f32.mrf.mxu0  ;;  %v13594_v41 = vadd.f32 %v10055_v21, %v13449_v25 }
 0x381   : > { %14270 = vst [vmem:[#allocation13_spill] sm:$0xff] %v13591_v4  ;;  %v5810_v13 = vpop.f32.mrf.mxu1 }
 0x382   : > { %14271 = vst [vmem:[#allocation35_spill] sm:$0xff] %v13594_v41  ;;  %v13596_v10 = vpop.f32.mrf.mxu0  ;;  %v13599_v18 = vadd.f32 %v5810_v13, %v13453_v33 }
 0x383   : > { %14272 = vst [vmem:[#allocation34_spill] sm:$0xff] %v13596_v10  ;;  %v10058_v52 = vpop.f32.mrf.mxu1 }
 0x384   : > { %14273 = vst [vmem:[#allocation80_spill] sm:$0xff] %v13599_v18  ;;  %v13601_v46 = vpop.f32.mrf.mxu0  ;;  %v13604_v38 = vadd.f32 %v10058_v52, %v13457_v44 }
 0x385   : > { %14274 = vst [vmem:[#allocation85_spill] sm:$0xff] %v13601_v46  ;;  %v5820_v34 = vpop.f32.mrf.mxu1 }
 0x386   : > { %14275 = vst [vmem:[#allocation9_spill] sm:$0xff] %v13604_v38  ;;  %v13606_v53 = vpop.f32.mrf.mxu0  ;;  %v13609_v8 = vadd.f32 %v5820_v34, %v13461_v6 }
 0x387   : > { %14276 = vst [vmem:[#allocation10_spill] sm:$0xff] %v13606_v53  ;;  %v10061_v25 = vpop.f32.mrf.mxu1 }
 0x388   : > { %14277 = vst [vmem:[#allocation37_spill] sm:$0xff] %v13609_v8  ;;  %v13611_v19 = vpop.f32.mrf.mxu0  ;;  %v13614_v1 = vadd.f32 %v10061_v25, %v13465_v30 }
 0x389   : > { %14278 = vst [vmem:[#allocation40_spill] sm:$0xff] %v13611_v19  ;;  %v5830_v33 = vpop.f32.mrf.mxu1 }
 0x38a   : > { %14279 = vst [vmem:[#allocation88_spill] sm:$0xff] %v13614_v1  ;;  %v13616_v2 = vpop.f32.mrf.mxu0  ;;  %v13619_v9 = vadd.f32 %v5830_v33, %v13469_v35 }
 0x38b   : > { %14280 = vst [vmem:[#allocation81_spill] sm:$0xff] %v13616_v2  ;;  %v10064_v44 = vpop.f32.mrf.mxu1 }
 0x38c   : > { %14281 = vst [vmem:[#allocation11_spill] sm:$0xff] %v13619_v9  ;;  %v13621_v21 = vpop.f32.mrf.mxu0  ;;  %v13624_v13 = vadd.f32 %v10064_v44, %v13473_v54 }
 0x38d   : > { %14282 = vst [vmem:[#allocation12_spill] sm:$0xff] %v13621_v21  ;;  %v5840_v6 = vpop.f32.mrf.mxu1 }
 0x38e   : > { %14283 = vst [vmem:[#allocation16_spill] sm:$0xff] %v13624_v13  ;;  %v13626_v52 = vpop.f32.mrf.mxu0  ;;  %v13629_v34 = vadd.f32 %v5840_v6, %v13477_v59 }
 0x38f   : > { %14284 = vst [vmem:[#allocation15_spill] sm:$0xff] %v13626_v52  ;;  %v10067_v30 = vpop.f32.mrf.mxu1 }
 0x390   : > { %14285 = vst [vmem:[#allocation39_spill] sm:$0xff] %v13629_v34  ;;  %v13631_v25 = vpop.f32.mrf.mxu0  ;;  %v13634_v2 = vadd.f32 %v10067_v30, %v13481_v14 }
 0x391   : > { %14286 = vst [vmem:[#allocation38_spill] sm:$0xff] %v13631_v25  ;;  %v5850_v35 = vpop.f32.mrf.mxu1 }
 0x392   : > { %14287 = vst [vmem:[#allocation91_spill] sm:$0xff] %v13634_v2  ;;  %v13636_v33 = vpop.f32.mrf.mxu0  ;;  %v13639_v21 = vadd.f32 %v5850_v35, %v13485_v60 }
 0x393   : > { %14288 = vst [vmem:[#allocation83_spill] sm:$0xff] %v13636_v33  ;;  %v10070_v54 = vpop.f32.mrf.mxu1 }
 0x394   : > { %14289 = vst [vmem:[#allocation41_spill] sm:$0xff] %v13639_v21  ;;  %v13641_v44 = vpop.f32.mrf.mxu0  ;;  %v13644_v52 = vadd.f32 %v10070_v54, %v13490_v56 }
 0x395   : > { %14290 = vst [vmem:[#allocation44_spill] sm:$0xff] %v13641_v44  ;;  %v5860_v59 = vpop.f32.mrf.mxu1 }
 0x396   : > { %14291 = vst [vmem:[#allocation84_spill] sm:$0xff] %v13644_v52  ;;  %v13646_v6 = vpop.f32.mrf.mxu0  ;;  %v13649_v25 = vadd.f32 %v5860_v59, %v13495_v28 }
 0x397   : > { %14292 = vst [vmem:[#allocation94_spill] sm:$0xff] %v13646_v6  ;;  %v10073_v14 = vpop.f32.mrf.mxu1 }
 0x398   : > { %14293 = vst [vmem:[#allocation18_spill] sm:$0xff] %v13649_v25  ;;  %v13651_v30 = vpop.f32.mrf.mxu0  ;;  %v13654_v33 = vadd.f32 %v10073_v14, %v13499_v16 }
 0x399   : > { %14294 = vst [vmem:[#allocation17_spill] sm:$0xff] %v13651_v30  ;;  %v5870_v60 = vpop.f32.mrf.mxu1 }
 0x39a   : > { %14295 = vst [vmem:[#allocation19_spill] sm:$0xff] %v13654_v33  ;;  %v13656_v35 = vpop.f32.mrf.mxu0  ;;  %v13659_v44 = vadd.f32 %v5870_v60, %v13503_v29 }
 0x39b   : > { %14296 = vst [vmem:[#allocation43_spill] sm:$0xff] %v13656_v35  ;;  %v10076_v56 = vpop.f32.mrf.mxu1 }
 0x39c   : > { %14297 = vst [vmem:[#allocation42_spill] sm:$0xff] %v13659_v44  ;;  %v13661_v54 = vpop.f32.mrf.mxu0  ;;  %v13664_v6 = vadd.f32 %v10076_v56, %v13506_v26 }
 0x39d   : > { %14298 = vst [vmem:[#allocation86_spill] sm:$0xff] %v13661_v54  ;;  %v5880_v28 = vpop.f32.mrf.mxu1 }
 0x39e   : > { %14299 = vst [vmem:[#allocation45_spill] sm:$0xff] %v13664_v6  ;;  %v13666_v59 = vpop.f32.mrf.mxu0  ;;  %v13669_v30 = vadd.f32 %v5880_v28, %v13511_v17 }
 0x39f   : > { %14300 = vst [vmem:[#allocation48_spill] sm:$0xff] %v13666_v59  ;;  %v10159_v16 = vpop.f32.mrf.mxu1 }
 0x3a0   : > { %14301 = vst [vmem:[#allocation99_spill] sm:$0xff] %v13669_v30  ;;  %v10223_v14 = vpop.f32.mrf.mxu0 }
 0x3a1   : > { %v6519_v33 = vpop.f32.mrf.mxu1 }
 0x3a2   : > { %v6913_v25 = vpop.f32.mrf.mxu0 }
 0x3a3   : > { %v10162_v35 = vpop.f32.mrf.mxu1 }
 0x3a4   : > { %v10226_v29 = vpop.f32.mrf.mxu0 }
 0x3a5   : > { %v6529_v52 = vpop.f32.mrf.mxu1 }
 0x3a6   : > { %v13673_v54 = vpop.f32.mrf.mxu0 }
 0x3a7   : > { %v10165_v60 = vpop.f32.mrf.mxu1 }
 0x3a8   : > { %v13679_v59 = vpop.f32.mrf.mxu0 }
 0x3a9   : > { %v13671_v44 = vpop.f32.mrf.mxu1 }
 0x3aa   : > { %v13685_v30 = vpop.f32.mrf.mxu0 }
 0x3ab   : > { %v13675_v26 = vpop.f32.mrf.mxu1 }
 0x3ac   : > { %v13691_v2 = vpop.f32.mrf.mxu0 }
 0x3ad   : > { %v13677_v56 = vpop.f32.mrf.mxu1 }
 0x3ae   : > { %v13697_v9 = vpop.f32.mrf.mxu0 }
 0x3af   : > { %v13681_v17 = vpop.f32.mrf.mxu1 }
 0x3b0   : > { %v13703_v53 = vpop.f32.mrf.mxu0 }
 0x3b1   : > { %v13683_v28 = vpop.f32.mrf.mxu1 }
 0x3b2   : > { %v13709_v38 = vpop.f32.mrf.mxu0 }
 0x3b3   : > { %v13687_v6 = vpop.f32.mrf.mxu1 }
 0x3b4   : > { %v13715_v4 = vpop.f32.mrf.mxu0 }
 0x3b5   : > { %v13689_v21 = vpop.f32.mrf.mxu1 }
 0x3b7   : > { %v13693_v34 = vpop.f32.mrf.mxu1 }
 0x3b9   : > { %v13695_v13 = vpop.f32.mrf.mxu1 }
 0x3ba   : > { %14302 = vst [vmem:[#allocation87_spill] sm:$0xff] %v13695_v13 }
 0x3bb   : > { %v13699_v19 = vpop.f32.mrf.mxu1 }
 0x3bc   : > { %14303 = vst [vmem:[#allocation20_spill] sm:$0xff] %v13699_v19  ;;  %v13721_v19 = vpop.f32.mrf.mxu0 }
 0x3bd   : > { %v13701_v1 = vpop.f32.mrf.mxu1 }
 0x3be   : > { %14304 = vst [vmem:[#allocation21_spill] sm:$0xff] %v13701_v1 }
 0x3bf   : > { %v13705_v8 = vpop.f32.mrf.mxu1 }
 0x3c0   : > { %14305 = vst [vmem:[#allocation47_spill] sm:$0xff] %v13705_v8  ;;  %v13727_v8 = vpop.f32.mrf.mxu0 }
 0x3c1   : > { %v13707_v46 = vpop.f32.mrf.mxu1  ;;  %14313 = vst [vmem:[#allocation51_spill] sm:$0xff] %v13727_v8 }
 0x3c2   : > { %14306 = vst [vmem:[#allocation46_spill] sm:$0xff] %v13707_v46 }
 0x3c3   : > { %v13711_v10 = vpop.f32.mrf.mxu1 }
 0x3c4   : > { %14307 = vst [vmem:[#allocation89_spill] sm:$0xff] %v13711_v10  ;;  %v13733_v10 = vpop.f32.mrf.mxu0 }
 0x3c5   : > { %v13713_v18 = vpop.f32.mrf.mxu1  ;;  %14316 = vst [vmem:[#allocation53_spill] sm:$0xff] %v13733_v10 }
 0x3c6   : > { %14308 = vst [vmem:[#allocation49_spill] sm:$0xff] %v13713_v18 }
 0x3c7   : > { %v13717_v41 = vpop.f32.mrf.mxu1 }
 0x3c8   : > { %14309 = vst [vmem:[#allocation52_spill] sm:$0xff] %v13717_v41  ;;  %v13739_v41 = vpop.f32.mrf.mxu0 }
 0x3c9   : > { %v13719_v23 = vpop.f32.mrf.mxu1  ;;  %14319 = vst [vmem:[#allocation24_spill] sm:$0xff] %v13739_v41 }
 0x3ca   : > { %14310 = vst [vmem:[#allocation90_spill] sm:$0xff] %v13719_v23  ;;  %v13749_v8 = vpop.f32.mrf.mxu0 }
 0x3cb   : > { %v13723_v1 = vpop.f32.mrf.mxu1 }
 0x3cc   : > { %14311 = vst [vmem:[#allocation22_spill] sm:$0xff] %v13723_v1 }
 0x3cd   : > { %v13725_v50 = vpop.f32.mrf.mxu1 }
 0x3ce   : > { %14312 = vst [vmem:[#allocation23_spill] sm:$0xff] %v13725_v50  ;;  %v6284_v50 = vadd.f32 %v13509_v57, %v13514_v55 }
 0x3cf   : > { %v13729_v46 = vpop.f32.mrf.mxu1 }
 0x3d0   : > { %14314 = vst [vmem:[#allocation50_spill] sm:$0xff] %v13729_v46  ;;  %v6283_v46 = vadd.f32 %v13516_v37, %v13519_v36  ;;  %v6288_v37 = vadd.f32 %v13531_v24, %v13534_v63 }
 0x3d1   : > { %v13731_v13 = vpop.f32.mrf.mxu1 }
 0x3d2   : > { %14315 = vst [vmem:[#allocation92_spill] sm:$0xff] %v13731_v13  ;;  %v6679_v13 = vadd.f32 %v10159_v16, %v6284_v50  ;;  %v6290_v16 = vadd.f32 %v13541_v48, %v13544_v47 }
 0x3d3   : > { %v13735_v18 = vpop.f32.mrf.mxu1 }
 0x3d4   : > { %14317 = vst [vmem:[#allocation56_spill] sm:$0xff] %v13735_v18  ;;  %v6678_v18 = vadd.f32 %v6519_v33, %v6283_v46  ;;  %v7073_v57 = vadd.f32 %v10223_v14, %v6679_v13 }
 0x3d5   : > { %v13737_v45 = vpop.f32.mrf.mxu1 }
 0x3d6   : > { %14318 = vst [vmem:[#allocation93_spill] sm:$0xff] %v13737_v45  ;;  %v6286_v45 = vadd.f32 %v13521_v31, %v13524_v32  ;;  %v13767_v31 = vld [vmem:[%s14046_s4] ss:$0 sm:$0xff]  ;;  %v7072_v32 = vadd.f32 %v6913_v25, %v6678_v18 }
 0x3d7   : > { %v13741_v23 = vpop.f32.mrf.mxu1  ;;  %v7537_v18 = vld [vmem:[#allocation2 + $0x19] sm:$0xff] }
 0x3d8   : > { %14320 = vst [vmem:[#allocation25_spill] sm:$0xff] %v13741_v23  ;;  %v6285_v23 = vadd.f32 %v13526_v5, %v13529_v49  ;;  %v6681_v55 = vadd.f32 %v10162_v35, %v6286_v45  ;;  %v6287_v5 = vadd.f32 %v13536_v22, %v13539_v7  ;;  %v6683_v49 = vadd.f32 %v10165_v60, %v6288_v37  ;;  %v7538_v45 = vld [vmem:[#allocation2 + $0x21] sm:$0xff] }
 0x3d9   : > { %v13745_v1 = vpop.f32.mrf.mxu1 }
 0x3da   : > { %14321 = vst [vmem:[#allocation55_spill] sm:$0xff] %v13745_v1  ;;  %v13759_v1 = vpop.f32.mrf.mxu0  ;;  %v6680_v50 = vadd.f32 %v6529_v52, %v6285_v23  ;;  %v7075_v33 = vadd.f32 %v10226_v29, %v6681_v55  ;;  %v6682_v23 = vadd.f32 %v13671_v44, %v6287_v5  ;;  %v6289_v29 = vadd.f32 %v13546_v62, %v13549_v39  ;;  %v7540_v55 = vld [vmem:[#allocation2 + $0x39] sm:$0xff]  ;;  %v7539_v39 = vld [vmem:[#allocation2 + $0x31] sm:$0xff] }
 0x3db   : > { %v13751_v10 = vpop.f32.mrf.mxu1  ;;  %v7077_v60 = vadd.f32 %v13679_v59, %v6683_v49 }
 0x3dc   : > { %v13771_v35 = vpop.f32.mrf.mxu0  ;;  %v7074_v22 = vadd.f32 %v13673_v54, %v6680_v50  ;;  %v7076_v50 = vadd.f32 %v13685_v30, %v6682_v23  ;;  %v6684_v62 = vadd.f32 %v13677_v56, %v6289_v29  ;;  %v7542_v56 = vld [vmem:[#allocation2 + $0x51] sm:$0xff]  ;;  %v6294_v23 = vadd.f32 %v13561_v58, %v13564_v11 }
 0x3dd   : > { %v13755_v41 = vpop.f32.mrf.mxu1 }
 0x3de   : > { %v13785_v48 = vpop.f32.mrf.mxu0  ;;  %v6689_v11 = vadd.f32 %v13687_v6, %v6294_v23 }
 0x3df   : > { %v10287_v36 = vpop.f32.mrf.mxu1 }
 0x3e0   : > { %v7467_v46 = vadd.f32 %v10287_v36, %v7073_v57  ;;  %v6685_v57 = vadd.f32 %v13675_v26, %v6290_v16 }
 0x3e1   : > { %v7307_v13 = vpop.f32.mrf.mxu1 }
 0x3e2   : > { %v7506_v24 = vadd.f32 %v13767_v31, %v7467_v46  ;;  %v7466_v63 = vadd.f32 %v7307_v13, %v7072_v32  ;;  %v6292_v32 = vadd.f32 %v13551_v20, %v13554_v61  ;;  %v6291_v20 = vadd.f32 %v13556_v0, %v13559_v15  ;;  %v13801_v13 = vpop.f32.mrf.mxu0 }
 0x3e3   : > { %v10290_v52 = vpop.f32.mrf.mxu1  ;;  %v7079_v61 = vadd.f32 %v13691_v2, %v6685_v57  ;;  %v7078_v0 = vadd.f32 %v13697_v9, %v6684_v62  ;;  %v7541_v2 = vld [vmem:[#allocation2 + $0x49] sm:$0xff] }
 0x3e4   : > { %v7570_v7 = vadd.f32 %v7538_v45, %v7506_v24  ;;  %v7505_v25 = vadd.f32 %v13767_v31, %v7466_v63  ;;  %v7469_v14 = vadd.f32 %v10290_v52, %v7075_v33  ;;  %v6687_v30 = vadd.f32 %v13681_v17, %v6292_v32  ;;  %v7544_v9 = vld [vmem:[#allocation2 + $0x69] sm:$0xff] }
 0x3e5   : > { %v7317_v37 = vpop.f32.mrf.mxu1  ;;  %v6686_v15 = vadd.f32 %v13683_v28, %v6291_v20  ;;  %v13817_v28 = vpop.f32.mrf.mxu0  ;;  %v6295_v32 = vadd.f32 %v13576_v40, %v13579_v51  ;;  %v14323_v51 = vld [vmem:[#allocation87_spill] sm:$0xff] }
 0x3e6   : > { %v7602_v47 = vmax.f32 %v7570_v7, 0.0  ;;  %v7569_v44 = vadd.f32 %v7537_v18, %v7505_v25  ;;  %v7508_v36 = vadd.f32 %v13767_v31, %v7469_v14  ;;  %v7468_v54 = vadd.f32 %v7317_v37, %v7074_v22 }
 0x3e7   : > { %v10293_v59 = vpop.f32.mrf.mxu1  ;;  %v6293_v25 = vadd.f32 %v13566_v3, %v13569_v42  ;;  %v7081_v58 = vadd.f32 %v13703_v53, %v6687_v30  ;;  %v6296_v37 = vadd.f32 %v13571_v43, %v13574_v27  ;;  %v7080_v3 = vadd.f32 %v13709_v38, %v6686_v15  ;;  %v7543_v53 = vld [vmem:[#allocation2 + $0x61] sm:$0xff] }
 0x3e8   : > { %7634 = vst.msk [vmem:[%s13792_s23 + $0x8] sm:$0xff] %vm223_vm0, %v7602_v47  ;;  %v7601_v26 = vmax.f32 %v7569_v44, 0.0  ;;  %v7572_v46 = vadd.f32 %v7540_v55, %v7508_v36  ;;  %v7507_v5 = vadd.f32 %v13767_v31, %v7468_v54  ;;  %v7471_v49 = vadd.f32 %v10293_v59, %v7077_v60  ;;  %v7546_v38 = vld [vmem:[#allocation2 + $0x81] sm:$0xff] }
 0x3e9   : > { %v7327_v45 = vpop.f32.mrf.mxu1  ;;  %v6688_v42 = vadd.f32 %v13689_v21, %v6293_v25  ;;  %v7083_v43 = vadd.f32 %v13715_v4, %v6689_v11  ;;  %v6691_v27 = vadd.f32 %v13693_v34, %v6296_v37  ;;  %v13833_v21 = vpop.f32.mrf.mxu0  ;;  %v6690_v4 = vadd.f32 %v14323_v51, %v6295_v32  ;;  %v7545_v34 = vld [vmem:[#allocation2 + $0x79] sm:$0xff]  ;;  %v7550_v32 = vld [vmem:[#allocation2 + $0xb1] sm:$0xff] }
 0x3ea   : > { %7633 = vst.msk [vmem:[%s13792_s23] sm:$0xff] %vm223_vm0, %v7601_v26  ;;  %v7604_v33 = vmax.f32 %v7572_v46, 0.0  ;;  %v7571_v24 = vadd.f32 %v7539_v39, %v7507_v5  ;;  %v7510_v63 = vadd.f32 %v13767_v31, %v7471_v49  ;;  %v7470_v16 = vadd.f32 %v7327_v45, %v7076_v50  ;;  %v14322_v46 = vld [vmem:[#allocation7_spill] sm:$0xff]  ;;  %v14324_v45 = vld [vmem:[#allocation14_spill] sm:$0xff] }
 0x3eb   : > { %v10296_v17 = vpop.f32.mrf.mxu1  ;;  %v6298_v5 = vadd.f32 %v14322_v46, %v13584_v12  ;;  %v7082_v40 = vadd.f32 %v13721_v19, %v6688_v42  ;;  %v7548_v19 = vld [vmem:[#allocation2 + $0x99] sm:$0xff]  ;;  %v13849_v15 = vpop.f32.mrf.mxu0  ;;  %v14332_v42 = vld [vmem:[#allocation80_spill] sm:$0xff] }
 0x3ec   : > { %7636 = vst.msk [vmem:[%s13792_s23 + $0x18] sm:$0xff] %vm223_vm0, %v7604_v33  ;;  %v7603_v18 = vmax.f32 %v7571_v24, 0.0  ;;  %v7574_v52 = vadd.f32 %v7542_v56, %v7510_v63  ;;  %v7509_v22 = vadd.f32 %v13767_v31, %v7470_v16  ;;  %v7473_v7 = vadd.f32 %v10296_v17, %v7079_v61  ;;  %v14325_v33 = vld [vmem:[#allocation8_spill] sm:$0xff]  ;;  %v14326_v63 = vld [vmem:[#allocation51_spill] sm:$0xff] }
 0x3ed   : > { %v7337_v14 = vpop.f32.mrf.mxu1  ;;  %v6297_v24 = vadd.f32 %v14325_v33, %v14324_v45  ;;  %v7085_v12 = vadd.f32 %v14326_v63, %v6691_v27  ;;  %v14327_v16 = vld [vmem:[#allocation20_spill] sm:$0xff]  ;;  %v13865_v27 = vpop.f32.mrf.mxu0  ;;  %v14340_v45 = vld [vmem:[#allocation10_spill] sm:$0xff]  ;;  %v14341_v63 = vld [vmem:[#allocation89_spill] sm:$0xff] }
 0x3ee   : > { %7635 = vst.msk [vmem:[%s13792_s23 + $0x10] sm:$0xff] %vm223_vm0, %v7603_v18  ;;  %v7606_v29 = vmax.f32 %v7574_v52, 0.0  ;;  %v7573_v60 = vadd.f32 %v7541_v2, %v7509_v22  ;;  %v7512_v57 = vadd.f32 %v13767_v31, %v7473_v7  ;;  %v7472_v55 = vadd.f32 %v7337_v14, %v7078_v0  ;;  %v14328_v22 = vld [vmem:[#allocation35_spill] sm:$0xff]  ;;  %v14329_v7 = vld [vmem:[#allocation13_spill] sm:$0xff] }
 0x3ef   : > { %v10299_v6 = vpop.f32.mrf.mxu1  ;;  %v6693_v23 = vadd.f32 %v14327_v16, %v6298_v5  ;;  %v6300_v25 = vadd.f32 %v14329_v7, %v14328_v22 }
 0x3f0   : > { %7638 = vst.msk [vmem:[%s13792_s23 + $0x28] sm:$0xff] %vm223_vm0, %v7606_v29  ;;  %v7605_v47 = vmax.f32 %v7573_v60, 0.0  ;;  %v7576_v44 = vadd.f32 %v7544_v9, %v7512_v57  ;;  %v7511_v36 = vadd.f32 %v13767_v31, %v7472_v55  ;;  %v7475_v54 = vadd.f32 %v10299_v6, %v7081_v58  ;;  %v14330_v58 = vld [vmem:[#allocation53_spill] sm:$0xff] }
 0x3f1   : > { %v7347_v50 = vpop.f32.mrf.mxu1  ;;  %v7084_v11 = vadd.f32 %v14330_v58, %v6690_v4  ;;  %v14331_v9 = vld [vmem:[#allocation21_spill] sm:$0xff]  ;;  %v7551_v58 = vld [vmem:[#allocation2 + $0xc1] sm:$0xff] }
 0x3f2   : > { %7637 = vst.msk [vmem:[%s13792_s23 + $0x20] sm:$0xff] %vm223_vm0, %v7605_v47  ;;  %v7608_v62 = vmax.f32 %v7576_v44, 0.0  ;;  %v7575_v39 = vadd.f32 %v7543_v53, %v7511_v36  ;;  %v7514_v59 = vadd.f32 %v13767_v31, %v7475_v54  ;;  %v7474_v26 = vadd.f32 %v7347_v50, %v7080_v3  ;;  %v7547_v29 = vld [vmem:[#allocation2 + $0x91] sm:$0xff]  ;;  %v14334_v47 = vld [vmem:[#allocation24_spill] sm:$0xff]  ;;  %v14335_v36 = vld [vmem:[#allocation47_spill] sm:$0xff] }
 0x3f3   : > { %v10302_v49 = vpop.f32.mrf.mxu1  ;;  %v6692_v14 = vadd.f32 %v14331_v9, %v6297_v24  ;;  %v14333_v53 = vld [vmem:[#allocation34_spill] sm:$0xff]  ;;  %v7087_v44 = vadd.f32 %v14334_v47, %v6693_v23  ;;  %v6695_v54 = vadd.f32 %v14335_v36, %v6300_v25  ;;  %v7549_v4 = vld [vmem:[#allocation2 + $0xa9] sm:$0xff]  ;;  %v13881_v23 = vpop.f32.mrf.mxu0 }
 0x3f4   : > { %7640 = vst.msk [vmem:[%s13792_s23 + $0x38] sm:$0xff] %vm223_vm0, %v7608_v62  ;;  %v7607_v20 = vmax.f32 %v7575_v39, 0.0  ;;  %v7578_v61 = vadd.f32 %v7546_v38, %v7514_v59  ;;  %v7513_v30 = vadd.f32 %v13767_v31, %v7474_v26  ;;  %v7477_v56 = vadd.f32 %v10302_v49, %v7083_v43  ;;  %v14336_v59 = vld [vmem:[#allocation9_spill] sm:$0xff] }
 0x3f5   : > { %v7357_v0 = vpop.f32.mrf.mxu1  ;;  %v6299_v6 = vadd.f32 %v14333_v53, %v14332_v42  ;;  %v14337_v26 = vld [vmem:[#allocation85_spill] sm:$0xff]  ;;  %v7086_v5 = vadd.f32 %v13749_v8, %v6692_v14  ;;  %v7089_v24 = vadd.f32 %v13759_v1, %v6695_v54  ;;  %v14347_v42 = vld [vmem:[#allocation52_spill] sm:$0xff]  ;;  %v13897_v47 = vpop.f32.mrf.mxu0 }
 0x3f6   : > { %7639 = vst.msk [vmem:[%s13792_s23 + $0x30] sm:$0xff] %vm223_vm0, %v7607_v20  ;;  %v7610_v2 = vmax.f32 %v7578_v61, 0.0  ;;  %v7577_v17 = vadd.f32 %v7545_v34, %v7513_v30  ;;  %v7516_v18 = vadd.f32 %v13767_v31, %v7477_v56  ;;  %v7476_v52 = vadd.f32 %v7357_v0, %v7082_v40  ;;  %v14338_v40 = vld [vmem:[#allocation46_spill] sm:$0xff]  ;;  %v14339_v56 = vld [vmem:[#allocation37_spill] sm:$0xff] }
 0x3f7   : > { %v10305_v60 = vpop.f32.mrf.mxu1  ;;  %v6302_v46 = vadd.f32 %v14337_v26, %v14336_v59  ;;  %v6694_v51 = vadd.f32 %v14338_v40, %v6299_v6  ;;  %v6301_v33 = vadd.f32 %v14340_v45, %v14339_v56  ;;  %v7552_v8 = vld [vmem:[#allocation2 + $0xc9] sm:$0xff]  ;;  %v7553_v59 = vld [vmem:[#allocation2 + $0xd9] sm:$0xff]  ;;  %v10262_v45 = vpop.f32.mrf.mxu0 }
 0x3f8   : > { %7642 = vst.msk [vmem:[%s13792_s23 + $0x48] sm:$0xff] %vm223_vm0, %v7610_v2  ;;  %v7609_v57 = vmax.f32 %v7577_v17, 0.0  ;;  %v7580_v55 = vadd.f32 %v7548_v19, %v7516_v18  ;;  %v7515_v37 = vadd.f32 %v13767_v31, %v7476_v52  ;;  %v7479_v3 = vadd.f32 %v10305_v60, %v7085_v12  ;;  %v14342_v18 = vld [vmem:[#allocation88_spill] sm:$0xff]  ;;  %v14344_v1 = vld [vmem:[#allocation49_spill] sm:$0xff] }
 0x3f9   : > { %v7367_v43 = vpop.f32.mrf.mxu1  ;;  %v6697_v12 = vadd.f32 %v14341_v63, %v6302_v46  ;;  %v14343_v52 = vld [vmem:[#allocation40_spill] sm:$0xff]  ;;  %v7088_v7 = vadd.f32 %v13771_v35, %v6694_v51  ;;  %v6696_v25 = vadd.f32 %v14344_v1, %v6301_v33 }
 0x3fa   : > { %7641 = vst.msk [vmem:[%s13792_s23 + $0x40] sm:$0xff] %vm223_vm0, %v7609_v57  ;;  %v7612_v38 = vmax.f32 %v7580_v55, 0.0  ;;  %v7579_v50 = vadd.f32 %v7547_v29, %v7515_v37  ;;  %v7518_v62 = vadd.f32 %v13767_v31, %v7479_v3  ;;  %v7478_v39 = vadd.f32 %v7367_v43, %v7084_v11  ;;  %v14345_v57 = vld [vmem:[#allocation11_spill] sm:$0xff]  ;;  %v14346_v55 = vld [vmem:[#allocation81_spill] sm:$0xff]  ;;  %v14348_v43 = vld [vmem:[#allocation16_spill] sm:$0xff] }
 0x3fb   : > { %v10308_v34 = vpop.f32.mrf.mxu1  ;;  %v6304_v22 = vadd.f32 %v14343_v52, %v14342_v18  ;;  %v6303_v37 = vadd.f32 %v14346_v55, %v14345_v57  ;;  %v7091_v3 = vadd.f32 %v13785_v48, %v6697_v12  ;;  %v7554_v35 = vld [vmem:[#allocation2 + $0xe1] sm:$0xff]  ;;  %v14350_v48 = vld [vmem:[#allocation90_spill] sm:$0xff]  ;;  %v7043_v57 = vpop.f32.mrf.mxu0 }
 0x3fc   : > { %7644 = vst.msk [vmem:[%s13792_s23 + $0x58] sm:$0xff] %vm223_vm0, %v7612_v38  ;;  %v7611_v49 = vmax.f32 %v7579_v50, 0.0  ;;  %v7582_v20 = vadd.f32 %v7550_v32, %v7518_v62  ;;  %v7517_v61 = vadd.f32 %v13767_v31, %v7478_v39  ;;  %v7481_v30 = vadd.f32 %v10308_v34, %v7087_v44  ;;  %v14349_v38 = vld [vmem:[#allocation12_spill] sm:$0xff]  ;;  %v14352_v34 = vld [vmem:[#allocation15_spill] sm:$0xff] }
 0x3fd   : > { %v7377_v16 = vpop.f32.mrf.mxu1  ;;  %v6699_v53 = vadd.f32 %v14347_v42, %v6304_v22  ;;  %v6306_v50 = vadd.f32 %v14349_v38, %v14348_v43  ;;  %v7090_v62 = vadd.f32 %v13801_v13, %v6696_v25  ;;  %v6698_v39 = vadd.f32 %v14350_v48, %v6303_v37  ;;  %v7556_v13 = vld [vmem:[#allocation2 + $0xf9] sm:$0xff]  ;;  %v14357_v25 = vld [vmem:[#allocation41_spill] sm:$0xff] }
 0x3fe   : > { %7643 = vst.msk [vmem:[%s13792_s23 + $0x50] sm:$0xff] %vm223_vm0, %v7611_v49  ;;  %v7614_v19 = vmax.f32 %v7582_v20, 0.0  ;;  %v7581_v0 = vadd.f32 %v7549_v4, %v7517_v61  ;;  %v7520_v2 = vadd.f32 %v13767_v31, %v7481_v30  ;;  %v7480_v17 = vadd.f32 %v7377_v16, %v7086_v5  ;;  %v14351_v4 = vld [vmem:[#allocation39_spill] sm:$0xff]  ;;  %v14353_v61 = vld [vmem:[#allocation22_spill] sm:$0xff] }
 0x3ff   : > { %v10311_v11 = vpop.f32.mrf.mxu1  ;;  %v6305_v49 = vadd.f32 %v14352_v34, %v14351_v4  ;;  %v7093_v20 = vadd.f32 %v13817_v28, %v6699_v53  ;;  %v6701_v30 = vadd.f32 %v14353_v61, %v6306_v50  ;;  %v14355_v16 = vld [vmem:[#allocation38_spill] sm:$0xff]  ;;  %v14360_v53 = vld [vmem:[#allocation84_spill] sm:$0xff]  ;;  %v14366_v61 = vld [vmem:[#allocation19_spill] sm:$0xff] }
 0x400   : > { %7646 = vst.msk [vmem:[%s13792_s23 + $0x68] sm:$0xff] %vm223_vm0, %v7614_v19  ;;  %v7613_v9 = vmax.f32 %v7581_v0, 0.0  ;;  %v7584_v14 = vadd.f32 %v7552_v8, %v7520_v2  ;;  %v7519_v29 = vadd.f32 %v13767_v31, %v7480_v17  ;;  %v7483_v60 = vadd.f32 %v10311_v11, %v7089_v24  ;;  %v14354_v8 = vld [vmem:[#allocation91_spill] sm:$0xff]  ;;  %v7555_v17 = vld [vmem:[#allocation2 + $0xf1] sm:$0xff] }
 0x401   : > { %v7387_v6 = vpop.f32.mrf.mxu1  ;;  %v6308_v19 = vadd.f32 %v14355_v16, %v14354_v8  ;;  %v7092_v0 = vadd.f32 %v13833_v21, %v6698_v39  ;;  %v14356_v2 = vld [vmem:[#allocation23_spill] sm:$0xff]  ;;  %v7558_v21 = vld [vmem:[#allocation2 + $0x111] sm:$0xff] }
 0x402   : > { %7645 = vst.msk [vmem:[%s13792_s23 + $0x60] sm:$0xff] %vm223_vm0, %v7613_v9  ;;  %v7616_v44 = vmax.f32 %v7584_v14, 0.0  ;;  %v7583_v36 = vadd.f32 %v7551_v58, %v7519_v29  ;;  %v7522_v54 = vadd.f32 %v13767_v31, %v7483_v60  ;;  %v7482_v32 = vadd.f32 %v7387_v6, %v7088_v7  ;;  %v14358_v58 = vld [vmem:[#allocation83_spill] sm:$0xff]  ;;  %v14359_v14 = vld [vmem:[#allocation50_spill] sm:$0xff] }
 0x403   : > { %v10314_v26 = vpop.f32.mrf.mxu1  ;;  %v6700_v28 = vadd.f32 %v14356_v2, %v6305_v49  ;;  %v6307_v11 = vadd.f32 %v14358_v58, %v14357_v25  ;;  %v7095_v9 = vadd.f32 %v13849_v15, %v6701_v30  ;;  %v6703_v29 = vadd.f32 %v14359_v14, %v6308_v19  ;;  %v14363_v48 = vld [vmem:[#allocation18_spill] sm:$0xff]  ;;  %v14367_v30 = vld [vmem:[#allocation17_spill] sm:$0xff]  ;;  %v14370_v2 = vld [vmem:[#allocation43_spill] sm:$0xff] }
 0x404   : > { %7648 = vst.msk [vmem:[%s13792_s23 + $0x78] sm:$0xff] %vm223_vm0, %v7616_v44  ;;  %v7615_v46 = vmax.f32 %v7583_v36, 0.0  ;;  %v7586_v5 = vadd.f32 %v7554_v35, %v7522_v54  ;;  %v7521_v40 = vadd.f32 %v13767_v31, %v7482_v32  ;;  %v7485_v51 = vadd.f32 %v10314_v26, %v7091_v3  ;;  %v14361_v35 = vld [vmem:[#allocation44_spill] sm:$0xff]  ;;  %v14364_v39 = vld [vmem:[#allocation94_spill] sm:$0xff] }
 0x405   : > { %v7397_v56 = vpop.f32.mrf.mxu1  ;;  %v6310_v6 = vadd.f32 %v14361_v35, %v14360_v53  ;;  %v7094_v44 = vadd.f32 %v13865_v27, %v6700_v28  ;;  %v14362_v36 = vld [vmem:[#allocation92_spill] sm:$0xff]  ;;  %v7097_v26 = vadd.f32 %v13881_v23, %v6703_v29  ;;  %v14373_v14 = vld [vmem:[#allocation86_spill] sm:$0xff] }
 0x406   : > { %7647 = vst.msk [vmem:[%s13792_s23 + $0x70] sm:$0xff] %vm223_vm0, %v7615_v46  ;;  %v7618_v33 = vmax.f32 %v7586_v5, 0.0  ;;  %v7585_v24 = vadd.f32 %v7553_v59, %v7521_v40  ;;  %v7524_v63 = vadd.f32 %v13767_v31, %v7485_v51  ;;  %v7484_v12 = vadd.f32 %v7397_v56, %v7090_v62  ;;  %v7557_v54 = vld [vmem:[#allocation2 + $0x109] sm:$0xff]  ;;  %v10265_v51 = vpop.f32.mrf.mxu0 }
 0x407   : > { %v10317_v18 = vpop.f32.mrf.mxu1  ;;  %v6702_v15 = vadd.f32 %v14362_v36, %v6307_v11  ;;  %v6309_v59 = vadd.f32 %v14364_v39, %v14363_v48  ;;  %v14365_v46 = vld [vmem:[#allocation56_spill] sm:$0xff] }
 0x408   : > { %7650 = vst.msk [vmem:[%s13792_s23 + $0x88] sm:$0xff] %vm223_vm0, %v7618_v33  ;;  %v7617_v52 = vmax.f32 %v7585_v24, 0.0  ;;  %v7588_v22 = vadd.f32 %v7556_v13, %v7524_v63  ;;  %v7523_v7 = vadd.f32 %v13767_v31, %v7484_v12  ;;  %v7487_v1 = vadd.f32 %v10317_v18, %v7093_v20  ;;  %v7560_v27 = vld [vmem:[#allocation2 + $0x129] sm:$0xff]  ;;  %v7559_v24 = vld [vmem:[#allocation2 + $0x121] sm:$0xff] }
 0x409   : > { %v7407_v60 = vpop.f32.mrf.mxu1  ;;  %v6705_v5 = vadd.f32 %v14365_v46, %v6310_v6  ;;  %v6312_v13 = vadd.f32 %v14367_v30, %v14366_v61  ;;  %v7096_v56 = vadd.f32 %v13897_v47, %v6702_v15  ;;  %v14368_v33 = vld [vmem:[#allocation93_spill] sm:$0xff]  ;;  %v14376_v36 = vld [vmem:[#allocation48_spill] sm:$0xff] }
 0x40a   : > { %7649 = vst.msk [vmem:[%s13792_s23 + $0x80] sm:$0xff] %vm223_vm0, %v7617_v52  ;;  %v7620_v55 = vmax.f32 %v7588_v22, 0.0  ;;  %v7587_v37 = vadd.f32 %v7555_v17, %v7523_v7  ;;  %v7526_v3 = vadd.f32 %v13767_v31, %v7487_v1  ;;  %v7486_v42 = vadd.f32 %v7407_v60, %v7092_v0  ;;  %v14369_v0 = vld [vmem:[#allocation42_spill] sm:$0xff]  ;;  %v14371_v18 = vld [vmem:[#allocation25_spill] sm:$0xff]  ;;  %v7562_v22 = vld [vmem:[#allocation2 + $0x141] sm:$0xff]  ;;  %v7053_v7 = vpop.f32.mrf.mxu0 }
 0x40b   : > { %v10320_v32 = vpop.f32.mrf.mxu1  ;;  %v6704_v23 = vadd.f32 %v14368_v33, %v6309_v59  ;;  %v6311_v28 = vadd.f32 %v14370_v2, %v14369_v0  ;;  %v7099_v17 = vadd.f32 %v10262_v45, %v6705_v5  ;;  %v6707_v52 = vadd.f32 %v14371_v18, %v6312_v13  ;;  %v14374_v60 = vld [vmem:[#allocation55_spill] sm:$0xff] }
 0x40c   : > { %7652 = vst.msk [vmem:[%s13792_s23 + $0x98] sm:$0xff] %vm223_vm0, %v7620_v55  ;;  %v7619_v43 = vmax.f32 %v7587_v37, 0.0  ;;  %v7590_v38 = vadd.f32 %v7558_v21, %v7526_v3  ;;  %v7525_v50 = vadd.f32 %v13767_v31, %v7486_v42  ;;  %v7489_v62 = vadd.f32 %v10320_v32, %v7095_v9  ;;  %v14372_v9 = vld [vmem:[#allocation45_spill] sm:$0xff]  ;;  %v7561_v55 = vld [vmem:[#allocation2 + $0x139] sm:$0xff]  ;;  %v10268_v3 = vpop.f32.mrf.mxu0 }
 0x40d   : > { %v7417_v40 = vpop.f32.mrf.mxu1  ;;  %v6314_v29 = vadd.f32 %v14373_v14, %v14372_v9  ;;  %v7098_v21 = vadd.f32 %v7043_v57, %v6704_v23  ;;  %v6706_v45 = vadd.f32 %v14374_v60, %v6311_v28  ;;  %v7564_v57 = vld [vmem:[#allocation2 + $0x159] sm:$0xff] }
 0x40e   : > { %7651 = vst.msk [vmem:[%s13792_s23 + $0x90] sm:$0xff] %vm223_vm0, %v7619_v43  ;;  %v7622_v4 = vmax.f32 %v7590_v38, 0.0  ;;  %v7589_v34 = vadd.f32 %v7557_v54, %v7525_v50  ;;  %v7528_v49 = vadd.f32 %v13767_v31, %v7489_v62  ;;  %v7488_v20 = vadd.f32 %v7417_v40, %v7094_v44  ;;  %v14375_v44 = vld [vmem:[#allocation99_spill] sm:$0xff]  ;;  %v7063_v5 = vpop.f32.mrf.mxu0 }
 0x40f   : > { %v10323_v63 = vpop.f32.mrf.mxu1  ;;  %v6313_v15 = vadd.f32 %v14376_v36, %v14375_v44  ;;  %v7101_v54 = vadd.f32 %v10265_v51, %v6707_v52  ;;  %v6709_v32 = vadd.f32 %v13751_v10, %v6314_v29  ;;  %v7100_v39 = vadd.f32 %v7053_v7, %v6706_v45 }
 0x410   : > { %7654 = vst.msk [vmem:[%s13792_s23 + $0xa8] sm:$0xff] %vm223_vm0, %v7622_v4  ;;  %v7621_v12 = vmax.f32 %v7589_v34, 0.0  ;;  %v7592_v8 = vadd.f32 %v7560_v27, %v7528_v49  ;;  %v7527_v16 = vadd.f32 %v13767_v31, %v7488_v20  ;;  %v7491_v19 = vadd.f32 %v10323_v63, %v7097_v26  ;;  %v7563_v26 = vld [vmem:[#allocation2 + $0x151] sm:$0xff] }
 0x411   : > { %v7427_v47 = vpop.f32.mrf.mxu1  ;;  %v6708_v59 = vadd.f32 %v13755_v41, %v6313_v15  ;;  %v7103_v4 = vadd.f32 %v10268_v3, %v6709_v32  ;;  %v7566_v34 = vld [vmem:[#allocation2 + $0x171] sm:$0xff] }
 0x412   : > { %7653 = vst.msk [vmem:[%s13792_s23 + $0xa0] sm:$0xff] %vm223_vm0, %v7621_v12  ;;  %v7624_v1 = vmax.f32 %v7592_v8, 0.0  ;;  %v7591_v25 = vadd.f32 %v7559_v24, %v7527_v16  ;;  %v7530_v58 = vadd.f32 %v13767_v31, %v7491_v19  ;;  %v7490_v11 = vadd.f32 %v7427_v47, %v7096_v56  ;;  %v7565_v56 = vld [vmem:[#allocation2 + $0x169] sm:$0xff] }
 0x413   : > { %v10326_v37 = vpop.f32.mrf.mxu1  ;;  %v7102_v13 = vadd.f32 %v7063_v5, %v6708_v59  ;;  %v7568_v8 = vld [vmem:[#allocation2 + $0x189] sm:$0xff] }
 0x414   : > { %7656 = vst.msk [vmem:[%s13792_s23 + $0xb8] sm:$0xff] %vm223_vm0, %v7624_v1  ;;  %v7623_v42 = vmax.f32 %v7591_v25, 0.0  ;;  %v7594_v53 = vadd.f32 %v7562_v22, %v7530_v58  ;;  %v7529_v35 = vadd.f32 %v13767_v31, %v7490_v11  ;;  %v7493_v6 = vadd.f32 %v10326_v37, %v7099_v17  ;;  %v7567_v17 = vld [vmem:[#allocation2 + $0x181] sm:$0xff] }
 0x415   : > { %v7437_v43 = vpop.f32.mrf.mxu1 }
 0x416   : > { %7655 = vst.msk [vmem:[%s13792_s23 + $0xb0] sm:$0xff] %vm223_vm0, %v7623_v42  ;;  %v7626_v38 = vmax.f32 %v7594_v53, 0.0  ;;  %v7593_v50 = vadd.f32 %v7561_v55, %v7529_v35  ;;  %v7532_v62 = vadd.f32 %v13767_v31, %v7493_v6  ;;  %v7492_v48 = vadd.f32 %v7437_v43, %v7098_v21 }
 0x417   : > { %v10329_v46 = vpop.f32.mrf.mxu1 }
 0x418   : > { %7658 = vst.msk [vmem:[%s13792_s23 + $0xc8] sm:$0xff] %vm223_vm0, %v7626_v38  ;;  %v7625_v10 = vmax.f32 %v7593_v50, 0.0  ;;  %v7596_v27 = vadd.f32 %v7564_v57, %v7532_v62  ;;  %v7531_v40 = vadd.f32 %v13767_v31, %v7492_v48  ;;  %v7495_v51 = vadd.f32 %v10329_v46, %v7101_v54 }
 0x419   : > { %v7447_v49 = vpop.f32.mrf.mxu1 }
 0x41a   : > { %7657 = vst.msk [vmem:[%s13792_s23 + $0xc0] sm:$0xff] %vm223_vm0, %v7625_v10  ;;  %v7628_v20 = vmax.f32 %v7596_v27, 0.0  ;;  %v7595_v61 = vadd.f32 %v7563_v26, %v7531_v40  ;;  %v7534_v41 = vadd.f32 %v13767_v31, %v7495_v51  ;;  %v7494_v30 = vadd.f32 %v7447_v49, %v7100_v39 }
 0x41b   : > { %v10332_v33 = vpop.f32.mrf.mxu1 }
 0x41c   : > { %7660 = vst.msk [vmem:[%s13792_s23 + $0xd8] sm:$0xff] %vm223_vm0, %v7628_v20  ;;  %v7627_v23 = vmax.f32 %v7595_v61, 0.0  ;;  %v7598_v24 = vadd.f32 %v7566_v34, %v7534_v41  ;;  %v7533_v63 = vadd.f32 %v13767_v31, %v7494_v30  ;;  %v7497_v12 = vadd.f32 %v10332_v33, %v7103_v4 }
 0x41d   : > { %v7457_v16 = vpop.f32.mrf.mxu1 }
 0x41e   : > { %7659 = vst.msk [vmem:[%s13792_s23 + $0xd0] sm:$0xff] %vm223_vm0, %v7627_v23  ;;  %v7630_v19 = vmax.f32 %v7598_v24, 0.0  ;;  %v7597_v0 = vadd.f32 %v7565_v56, %v7533_v63  ;;  %v7536_v2 = vadd.f32 %v13767_v31, %v7497_v12  ;;  %v7496_v28 = vadd.f32 %v7457_v16, %v7102_v13 }
 0x420   : > { %7662 = vst.msk [vmem:[%s13792_s23 + $0xe8] sm:$0xff] %vm223_vm0, %v7630_v19  ;;  %v7629_v18 = vmax.f32 %v7597_v0, 0.0  ;;  %v7600_v52 = vadd.f32 %v7568_v8, %v7536_v2  ;;  %v7535_v22 = vadd.f32 %v13767_v31, %v7496_v28 }
 0x422   : > { %7661 = vst.msk [vmem:[%s13792_s23 + $0xe0] sm:$0xff] %vm223_vm0, %v7629_v18  ;;  %v7632_v47 = vmax.f32 %v7600_v52, 0.0  ;;  %v7599_v7 = vadd.f32 %v7567_v17, %v7535_v22 }
 0x424   : > { %7664 = vst.msk [vmem:[%s13792_s23 + $0xf8] sm:$0xff] %vm223_vm0, %v7632_v47  ;;  %v7631_v1 = vmax.f32 %v7599_v7, 0.0 }
 0x426   : > { %7663 = vst.msk [vmem:[%s13792_s23 + $0xf0] sm:$0xff] %vm223_vm0, %v7631_v1 }
 0x427   : > { %10388 = shalt.err (!%p10385_p3)
}
 0x428   : > { %s10389_s13 = scalar_lea.hbm %s13992_s7, 4096  ;;  %s10393_s15 = scalar_lea.hbm %s14047_s5, 8192 }
 0x429   : > { %p10390_p4 = scmp.ne.s32.totalorder %s13992_s7, %s10389_s13  ;;  %p10394_p9 = scmp.lt.s32.totalorder %s13992_s7, %s14047_s5 }
 0x42a   : > { %p10395_p10 = scmp.lt.s32.totalorder %s10393_s15, %s10389_s13 }
 0x42b   : > { %p10391_p7 = pnand %p10390_p4, %p10509_p5 }
 0x42c   : > { %p10396_p11 = por %p10395_p10, %p10394_p9 }
 0x42d   : > { %p10392_p8 = pneg %p10391_p7 }
 0x42f   : > { %p10397_p12 = pnand %p10396_p11, %p10392_p8 }
 0x431   : > { %10400 = shalt.err (!%p10397_p12)
}
 0x432   : > { %s10439_s23 = smov 128   ;;  %s10440_s25 = smov 8  }
 0x433   : > { %10333 = dma.vmem_to_hbm [thread:$0]  (%p10509_p5), %s13994_s26, 4096, %s13992_s7, %s14002_s22, %s10439_s23, %s10439_s23, %s10440_s25  }
 0x434 PF: > { %p10339_p13 = scmp.ge.s32.totalorder %s10435_s21, 2  ;;  %s7694_s30 = sand.u32 1, %s10423_s18  }
 0x435   : > { %s7695_s6 = scalar_lea.sflag [#allocation5], %s7694_s30 }
 0x436   : > { %p10336_p0 = pnand %p10339_p13, %p10513_p6 }
 0x438   : > { %p10337_p1 = pneg %p10336_p0 }
 0x43a   : > { %10418 = dma.done.wait (%p10337_p1), %s7695_s6, 4096  }
 0x43b   : > { %10420 = vsyncadd (%p10337_p1), %s7695_s6, 4294963200  ;;  %p15_p2 = scmp.ge.s32.totalorder %s10496_s24, 4   ;;  %s14377_s18 = smov %s10427_s19 }
 0x43c   : > { %s14378_s19 = smov %s10431_s20  ;;  %s14379_s20 = smov %s10507_s27 }
 0x43d   : > { %s14380_s21 = smov %s10496_s24  ;;  %17 = sbr.rel (!%p15_p2) target bundleno = 3 (0x3), region = 95 }
 0x442   :  { %7700 = vsyncpa [#allocation5], 1 }
 0x443   :  { %7702 = vsyncpa [#allocation5 + $0x1], 1 }

</bundles_post_ra>
